<compile_context>
chip_gen: v5e
topology: v5e:2x2
jax: 0.10.0
libtpu: 0.0.40
codegen_flags: <defaults>
</compile_context>

<pallas_src>
import jax
import jax.numpy as jnp
from jax.experimental import pallas as pl
from jax.experimental.pallas import tpu as pltpu

K = 4  # Conv1d kernel_size in the module


def _round_up(v, m):
    return (v + m - 1) // m * m


def _cnn1d_kernel(x_ref, w1_ref, b1_ref, w2_ref, b2_ref, w3_ref, b3_ref,
                  w4_ref, b4_ref, o_ref):
    # x_ref block : (1, S, Lx)           -> one batch element, all sensors
    # o_ref block : (1, S, C_pad, Lw_out) with Lw_out a multiple of 128
    S = x_ref.shape[1]
    C = w1_ref.shape[0]                  # padded channel count (multiple of 8)
    Lw_out = o_ref.shape[3]              # lane-dense output width

    xall = x_ref[0]                      # (S, Lx)
    w1 = w1_ref[...]                     # (C, K)

    # Static unroll over sensors (S is small, e.g. 21 at the real shape).
    for s in range(S):
        x_row = xall[s:s + 1, :]         # (1, Lx)

        # ---- conv_layer_1: 1 -> C channels, kernel 4, on the VPU ----------
        # Keep 3*(K-1)=9 extra columns so layers 2..4 can shrink by 3 each
        # and the final width is exactly Lw_out (lane-dense store).
        width = Lw_out + 3 * (K - 1)
        y = jnp.broadcast_to(b1_ref[...], (C, width))        # (C, width)
        for k in range(K):
            # (C,1) * (1,width) broadcast FMA (lane + sublane broadcasts).
            y = y + w1[:, k:k + 1] * x_row[:, k:k + width]

        # ---- conv_layer_2..4: 4 taps fused into the MXU contraction -------
        # w_ref is (C, K*C) with W[:, k*C:(k+1)*C] = torch_w[:, :, k].
        for w_ref, b_ref in ((w2_ref, b2_ref), (w3_ref, b3_ref),
                             (w4_ref, b4_ref)):
            width -= (K - 1)
            stacked = jnp.concatenate([y[:, k:k + width] for k in range(K)],
                                      axis=0)                # (K*C, width)
            y = jnp.dot(w_ref[...], stacked,
                        preferred_element_type=jnp.float32) + b_ref[...]

        # width == Lw_out here: a full, unmasked (C, Lw_out) store.
        o_ref[0, s, :, :] = y


@jax.jit
def cnn1d_forward(x, w1, b1, w2, b2, w3, b3, w4, b4):
    """x: (B, S, L) float.  Weights in PyTorch Conv1d layout:
         w1: (C, 1, K), w2..w4: (C, C, K), biases: (C,).
       Returns (B, S, C, L - 12) float32 (module runs f64; TPU has no f64)."""
    Bsz, S, L = x.shape
    C = w1.shape[0]
    Lout = L - 4 * (K - 1)

    C_pad = _round_up(C, 8)              # sublane-aligned channel count
    Lw_out = _round_up(Lout, 128)        # lane-dense output width
    Lx = Lw_out + 4 * (K - 1)            # padded input length (>= L)

    x_p = jnp.pad(x.astype(jnp.float32), ((0, 0), (0, 0), (0, Lx - L)))

    dc = C_pad - C
    # conv1 weight: (C, 1, K) -> (C_pad, K)
    w1_p = jnp.pad(w1[:, 0, :].astype(jnp.float32), ((0, dc), (0, 0)))

    def stack_taps(w):
        # (C_out, C_in, K) -> (C_pad, K*C_pad); taps laid out along the
        # contraction dim: W[:, k*C_pad:(k+1)*C_pad] = w[:, :, k].
        wp = jnp.pad(w.astype(jnp.float32), ((0, dc), (0, dc), (0, 0)))
        return jnp.transpose(wp, (0, 2, 1)).reshape(C_pad, K * C_pad)

    def col(b):
        return jnp.pad(b.astype(jnp.float32), (0, dc)).reshape(C_pad, 1)

    w2_p, w3_p, w4_p = stack_taps(w2), stack_taps(w3), stack_taps(w4)
    b1_p, b2_p, b3_p, b4_p = col(b1), col(b2), col(b3), col(b4)

    const2 = lambda b: (0, 0)

    out = pl.pallas_call(
        _cnn1d_kernel,
        out_shape=jax.ShapeDtypeStruct((Bsz, S, C_pad, Lw_out), jnp.float32),
        grid_spec=pltpu.PrefetchScalarGridSpec(
            num_scalar_prefetch=0,
            grid=(Bsz,),
            in_specs=[
                pl.BlockSpec((1, S, Lx), lambda b: (b, 0, 0)),      # x
                pl.BlockSpec((C_pad, K), const2),                   # w1
                pl.BlockSpec((C_pad, 1), const2),                   # b1
                pl.BlockSpec((C_pad, K * C_pad), const2),           # w2 stacked
                pl.BlockSpec((C_pad, 1), const2),                   # b2
                pl.BlockSpec((C_pad, K * C_pad), const2),           # w3 stacked
                pl.BlockSpec((C_pad, 1), const2),                   # b3
                pl.BlockSpec((C_pad, K * C_pad), const2),           # w4 stacked
                pl.BlockSpec((C_pad, 1), const2),                   # b4
            ],
            out_specs=pl.BlockSpec((1, S, C_pad, Lw_out),
                                   lambda b: (b, 0, 0, 0)),
        ),
        compiler_params=pltpu.CompilerParams(
            dimension_semantics=("parallel",)),
    )(x_p, w1_p, b1_p, w2_p, b2_p, w3_p, b3_p, w4_p, b4_p)

    # Slice off channel / time padding.
    return out[:, :, :C, :Lout]


# ---------------- pure-JAX reference (for correctness check) ----------------
def _conv1d_ref(x, w, b):
    # x: (B, Cin, L), w: (Cout, Cin, K), b: (Cout,)
    Lo = x.shape[-1] - (K - 1)
    out = b[None, :, None]
    for k in range(K):
        out = out + jnp.einsum('bil,oi->bol', x[:, :, k:k + Lo], w[:, :, k])
    return out


def cnn1d_ref(x, tw1, tb1, tw2, tb2, tw3, tb3, tw4, tb4):
    outs = []
    for i in range(x.shape[1]):
        row = x[:, i:i + 1, :]
        y = _conv1d_ref(row, tw1, tb1)
        y = _conv1d_ref(y, tw2, tb2)
        y = _conv1d_ref(y, tw3, tb3)
        y = _conv1d_ref(y, tw4, tb4)
        outs.append(y[:, None])
    return jnp.concatenate(outs, axis=1)


if __name__ == "__main__":
    # Small shapes consistent with the module (real defaults: S=21, L=150, C=120).
    Bsz, S, L, C = 2, 4, 28, 32

    key = jax.random.PRNGKey(0)
    keys = jax.random.split(key, 9)

    x = jax.random.normal(keys[0], (Bsz, S, L), dtype=jnp.float32)

    # PyTorch-style deterministic init: U(-1/sqrt(fan_in), 1/sqrt(fan_in))
    def uinit(k, shape, fan_in):
        bound = 1.0 / jnp.sqrt(float(fan_in))
        return jax.random.uniform(k, shape, jnp.float32, -bound, bound)

    tw1 = uinit(keys[1], (C, 1, K), 1 * K)       # conv_layer_1.weight
    tb1 = uinit(keys[2], (C,), 1 * K)
    tw2 = uinit(keys[3], (C, C, K), C * K)
    tb2 = uinit(keys[4], (C,), C * K)
    tw3 = uinit(keys[5], (C, C, K), C * K)
    tb3 = uinit(keys[6], (C,), C * K)
    tw4 = uinit(keys[7], (C, C, K), C * K)
    tb4 = uinit(keys[8], (C,), C * K)

    out = cnn1d_forward(x, tw1, tb1, tw2, tb2, tw3, tb3, tw4, tb4)
    out = jax.block_until_ready(out)

    ref = cnn1d_ref(x, tw1, tb1, tw2, tb2, tw3, tb3, tw4, tb4)
    ref = jax.block_until_ready(ref)

    assert out.shape == (Bsz, S, C, L - 12), out.shape
    assert jnp.allclose(out, ref, atol=1e-4, rtol=1e-4), \
        f"max abs err {jnp.max(jnp.abs(out - ref))}"

    print("KERNEL_OK")
</pallas_src>

<mosaic_0001>
module attributes {stable_mosaic.version = 11 : i64} {
  func.func @_cnn1d_kernel(%arg0: i32, %arg1: memref<1x4x140xf32, #tpu.memory_space<vmem>>, %arg2: memref<32x4xf32, #tpu.memory_space<vmem>>, %arg3: memref<32x1xf32, #tpu.memory_space<vmem>>, %arg4: memref<32x128xf32, #tpu.memory_space<vmem>>, %arg5: memref<32x1xf32, #tpu.memory_space<vmem>>, %arg6: memref<32x128xf32, #tpu.memory_space<vmem>>, %arg7: memref<32x1xf32, #tpu.memory_space<vmem>>, %arg8: memref<32x128xf32, #tpu.memory_space<vmem>>, %arg9: memref<32x1xf32, #tpu.memory_space<vmem>>, %arg10: memref<1x4x32x128xf32, #tpu.memory_space<vmem>>) attributes {dimension_semantics = [#tpu.dimension_semantics<parallel>], iteration_bounds = array<i64: 2>, scalar_prefetch = 0 : i64, scratch_operands = 0 : i64, tpu.core_type = #tpu.core_type<tc>, window_params = [{transform_indices = @transform_0, window_bounds = array<i64: 1, 4, 140>}, {pipeline_mode = #tpu.pipeline_mode<synchronous>, transform_indices = @transform_1, window_bounds = array<i64: 32, 4>}, {pipeline_mode = #tpu.pipeline_mode<synchronous>, transform_indices = @transform_2, window_bounds = array<i64: 32, 1>}, {pipeline_mode = #tpu.pipeline_mode<synchronous>, transform_indices = @transform_3, window_bounds = array<i64: 32, 128>}, {pipeline_mode = #tpu.pipeline_mode<synchronous>, transform_indices = @transform_4, window_bounds = array<i64: 32, 1>}, {pipeline_mode = #tpu.pipeline_mode<synchronous>, transform_indices = @transform_5, window_bounds = array<i64: 32, 128>}, {pipeline_mode = #tpu.pipeline_mode<synchronous>, transform_indices = @transform_6, window_bounds = array<i64: 32, 1>}, {pipeline_mode = #tpu.pipeline_mode<synchronous>, transform_indices = @transform_7, window_bounds = array<i64: 32, 128>}, {pipeline_mode = #tpu.pipeline_mode<synchronous>, transform_indices = @transform_8, window_bounds = array<i64: 32, 1>}, {transform_indices = @transform_9, window_bounds = array<i64: 1, 4, 32, 128>}]} {
    %c0 = arith.constant 0 : index
    %c0_0 = arith.constant 0 : index
    %c0_1 = arith.constant 0 : index
    %0 = vector.load %arg1[%c0, %c0_0, %c0_1] : memref<1x4x140xf32, #tpu.memory_space<vmem>>, vector<1x4x140xf32>
    %1 = vector.shape_cast %0 : vector<1x4x140xf32> to vector<4x140xf32>
    %c0_2 = arith.constant 0 : index
    %c0_3 = arith.constant 0 : index
    %2 = vector.load %arg2[%c0_2, %c0_3] : memref<32x4xf32, #tpu.memory_space<vmem>>, vector<32x4xf32>
    %3 = vector.extract_strided_slice %1 {offsets = [0, 0], sizes = [1, 140], strides = [1, 1]} : vector<4x140xf32> to vector<1x140xf32>
    %c0_4 = arith.constant 0 : index
    %c0_5 = arith.constant 0 : index
    %4 = vector.load %arg3[%c0_4, %c0_5] : memref<32x1xf32, #tpu.memory_space<vmem>>, vector<32x1xf32>
    %5 = vector.shape_cast %4 : vector<32x1xf32> to vector<32x1xf32>
    %6 = vector.broadcast %5 : vector<32x1xf32> to vector<32x137xf32>
    %7 = vector.extract_strided_slice %2 {offsets = [0, 0], sizes = [32, 1], strides = [1, 1]} : vector<32x4xf32> to vector<32x1xf32>
    %8 = vector.extract_strided_slice %3 {offsets = [0, 0], sizes = [1, 137], strides = [1, 1]} : vector<1x140xf32> to vector<1x137xf32>
    %9 = vector.broadcast %7 : vector<32x1xf32> to vector<32x137xf32>
    %10 = vector.broadcast %8 : vector<1x137xf32> to vector<32x137xf32>
    %11 = arith.mulf %9, %10 : vector<32x137xf32>
    %12 = arith.addf %6, %11 : vector<32x137xf32>
    %13 = vector.extract_strided_slice %2 {offsets = [0, 1], sizes = [32, 1], strides = [1, 1]} : vector<32x4xf32> to vector<32x1xf32>
    %14 = vector.extract_strided_slice %3 {offsets = [0, 1], sizes = [1, 137], strides = [1, 1]} : vector<1x140xf32> to vector<1x137xf32>
    %15 = vector.broadcast %13 : vector<32x1xf32> to vector<32x137xf32>
    %16 = vector.broadcast %14 : vector<1x137xf32> to vector<32x137xf32>
    %17 = arith.mulf %15, %16 : vector<32x137xf32>
    %18 = arith.addf %12, %17 : vector<32x137xf32>
    %19 = vector.extract_strided_slice %2 {offsets = [0, 2], sizes = [32, 1], strides = [1, 1]} : vector<32x4xf32> to vector<32x1xf32>
    %20 = vector.extract_strided_slice %3 {offsets = [0, 2], sizes = [1, 137], strides = [1, 1]} : vector<1x140xf32> to vector<1x137xf32>
    %21 = vector.broadcast %19 : vector<32x1xf32> to vector<32x137xf32>
    %22 = vector.broadcast %20 : vector<1x137xf32> to vector<32x137xf32>
    %23 = arith.mulf %21, %22 : vector<32x137xf32>
    %24 = arith.addf %18, %23 : vector<32x137xf32>
    %25 = vector.extract_strided_slice %2 {offsets = [0, 3], sizes = [32, 1], strides = [1, 1]} : vector<32x4xf32> to vector<32x1xf32>
    %26 = vector.extract_strided_slice %3 {offsets = [0, 3], sizes = [1, 137], strides = [1, 1]} : vector<1x140xf32> to vector<1x137xf32>
    %27 = vector.broadcast %25 : vector<32x1xf32> to vector<32x137xf32>
    %28 = vector.broadcast %26 : vector<1x137xf32> to vector<32x137xf32>
    %29 = arith.mulf %27, %28 : vector<32x137xf32>
    %30 = arith.addf %24, %29 : vector<32x137xf32>
    %31 = vector.extract_strided_slice %30 {offsets = [0, 0], sizes = [32, 134], strides = [1, 1]} : vector<32x137xf32> to vector<32x134xf32>
    %32 = vector.extract_strided_slice %30 {offsets = [0, 1], sizes = [32, 134], strides = [1, 1]} : vector<32x137xf32> to vector<32x134xf32>
    %33 = vector.extract_strided_slice %30 {offsets = [0, 2], sizes = [32, 134], strides = [1, 1]} : vector<32x137xf32> to vector<32x134xf32>
    %34 = vector.extract_strided_slice %30 {offsets = [0, 3], sizes = [32, 134], strides = [1, 1]} : vector<32x137xf32> to vector<32x134xf32>
    %35 = tpu.concatenate %31, %32, %33, %34 in 0 : vector<32x134xf32>, vector<32x134xf32>, vector<32x134xf32>, vector<32x134xf32> -> vector<128x134xf32>
    %c0_6 = arith.constant 0 : index
    %c0_7 = arith.constant 0 : index
    %36 = vector.load %arg4[%c0_6, %c0_7] : memref<32x128xf32, #tpu.memory_space<vmem>>, vector<32x128xf32>
    %cst = arith.constant dense<0.000000e+00> : vector<32x134xf32>
    %37 = tpu.matmul %36, %35, %cst {dimension_numbers = #tpu.dot_dimension_numbers<[1], [0], [0], [1], [0, 0, 1, 1], [], []>} : vector<32x128xf32>, vector<128x134xf32>, vector<32x134xf32> -> vector<32x134xf32>
    %c0_8 = arith.constant 0 : index
    %c0_9 = arith.constant 0 : index
    %38 = vector.load %arg5[%c0_8, %c0_9] : memref<32x1xf32, #tpu.memory_space<vmem>>, vector<32x1xf32>
    %39 = vector.broadcast %38 : vector<32x1xf32> to vector<32x134xf32>
    %40 = arith.addf %37, %39 : vector<32x134xf32>
    %41 = vector.extract_strided_slice %40 {offsets = [0, 0], sizes = [32, 131], strides = [1, 1]} : vector<32x134xf32> to vector<32x131xf32>
    %42 = vector.extract_strided_slice %40 {offsets = [0, 1], sizes = [32, 131], strides = [1, 1]} : vector<32x134xf32> to vector<32x131xf32>
    %43 = vector.extract_strided_slice %40 {offsets = [0, 2], sizes = [32, 131], strides = [1, 1]} : vector<32x134xf32> to vector<32x131xf32>
    %44 = vector.extract_strided_slice %40 {offsets = [0, 3], sizes = [32, 131], strides = [1, 1]} : vector<32x134xf32> to vector<32x131xf32>
    %45 = tpu.concatenate %41, %42, %43, %44 in 0 : vector<32x131xf32>, vector<32x131xf32>, vector<32x131xf32>, vector<32x131xf32> -> vector<128x131xf32>
    %c0_10 = arith.constant 0 : index
    %c0_11 = arith.constant 0 : index
    %46 = vector.load %arg6[%c0_10, %c0_11] : memref<32x128xf32, #tpu.memory_space<vmem>>, vector<32x128xf32>
    %cst_12 = arith.constant dense<0.000000e+00> : vector<32x131xf32>
    %47 = tpu.matmul %46, %45, %cst_12 {dimension_numbers = #tpu.dot_dimension_numbers<[1], [0], [0], [1], [0, 0, 1, 1], [], []>} : vector<32x128xf32>, vector<128x131xf32>, vector<32x131xf32> -> vector<32x131xf32>
    %c0_13 = arith.constant 0 : index
    %c0_14 = arith.constant 0 : index
    %48 = vector.load %arg7[%c0_13, %c0_14] : memref<32x1xf32, #tpu.memory_space<vmem>>, vector<32x1xf32>
    %49 = vector.broadcast %48 : vector<32x1xf32> to vector<32x131xf32>
    %50 = arith.addf %47, %49 : vector<32x131xf32>
    %51 = vector.extract_strided_slice %50 {offsets = [0, 0], sizes = [32, 128], strides = [1, 1]} : vector<32x131xf32> to vector<32x128xf32>
    %52 = vector.extract_strided_slice %50 {offsets = [0, 1], sizes = [32, 128], strides = [1, 1]} : vector<32x131xf32> to vector<32x128xf32>
    %53 = vector.extract_strided_slice %50 {offsets = [0, 2], sizes = [32, 128], strides = [1, 1]} : vector<32x131xf32> to vector<32x128xf32>
    %54 = vector.extract_strided_slice %50 {offsets = [0, 3], sizes = [32, 128], strides = [1, 1]} : vector<32x131xf32> to vector<32x128xf32>
    %55 = tpu.concatenate %51, %52, %53, %54 in 0 : vector<32x128xf32>, vector<32x128xf32>, vector<32x128xf32>, vector<32x128xf32> -> vector<128x128xf32>
    %c0_15 = arith.constant 0 : index
    %c0_16 = arith.constant 0 : index
    %56 = vector.load %arg8[%c0_15, %c0_16] : memref<32x128xf32, #tpu.memory_space<vmem>>, vector<32x128xf32>
    %cst_17 = arith.constant dense<0.000000e+00> : vector<32x128xf32>
    %57 = tpu.matmul %56, %55, %cst_17 {dimension_numbers = #tpu.dot_dimension_numbers<[1], [0], [0], [1], [0, 0, 1, 1], [], []>} : vector<32x128xf32>, vector<128x128xf32>, vector<32x128xf32> -> vector<32x128xf32>
    %c0_18 = arith.constant 0 : index
    %c0_19 = arith.constant 0 : index
    %58 = vector.load %arg9[%c0_18, %c0_19] : memref<32x1xf32, #tpu.memory_space<vmem>>, vector<32x1xf32>
    %59 = vector.broadcast %58 : vector<32x1xf32> to vector<32x128xf32>
    %60 = arith.addf %57, %59 : vector<32x128xf32>
    %c0_20 = arith.constant 0 : index
    %c0_21 = arith.constant 0 : index
    %c0_22 = arith.constant 0 : index
    %c0_23 = arith.constant 0 : index
    %61 = vector.load %arg10[%c0_20, %c0_21, %c0_22, %c0_23] : memref<1x4x32x128xf32, #tpu.memory_space<vmem>>, vector<1x1x32x128xf32>
    %62 = vector.shape_cast %61 : vector<1x1x32x128xf32> to vector<32x128xf32>
    %63 = vector.shape_cast %60 : vector<32x128xf32> to vector<1x1x32x128xf32>
    tpu.vector_store %arg10[%c0_20, %c0_21, %c0_22, %c0_23], %63 {strides = array<i32>} : memref<1x4x32x128xf32, #tpu.memory_space<vmem>>, vector<1x1x32x128xf32>,
    %64 = vector.extract_strided_slice %1 {offsets = [1, 0], sizes = [1, 140], strides = [1, 1]} : vector<4x140xf32> to vector<1x140xf32>
    %c0_24 = arith.constant 0 : index
    %c0_25 = arith.constant 0 : index
    %65 = vector.load %arg3[%c0_24, %c0_25] : memref<32x1xf32, #tpu.memory_space<vmem>>, vector<32x1xf32>
    %66 = vector.shape_cast %65 : vector<32x1xf32> to vector<32x1xf32>
    %67 = vector.broadcast %66 : vector<32x1xf32> to vector<32x137xf32>
    %68 = vector.extract_strided_slice %2 {offsets = [0, 0], sizes = [32, 1], strides = [1, 1]} : vector<32x4xf32> to vector<32x1xf32>
    %69 = vector.extract_strided_slice %64 {offsets = [0, 0], sizes = [1, 137], strides = [1, 1]} : vector<1x140xf32> to vector<1x137xf32>
    %70 = vector.broadcast %68 : vector<32x1xf32> to vector<32x137xf32>
    %71 = vector.broadcast %69 : vector<1x137xf32> to vector<32x137xf32>
    %72 = arith.mulf %70, %71 : vector<32x137xf32>
    %73 = arith.addf %67, %72 : vector<32x137xf32>
    %74 = vector.extract_strided_slice %2 {offsets = [0, 1], sizes = [32, 1], strides = [1, 1]} : vector<32x4xf32> to vector<32x1xf32>
    %75 = vector.extract_strided_slice %64 {offsets = [0, 1], sizes = [1, 137], strides = [1, 1]} : vector<1x140xf32> to vector<1x137xf32>
    %76 = vector.broadcast %74 : vector<32x1xf32> to vector<32x137xf32>
    %77 = vector.broadcast %75 : vector<1x137xf32> to vector<32x137xf32>
    %78 = arith.mulf %76, %77 : vector<32x137xf32>
    %79 = arith.addf %73, %78 : vector<32x137xf32>
    %80 = vector.extract_strided_slice %2 {offsets = [0, 2], sizes = [32, 1], strides = [1, 1]} : vector<32x4xf32> to vector<32x1xf32>
    %81 = vector.extract_strided_slice %64 {offsets = [0, 2], sizes = [1, 137], strides = [1, 1]} : vector<1x140xf32> to vector<1x137xf32>
    %82 = vector.broadcast %80 : vector<32x1xf32> to vector<32x137xf32>
    %83 = vector.broadcast %81 : vector<1x137xf32> to vector<32x137xf32>
    %84 = arith.mulf %82, %83 : vector<32x137xf32>
    %85 = arith.addf %79, %84 : vector<32x137xf32>
    %86 = vector.extract_strided_slice %2 {offsets = [0, 3], sizes = [32, 1], strides = [1, 1]} : vector<32x4xf32> to vector<32x1xf32>
    %87 = vector.extract_strided_slice %64 {offsets = [0, 3], sizes = [1, 137], strides = [1, 1]} : vector<1x140xf32> to vector<1x137xf32>
    %88 = vector.broadcast %86 : vector<32x1xf32> to vector<32x137xf32>
    %89 = vector.broadcast %87 : vector<1x137xf32> to vector<32x137xf32>
    %90 = arith.mulf %88, %89 : vector<32x137xf32>
    %91 = arith.addf %85, %90 : vector<32x137xf32>
    %92 = vector.extract_strided_slice %91 {offsets = [0, 0], sizes = [32, 134], strides = [1, 1]} : vector<32x137xf32> to vector<32x134xf32>
    %93 = vector.extract_strided_slice %91 {offsets = [0, 1], sizes = [32, 134], strides = [1, 1]} : vector<32x137xf32> to vector<32x134xf32>
    %94 = vector.extract_strided_slice %91 {offsets = [0, 2], sizes = [32, 134], strides = [1, 1]} : vector<32x137xf32> to vector<32x134xf32>
    %95 = vector.extract_strided_slice %91 {offsets = [0, 3], sizes = [32, 134], strides = [1, 1]} : vector<32x137xf32> to vector<32x134xf32>
    %96 = tpu.concatenate %92, %93, %94, %95 in 0 : vector<32x134xf32>, vector<32x134xf32>, vector<32x134xf32>, vector<32x134xf32> -> vector<128x134xf32>
    %c0_26 = arith.constant 0 : index
    %c0_27 = arith.constant 0 : index
    %97 = vector.load %arg4[%c0_26, %c0_27] : memref<32x128xf32, #tpu.memory_space<vmem>>, vector<32x128xf32>
    %cst_28 = arith.constant dense<0.000000e+00> : vector<32x134xf32>
    %98 = tpu.matmul %97, %96, %cst_28 {dimension_numbers = #tpu.dot_dimension_numbers<[1], [0], [0], [1], [0, 0, 1, 1], [], []>} : vector<32x128xf32>, vector<128x134xf32>, vector<32x134xf32> -> vector<32x134xf32>
    %c0_29 = arith.constant 0 : index
    %c0_30 = arith.constant 0 : index
    %99 = vector.load %arg5[%c0_29, %c0_30] : memref<32x1xf32, #tpu.memory_space<vmem>>, vector<32x1xf32>
    %100 = vector.broadcast %99 : vector<32x1xf32> to vector<32x134xf32>
    %101 = arith.addf %98, %100 : vector<32x134xf32>
    %102 = vector.extract_strided_slice %101 {offsets = [0, 0], sizes = [32, 131], strides = [1, 1]} : vector<32x134xf32> to vector<32x131xf32>
    %103 = vector.extract_strided_slice %101 {offsets = [0, 1], sizes = [32, 131], strides = [1, 1]} : vector<32x134xf32> to vector<32x131xf32>
    %104 = vector.extract_strided_slice %101 {offsets = [0, 2], sizes = [32, 131], strides = [1, 1]} : vector<32x134xf32> to vector<32x131xf32>
    %105 = vector.extract_strided_slice %101 {offsets = [0, 3], sizes = [32, 131], strides = [1, 1]} : vector<32x134xf32> to vector<32x131xf32>
    %106 = tpu.concatenate %102, %103, %104, %105 in 0 : vector<32x131xf32>, vector<32x131xf32>, vector<32x131xf32>, vector<32x131xf32> -> vector<128x131xf32>
    %c0_31 = arith.constant 0 : index
    %c0_32 = arith.constant 0 : index
    %107 = vector.load %arg6[%c0_31, %c0_32] : memref<32x128xf32, #tpu.memory_space<vmem>>, vector<32x128xf32>
    %cst_33 = arith.constant dense<0.000000e+00> : vector<32x131xf32>
    %108 = tpu.matmul %107, %106, %cst_33 {dimension_numbers = #tpu.dot_dimension_numbers<[1], [0], [0], [1], [0, 0, 1, 1], [], []>} : vector<32x128xf32>, vector<128x131xf32>, vector<32x131xf32> -> vector<32x131xf32>
    %c0_34 = arith.constant 0 : index
    %c0_35 = arith.constant 0 : index
    %109 = vector.load %arg7[%c0_34, %c0_35] : memref<32x1xf32, #tpu.memory_space<vmem>>, vector<32x1xf32>
    %110 = vector.broadcast %109 : vector<32x1xf32> to vector<32x131xf32>
    %111 = arith.addf %108, %110 : vector<32x131xf32>
    %112 = vector.extract_strided_slice %111 {offsets = [0, 0], sizes = [32, 128], strides = [1, 1]} : vector<32x131xf32> to vector<32x128xf32>
    %113 = vector.extract_strided_slice %111 {offsets = [0, 1], sizes = [32, 128], strides = [1, 1]} : vector<32x131xf32> to vector<32x128xf32>
    %114 = vector.extract_strided_slice %111 {offsets = [0, 2], sizes = [32, 128], strides = [1, 1]} : vector<32x131xf32> to vector<32x128xf32>
    %115 = vector.extract_strided_slice %111 {offsets = [0, 3], sizes = [32, 128], strides = [1, 1]} : vector<32x131xf32> to vector<32x128xf32>
    %116 = tpu.concatenate %112, %113, %114, %115 in 0 : vector<32x128xf32>, vector<32x128xf32>, vector<32x128xf32>, vector<32x128xf32> -> vector<128x128xf32>
    %c0_36 = arith.constant 0 : index
    %c0_37 = arith.constant 0 : index
    %117 = vector.load %arg8[%c0_36, %c0_37] : memref<32x128xf32, #tpu.memory_space<vmem>>, vector<32x128xf32>
    %cst_38 = arith.constant dense<0.000000e+00> : vector<32x128xf32>
    %118 = tpu.matmul %117, %116, %cst_38 {dimension_numbers = #tpu.dot_dimension_numbers<[1], [0], [0], [1], [0, 0, 1, 1], [], []>} : vector<32x128xf32>, vector<128x128xf32>, vector<32x128xf32> -> vector<32x128xf32>
    %c0_39 = arith.constant 0 : index
    %c0_40 = arith.constant 0 : index
    %119 = vector.load %arg9[%c0_39, %c0_40] : memref<32x1xf32, #tpu.memory_space<vmem>>, vector<32x1xf32>
    %120 = vector.broadcast %119 : vector<32x1xf32> to vector<32x128xf32>
    %121 = arith.addf %118, %120 : vector<32x128xf32>
    %c0_41 = arith.constant 0 : index
    %c1 = arith.constant 1 : index
    %c0_42 = arith.constant 0 : index
    %c0_43 = arith.constant 0 : index
    %122 = vector.load %arg10[%c0_41, %c1, %c0_42, %c0_43] : memref<1x4x32x128xf32, #tpu.memory_space<vmem>>, vector<1x1x32x128xf32>
    %123 = vector.shape_cast %122 : vector<1x1x32x128xf32> to vector<32x128xf32>
    %124 = vector.shape_cast %121 : vector<32x128xf32> to vector<1x1x32x128xf32>
    tpu.vector_store %arg10[%c0_41, %c1, %c0_42, %c0_43], %124 {strides = array<i32>} : memref<1x4x32x128xf32, #tpu.memory_space<vmem>>, vector<1x1x32x128xf32>,
    %125 = vector.extract_strided_slice %1 {offsets = [2, 0], sizes = [1, 140], strides = [1, 1]} : vector<4x140xf32> to vector<1x140xf32>
    %c0_44 = arith.constant 0 : index
    %c0_45 = arith.constant 0 : index
    %126 = vector.load %arg3[%c0_44, %c0_45] : memref<32x1xf32, #tpu.memory_space<vmem>>, vector<32x1xf32>
    %127 = vector.shape_cast %126 : vector<32x1xf32> to vector<32x1xf32>
    %128 = vector.broadcast %127 : vector<32x1xf32> to vector<32x137xf32>
    %129 = vector.extract_strided_slice %2 {offsets = [0, 0], sizes = [32, 1], strides = [1, 1]} : vector<32x4xf32> to vector<32x1xf32>
    %130 = vector.extract_strided_slice %125 {offsets = [0, 0], sizes = [1, 137], strides = [1, 1]} : vector<1x140xf32> to vector<1x137xf32>
    %131 = vector.broadcast %129 : vector<32x1xf32> to vector<32x137xf32>
    %132 = vector.broadcast %130 : vector<1x137xf32> to vector<32x137xf32>
    %133 = arith.mulf %131, %132 : vector<32x137xf32>
    %134 = arith.addf %128, %133 : vector<32x137xf32>
    %135 = vector.extract_strided_slice %2 {offsets = [0, 1], sizes = [32, 1], strides = [1, 1]} : vector<32x4xf32> to vector<32x1xf32>
    %136 = vector.extract_strided_slice %125 {offsets = [0, 1], sizes = [1, 137], strides = [1, 1]} : vector<1x140xf32> to vector<1x137xf32>
    %137 = vector.broadcast %135 : vector<32x1xf32> to vector<32x137xf32>
    %138 = vector.broadcast %136 : vector<1x137xf32> to vector<32x137xf32>
    %139 = arith.mulf %137, %138 : vector<32x137xf32>
    %140 = arith.addf %134, %139 : vector<32x137xf32>
    %141 = vector.extract_strided_slice %2 {offsets = [0, 2], sizes = [32, 1], strides = [1, 1]} : vector<32x4xf32> to vector<32x1xf32>
    %142 = vector.extract_strided_slice %125 {offsets = [0, 2], sizes = [1, 137], strides = [1, 1]} : vector<1x140xf32> to vector<1x137xf32>
    %143 = vector.broadcast %141 : vector<32x1xf32> to vector<32x137xf32>
    %144 = vector.broadcast %142 : vector<1x137xf32> to vector<32x137xf32>
    %145 = arith.mulf %143, %144 : vector<32x137xf32>
    %146 = arith.addf %140, %145 : vector<32x137xf32>
    %147 = vector.extract_strided_slice %2 {offsets = [0, 3], sizes = [32, 1], strides = [1, 1]} : vector<32x4xf32> to vector<32x1xf32>
    %148 = vector.extract_strided_slice %125 {offsets = [0, 3], sizes = [1, 137], strides = [1, 1]} : vector<1x140xf32> to vector<1x137xf32>
    %149 = vector.broadcast %147 : vector<32x1xf32> to vector<32x137xf32>
    %150 = vector.broadcast %148 : vector<1x137xf32> to vector<32x137xf32>
    %151 = arith.mulf %149, %150 : vector<32x137xf32>
    %152 = arith.addf %146, %151 : vector<32x137xf32>
    %153 = vector.extract_strided_slice %152 {offsets = [0, 0], sizes = [32, 134], strides = [1, 1]} : vector<32x137xf32> to vector<32x134xf32>
    %154 = vector.extract_strided_slice %152 {offsets = [0, 1], sizes = [32, 134], strides = [1, 1]} : vector<32x137xf32> to vector<32x134xf32>
    %155 = vector.extract_strided_slice %152 {offsets = [0, 2], sizes = [32, 134], strides = [1, 1]} : vector<32x137xf32> to vector<32x134xf32>
    %156 = vector.extract_strided_slice %152 {offsets = [0, 3], sizes = [32, 134], strides = [1, 1]} : vector<32x137xf32> to vector<32x134xf32>
    %157 = tpu.concatenate %153, %154, %155, %156 in 0 : vector<32x134xf32>, vector<32x134xf32>, vector<32x134xf32>, vector<32x134xf32> -> vector<128x134xf32>
    %c0_46 = arith.constant 0 : index
    %c0_47 = arith.constant 0 : index
    %158 = vector.load %arg4[%c0_46, %c0_47] : memref<32x128xf32, #tpu.memory_space<vmem>>, vector<32x128xf32>
    %cst_48 = arith.constant dense<0.000000e+00> : vector<32x134xf32>
    %159 = tpu.matmul %158, %157, %cst_48 {dimension_numbers = #tpu.dot_dimension_numbers<[1], [0], [0], [1], [0, 0, 1, 1], [], []>} : vector<32x128xf32>, vector<128x134xf32>, vector<32x134xf32> -> vector<32x134xf32>
    %c0_49 = arith.constant 0 : index
    %c0_50 = arith.constant 0 : index
    %160 = vector.load %arg5[%c0_49, %c0_50] : memref<32x1xf32, #tpu.memory_space<vmem>>, vector<32x1xf32>
    %161 = vector.broadcast %160 : vector<32x1xf32> to vector<32x134xf32>
    %162 = arith.addf %159, %161 : vector<32x134xf32>
    %163 = vector.extract_strided_slice %162 {offsets = [0, 0], sizes = [32, 131], strides = [1, 1]} : vector<32x134xf32> to vector<32x131xf32>
    %164 = vector.extract_strided_slice %162 {offsets = [0, 1], sizes = [32, 131], strides = [1, 1]} : vector<32x134xf32> to vector<32x131xf32>
    %165 = vector.extract_strided_slice %162 {offsets = [0, 2], sizes = [32, 131], strides = [1, 1]} : vector<32x134xf32> to vector<32x131xf32>
    %166 = vector.extract_strided_slice %162 {offsets = [0, 3], sizes = [32, 131], strides = [1, 1]} : vector<32x134xf32> to vector<32x131xf32>
    %167 = tpu.concatenate %163, %164, %165, %166 in 0 : vector<32x131xf32>, vector<32x131xf32>, vector<32x131xf32>, vector<32x131xf32> -> vector<128x131xf32>
    %c0_51 = arith.constant 0 : index
    %c0_52 = arith.constant 0 : index
    %168 = vector.load %arg6[%c0_51, %c0_52] : memref<32x128xf32, #tpu.memory_space<vmem>>, vector<32x128xf32>
    %cst_53 = arith.constant dense<0.000000e+00> : vector<32x131xf32>
    %169 = tpu.matmul %168, %167, %cst_53 {dimension_numbers = #tpu.dot_dimension_numbers<[1], [0], [0], [1], [0, 0, 1, 1], [], []>} : vector<32x128xf32>, vector<128x131xf32>, vector<32x131xf32> -> vector<32x131xf32>
    %c0_54 = arith.constant 0 : index
    %c0_55 = arith.constant 0 : index
    %170 = vector.load %arg7[%c0_54, %c0_55] : memref<32x1xf32, #tpu.memory_space<vmem>>, vector<32x1xf32>
    %171 = vector.broadcast %170 : vector<32x1xf32> to vector<32x131xf32>
    %172 = arith.addf %169, %171 : vector<32x131xf32>
    %173 = vector.extract_strided_slice %172 {offsets = [0, 0], sizes = [32, 128], strides = [1, 1]} : vector<32x131xf32> to vector<32x128xf32>
    %174 = vector.extract_strided_slice %172 {offsets = [0, 1], sizes = [32, 128], strides = [1, 1]} : vector<32x131xf32> to vector<32x128xf32>
    %175 = vector.extract_strided_slice %172 {offsets = [0, 2], sizes = [32, 128], strides = [1, 1]} : vector<32x131xf32> to vector<32x128xf32>
    %176 = vector.extract_strided_slice %172 {offsets = [0, 3], sizes = [32, 128], strides = [1, 1]} : vector<32x131xf32> to vector<32x128xf32>
    %177 = tpu.concatenate %173, %174, %175, %176 in 0 : vector<32x128xf32>, vector<32x128xf32>, vector<32x128xf32>, vector<32x128xf32> -> vector<128x128xf32>
    %c0_56 = arith.constant 0 : index
    %c0_57 = arith.constant 0 : index
    %178 = vector.load %arg8[%c0_56, %c0_57] : memref<32x128xf32, #tpu.memory_space<vmem>>, vector<32x128xf32>
    %cst_58 = arith.constant dense<0.000000e+00> : vector<32x128xf32>
    %179 = tpu.matmul %178, %177, %cst_58 {dimension_numbers = #tpu.dot_dimension_numbers<[1], [0], [0], [1], [0, 0, 1, 1], [], []>} : vector<32x128xf32>, vector<128x128xf32>, vector<32x128xf32> -> vector<32x128xf32>
    %c0_59 = arith.constant 0 : index
    %c0_60 = arith.constant 0 : index
    %180 = vector.load %arg9[%c0_59, %c0_60] : memref<32x1xf32, #tpu.memory_space<vmem>>, vector<32x1xf32>
    %181 = vector.broadcast %180 : vector<32x1xf32> to vector<32x128xf32>
    %182 = arith.addf %179, %181 : vector<32x128xf32>
    %c0_61 = arith.constant 0 : index
    %c2 = arith.constant 2 : index
    %c0_62 = arith.constant 0 : index
    %c0_63 = arith.constant 0 : index
    %183 = vector.load %arg10[%c0_61, %c2, %c0_62, %c0_63] : memref<1x4x32x128xf32, #tpu.memory_space<vmem>>, vector<1x1x32x128xf32>
    %184 = vector.shape_cast %183 : vector<1x1x32x128xf32> to vector<32x128xf32>
    %185 = vector.shape_cast %182 : vector<32x128xf32> to vector<1x1x32x128xf32>
    tpu.vector_store %arg10[%c0_61, %c2, %c0_62, %c0_63], %185 {strides = array<i32>} : memref<1x4x32x128xf32, #tpu.memory_space<vmem>>, vector<1x1x32x128xf32>,
    %186 = vector.extract_strided_slice %1 {offsets = [3, 0], sizes = [1, 140], strides = [1, 1]} : vector<4x140xf32> to vector<1x140xf32>
    %c0_64 = arith.constant 0 : index
    %c0_65 = arith.constant 0 : index
    %187 = vector.load %arg3[%c0_64, %c0_65] : memref<32x1xf32, #tpu.memory_space<vmem>>, vector<32x1xf32>
    %188 = vector.shape_cast %187 : vector<32x1xf32> to vector<32x1xf32>
    %189 = vector.broadcast %188 : vector<32x1xf32> to vector<32x137xf32>
    %190 = vector.extract_strided_slice %2 {offsets = [0, 0], sizes = [32, 1], strides = [1, 1]} : vector<32x4xf32> to vector<32x1xf32>
    %191 = vector.extract_strided_slice %186 {offsets = [0, 0], sizes = [1, 137], strides = [1, 1]} : vector<1x140xf32> to vector<1x137xf32>
    %192 = vector.broadcast %190 : vector<32x1xf32> to vector<32x137xf32>
    %193 = vector.broadcast %191 : vector<1x137xf32> to vector<32x137xf32>
    %194 = arith.mulf %192, %193 : vector<32x137xf32>
    %195 = arith.addf %189, %194 : vector<32x137xf32>
    %196 = vector.extract_strided_slice %2 {offsets = [0, 1], sizes = [32, 1], strides = [1, 1]} : vector<32x4xf32> to vector<32x1xf32>
    %197 = vector.extract_strided_slice %186 {offsets = [0, 1], sizes = [1, 137], strides = [1, 1]} : vector<1x140xf32> to vector<1x137xf32>
    %198 = vector.broadcast %196 : vector<32x1xf32> to vector<32x137xf32>
    %199 = vector.broadcast %197 : vector<1x137xf32> to vector<32x137xf32>
    %200 = arith.mulf %198, %199 : vector<32x137xf32>
    %201 = arith.addf %195, %200 : vector<32x137xf32>
    %202 = vector.extract_strided_slice %2 {offsets = [0, 2], sizes = [32, 1], strides = [1, 1]} : vector<32x4xf32> to vector<32x1xf32>
    %203 = vector.extract_strided_slice %186 {offsets = [0, 2], sizes = [1, 137], strides = [1, 1]} : vector<1x140xf32> to vector<1x137xf32>
    %204 = vector.broadcast %202 : vector<32x1xf32> to vector<32x137xf32>
    %205 = vector.broadcast %203 : vector<1x137xf32> to vector<32x137xf32>
    %206 = arith.mulf %204, %205 : vector<32x137xf32>
    %207 = arith.addf %201, %206 : vector<32x137xf32>
    %208 = vector.extract_strided_slice %2 {offsets = [0, 3], sizes = [32, 1], strides = [1, 1]} : vector<32x4xf32> to vector<32x1xf32>
    %209 = vector.extract_strided_slice %186 {offsets = [0, 3], sizes = [1, 137], strides = [1, 1]} : vector<1x140xf32> to vector<1x137xf32>
    %210 = vector.broadcast %208 : vector<32x1xf32> to vector<32x137xf32>
    %211 = vector.broadcast %209 : vector<1x137xf32> to vector<32x137xf32>
    %212 = arith.mulf %210, %211 : vector<32x137xf32>
    %213 = arith.addf %207, %212 : vector<32x137xf32>
    %214 = vector.extract_strided_slice %213 {offsets = [0, 0], sizes = [32, 134], strides = [1, 1]} : vector<32x137xf32> to vector<32x134xf32>
    %215 = vector.extract_strided_slice %213 {offsets = [0, 1], sizes = [32, 134], strides = [1, 1]} : vector<32x137xf32> to vector<32x134xf32>
    %216 = vector.extract_strided_slice %213 {offsets = [0, 2], sizes = [32, 134], strides = [1, 1]} : vector<32x137xf32> to vector<32x134xf32>
    %217 = vector.extract_strided_slice %213 {offsets = [0, 3], sizes = [32, 134], strides = [1, 1]} : vector<32x137xf32> to vector<32x134xf32>
    %218 = tpu.concatenate %214, %215, %216, %217 in 0 : vector<32x134xf32>, vector<32x134xf32>, vector<32x134xf32>, vector<32x134xf32> -> vector<128x134xf32>
    %c0_66 = arith.constant 0 : index
    %c0_67 = arith.constant 0 : index
    %219 = vector.load %arg4[%c0_66, %c0_67] : memref<32x128xf32, #tpu.memory_space<vmem>>, vector<32x128xf32>
    %cst_68 = arith.constant dense<0.000000e+00> : vector<32x134xf32>
    %220 = tpu.matmul %219, %218, %cst_68 {dimension_numbers = #tpu.dot_dimension_numbers<[1], [0], [0], [1], [0, 0, 1, 1], [], []>} : vector<32x128xf32>, vector<128x134xf32>, vector<32x134xf32> -> vector<32x134xf32>
    %c0_69 = arith.constant 0 : index
    %c0_70 = arith.constant 0 : index
    %221 = vector.load %arg5[%c0_69, %c0_70] : memref<32x1xf32, #tpu.memory_space<vmem>>, vector<32x1xf32>
    %222 = vector.broadcast %221 : vector<32x1xf32> to vector<32x134xf32>
    %223 = arith.addf %220, %222 : vector<32x134xf32>
    %224 = vector.extract_strided_slice %223 {offsets = [0, 0], sizes = [32, 131], strides = [1, 1]} : vector<32x134xf32> to vector<32x131xf32>
    %225 = vector.extract_strided_slice %223 {offsets = [0, 1], sizes = [32, 131], strides = [1, 1]} : vector<32x134xf32> to vector<32x131xf32>
    %226 = vector.extract_strided_slice %223 {offsets = [0, 2], sizes = [32, 131], strides = [1, 1]} : vector<32x134xf32> to vector<32x131xf32>
    %227 = vector.extract_strided_slice %223 {offsets = [0, 3], sizes = [32, 131], strides = [1, 1]} : vector<32x134xf32> to vector<32x131xf32>
    %228 = tpu.concatenate %224, %225, %226, %227 in 0 : vector<32x131xf32>, vector<32x131xf32>, vector<32x131xf32>, vector<32x131xf32> -> vector<128x131xf32>
    %c0_71 = arith.constant 0 : index
    %c0_72 = arith.constant 0 : index
    %229 = vector.load %arg6[%c0_71, %c0_72] : memref<32x128xf32, #tpu.memory_space<vmem>>, vector<32x128xf32>
    %cst_73 = arith.constant dense<0.000000e+00> : vector<32x131xf32>
    %230 = tpu.matmul %229, %228, %cst_73 {dimension_numbers = #tpu.dot_dimension_numbers<[1], [0], [0], [1], [0, 0, 1, 1], [], []>} : vector<32x128xf32>, vector<128x131xf32>, vector<32x131xf32> -> vector<32x131xf32>
    %c0_74 = arith.constant 0 : index
    %c0_75 = arith.constant 0 : index
    %231 = vector.load %arg7[%c0_74, %c0_75] : memref<32x1xf32, #tpu.memory_space<vmem>>, vector<32x1xf32>
    %232 = vector.broadcast %231 : vector<32x1xf32> to vector<32x131xf32>
    %233 = arith.addf %230, %232 : vector<32x131xf32>
    %234 = vector.extract_strided_slice %233 {offsets = [0, 0], sizes = [32, 128], strides = [1, 1]} : vector<32x131xf32> to vector<32x128xf32>
    %235 = vector.extract_strided_slice %233 {offsets = [0, 1], sizes = [32, 128], strides = [1, 1]} : vector<32x131xf32> to vector<32x128xf32>
    %236 = vector.extract_strided_slice %233 {offsets = [0, 2], sizes = [32, 128], strides = [1, 1]} : vector<32x131xf32> to vector<32x128xf32>
    %237 = vector.extract_strided_slice %233 {offsets = [0, 3], sizes = [32, 128], strides = [1, 1]} : vector<32x131xf32> to vector<32x128xf32>
    %238 = tpu.concatenate %234, %235, %236, %237 in 0 : vector<32x128xf32>, vector<32x128xf32>, vector<32x128xf32>, vector<32x128xf32> -> vector<128x128xf32>
    %c0_76 = arith.constant 0 : index
    %c0_77 = arith.constant 0 : index
    %239 = vector.load %arg8[%c0_76, %c0_77] : memref<32x128xf32, #tpu.memory_space<vmem>>, vector<32x128xf32>
    %cst_78 = arith.constant dense<0.000000e+00> : vector<32x128xf32>
    %240 = tpu.matmul %239, %238, %cst_78 {dimension_numbers = #tpu.dot_dimension_numbers<[1], [0], [0], [1], [0, 0, 1, 1], [], []>} : vector<32x128xf32>, vector<128x128xf32>, vector<32x128xf32> -> vector<32x128xf32>
    %c0_79 = arith.constant 0 : index
    %c0_80 = arith.constant 0 : index
    %241 = vector.load %arg9[%c0_79, %c0_80] : memref<32x1xf32, #tpu.memory_space<vmem>>, vector<32x1xf32>
    %242 = vector.broadcast %241 : vector<32x1xf32> to vector<32x128xf32>
    %243 = arith.addf %240, %242 : vector<32x128xf32>
    %c0_81 = arith.constant 0 : index
    %c3 = arith.constant 3 : index
    %c0_82 = arith.constant 0 : index
    %c0_83 = arith.constant 0 : index
    %244 = vector.load %arg10[%c0_81, %c3, %c0_82, %c0_83] : memref<1x4x32x128xf32, #tpu.memory_space<vmem>>, vector<1x1x32x128xf32>
    %245 = vector.shape_cast %244 : vector<1x1x32x128xf32> to vector<32x128xf32>
    %246 = vector.shape_cast %243 : vector<32x128xf32> to vector<1x1x32x128xf32>
    tpu.vector_store %arg10[%c0_81, %c3, %c0_82, %c0_83], %246 {strides = array<i32>} : memref<1x4x32x128xf32, #tpu.memory_space<vmem>>, vector<1x1x32x128xf32>,
    return
  }
  func.func @transform_0(%arg0: i32) -> (i32, i32, i32) {
    %c0_i32 = arith.constant 0 : i32
    %c0_i32_0 = arith.constant 0 : i32
    %c0_i32_1 = arith.constant 0 : i32
    return %arg0, %c0_i32, %c0_i32_0 : i32, i32, i32
  }
  func.func @transform_1(%arg0: i32) -> (i32, i32) {
    %c0_i32 = arith.constant 0 : i32
    %c0_i32_0 = arith.constant 0 : i32
    %c0_i32_1 = arith.constant 0 : i32
    return %c0_i32, %c0_i32_0 : i32, i32
  }
  func.func @transform_2(%arg0: i32) -> (i32, i32) {
    %c0_i32 = arith.constant 0 : i32
    %c0_i32_0 = arith.constant 0 : i32
    %c0_i32_1 = arith.constant 0 : i32
    return %c0_i32, %c0_i32_0 : i32, i32
  }
  func.func @transform_3(%arg0: i32) -> (i32, i32) {
    %c0_i32 = arith.constant 0 : i32
    %c0_i32_0 = arith.constant 0 : i32
    %c0_i32_1 = arith.constant 0 : i32
    return %c0_i32, %c0_i32_0 : i32, i32
  }
  func.func @transform_4(%arg0: i32) -> (i32, i32) {
    %c0_i32 = arith.constant 0 : i32
    %c0_i32_0 = arith.constant 0 : i32
    %c0_i32_1 = arith.constant 0 : i32
    return %c0_i32, %c0_i32_0 : i32, i32
  }
  func.func @transform_5(%arg0: i32) -> (i32, i32) {
    %c0_i32 = arith.constant 0 : i32
    %c0_i32_0 = arith.constant 0 : i32
    %c0_i32_1 = arith.constant 0 : i32
    return %c0_i32, %c0_i32_0 : i32, i32
  }
  func.func @transform_6(%arg0: i32) -> (i32, i32) {
    %c0_i32 = arith.constant 0 : i32
    %c0_i32_0 = arith.constant 0 : i32
    %c0_i32_1 = arith.constant 0 : i32
    return %c0_i32, %c0_i32_0 : i32, i32
  }
  func.func @transform_7(%arg0: i32) -> (i32, i32) {
    %c0_i32 = arith.constant 0 : i32
    %c0_i32_0 = arith.constant 0 : i32
    %c0_i32_1 = arith.constant 0 : i32
    return %c0_i32, %c0_i32_0 : i32, i32
  }
  func.func @transform_8(%arg0: i32) -> (i32, i32) {
    %c0_i32 = arith.constant 0 : i32
    %c0_i32_0 = arith.constant 0 : i32
    %c0_i32_1 = arith.constant 0 : i32
    return %c0_i32, %c0_i32_0 : i32, i32
  }
  func.func @transform_9(%arg0: i32) -> (i32, i32, i32, i32) {
    %c0_i32 = arith.constant 0 : i32
    %c0_i32_0 = arith.constant 0 : i32
    %c0_i32_1 = arith.constant 0 : i32
    %c0_i32_2 = arith.constant 0 : i32
    return %arg0, %c0_i32, %c0_i32_0, %c0_i32_1 : i32, i32, i32, i32
  }
}

</mosaic_0001>

<bundles_post_ra>
// kernel: cnn1d_forward.1
= control target key start
LH: loop header
LB: loop body
LE: loop exit
PB: predicated region body
PF: predicated region fallthrough
CT: control target
= control target key end

     0   :  { %s4104_s30 = smov 0   ;;  %s6074_s0 = inlined_call_operand.vmem [shape: f32[2,4,140], index: 0, kind: input, shape index: {}]   ;;  %s6075_s1 = inlined_call_operand.vmem [shape: f32[32,4], index: 1, kind: input, shape index: {}]   ;;  %s6076_s2 = inlined_call_operand.vmem [shape: f32[32,1], index: 2, kind: input, shape index: {}]   ;;  %s6077_s3 = inlined_call_operand.vmem [shape: f32[32,128], index: 3, kind: input, shape index: {}]   ;;  %s6078_s4 = inlined_call_operand.vmem [shape: f32[32,1], index: 4, kind: input, shape index: {}]   ;;  %s6079_s5 = inlined_call_operand.vmem [shape: f32[32,128], index: 5, kind: input, shape index: {}]   ;;  %s6080_s6 = inlined_call_operand.vmem [shape: f32[32,1], index: 6, kind: input, shape index: {}]   ;;  %s6081_s7 = inlined_call_operand.vmem [shape: f32[32,128], index: 7, kind: input, shape index: {}]   ;;  %s6082_s8 = inlined_call_operand.vmem [shape: f32[32,1], index: 8, kind: input, shape index: {}]   ;;  %s6083_s9 = inlined_call_operand.vmem [shape: f32[2,4,32,128], index: 9, kind: output, shape index: {}]  }
   0x1 LB: > { %s3264_s10 = sadd.s32 4294967295, %s4045_s30   ;;  %p3268_p0 = scmp.ge.s32.totalorder %s4045_s30, 1  ;;  %s4045_s30 = sphi %s4104_s30, %s19_s30  }
   0x2   : > { %p287_p1 = scmp.lt.s32.totalorder %s4045_s30, 3 }
   0x4   : > { %p288_p2 = pnand %p3268_p0, %p287_p1 }
   0x6   : > { %291 = sbr.rel (%p288_p2) target bundleno = 2452 (0x994), region = 56 }
   0xb   : > { %v4115_v0 = vld [vmem:[%s6076_s2 + $0x10] sm:$0xff]  ;;  %v335_v1 = vld [vmem:[%s6075_s1 + $0x8] sm:$0xff]  ;;  %v334_v2 = vld [vmem:[%s6075_s1] sm:$0xff]  ;;  %v4047_v3 = vmov 1   ;;  %v4048_v4 = vmov 0   ;;  %v4049_v7 = vmov 3  }
   0xc   : > { %3307 = vset.pattern.permute.xlu0 %v4047_v3  ;;  %3305 = vset.pattern.permute.xlu2 %v4048_v4  ;;  %v4127_v5 = vld [vmem:[%s6076_s2 + $0x18] sm:$0xff]  ;;  %v336_v8 = vld [vmem:[%s6075_s1 + $0x10] sm:$0xff]  ;;  %v4139_v9 = vld [vmem:[%s6076_s2] sm:$0xff]  ;;  %v4050_v11 = vmov 2   ;;  %p323_p3 = scmp.lt.s32.totalorder %s3264_s10, 1  ;;  %s4051_s12 = smov 127  }
   0xd   : > { %3304 = vset.pattern.permute.xlu1 %v4048_v4  ;;  %410 = vperm.xlu0 %3307, %v335_v1   ;;  %v337_v6 = vld [vmem:[%s6075_s1 + $0x18] sm:$0xff]  ;;  %v4145_v10 = vld [vmem:[%s6076_s2 + $0x8] sm:$0xff]  ;;  %s4052_s13 = smov 126   ;;  %s4053_s14 = smov 125   ;;  %vm453_vm0 = vcmask 1039360   ;;  %vm522_vm1 = vcmask 1031168  }
   0xe   : > { %354 = vperm.xlu1 %3304, %v4115_v0   ;;  %364 = vperm.xlu2 %3305, %v334_v2   ;;  %s6194_s10 = smov (!%p323_p3, %s3264_s10), 1  ;;  %vm591_vm2 = vcmask 1022976  }
   0xf   : > { %s3287_s27 = sshll.u32 %s6194_s10, 3 }
  0x10   : > { %s4160_s11 = scalar_lea.vmem %s6074_s0, %s3287_s27 }
  0x11   : > { %v4163_v13 = vld [vmem:[%s4160_s11] sm:$0xff] }
  0x12   : > { %v384_v15 = vperm.slane %v4163_v13, 4  ;;  %v383_v16 = vperm.slane %v4163_v13, 0 }
  0x14   : > { %v4169_v17 = vperm.slane %v384_v15, 0  ;;  %v4171_v18 = vperm.slane %v383_v16, 0 }
  0x15   : > { %3311 = vset.pattern.permute.xlu0 %v4049_v7 }
  0x16   : > { %359 = vperm.xlu1 %3304, %v4127_v5   ;;  %369 = vperm.xlu2 %3305, %v335_v1  }
  0x17   : > { %556 = vperm.xlu0 %3311, %v337_v6  }
  0x1e   : > { %379 = vperm.xlu1 %3304, %v337_v6   ;;  %3306 = vset.pattern.permute.xlu2 %v4047_v3 }
  0x1f   : > { %544 = vperm.xlu0 %3311, %v334_v2   ;;  %406 = vperm.xlu2 %3306, %v334_v2  }
  0x26   : > { %3308 = vset.pattern.permute.xlu1 %v4047_v3 }
  0x27   : > { %414 = vperm.xlu1 %3308, %v336_v8   ;;  %3313 = vset.pattern.permute.xlu0 %v4048_v4 }
  0x28   : > { %344 = vperm.xlu0 %3313, %v4139_v9   ;;  %418 = vperm.xlu2 %3306, %v337_v6  }
  0x2f   : > { %3309 = vset.pattern.permute.xlu1 %v4050_v11 }
  0x30   : > { %487 = vperm.xlu1 %3309, %v337_v6   ;;  %349 = vperm.xlu0 %3313, %v4145_v10  }
  0x31   : > { %3310 = vset.pattern.permute.xlu2 %v4050_v11 }
  0x32   : > { %483 = vperm.xlu2 %3310, %v336_v8  }
  0x38   : > { %479 = vperm.xlu1 %3309, %v335_v1   ;;  %374 = vperm.xlu0 %3313, %v336_v8  }
  0x3a   : > { %3312 = vset.pattern.permute.xlu2 %v4049_v7 }
  0x3b   : > { %552 = vperm.xlu2 %3312, %v336_v8  }
  0x40   : > { %475 = vperm.xlu1 %3309, %v334_v2  }
  0x43   : > { %548 = vperm.xlu2 %3312, %v335_v1  }
  0x48   : > { %3374 = vset.pattern.permute.xlu1 %v4048_v4 }
  0x4b   : > { %3375 = vset.pattern.permute.xlu2 %v4048_v4 }
  0x68   : > { %v4154_v12 = vpop.permute.xlu2 %364 }
  0x70   : > { %v4165_v14 = vpop.permute.xlu2 %369 }
  0x79   : > { %v4173_v19 = vpop.permute.xlu2 %406 }
  0x7a   : > { %6130 = vst [vmem:[#allocation2_spill] sm:$0xff] %v4173_v19  ;;  %v422_v20 = vmul.f32 %v4173_v19, %v4169_v17  ;;  %v421_v21 = vmul.f32 %v4173_v19, %v4171_v18 }
  0x7c   : > { %439 = vrot.lane.b32.xlu2 %v422_v20, %s4051_s12  ;;  %437 = vrot.lane.b32.xlu1 %v421_v21, %s4051_s12 }
  0x7f   : > { %v4181_v22 = vpop.permute.xlu0 %410 }
  0x80   : > { %6131 = vst [vmem:[#allocation3_spill] sm:$0xff] %v4181_v22  ;;  %v4183_v23 = vpop.permute.xlu1 %354  ;;  %v423_v24 = vmul.f32 %v4181_v22, %v4171_v18  ;;  %v424_v25 = vmul.f32 %v4181_v22, %v4169_v17 }
  0x82   : > { %441 = vrot.lane.b32.xlu0 %v423_v24, %s4051_s12  ;;  %v4191_v26 = vpop.permute.xlu2 %418 }
  0x83   : > { %v427_v28 = vmul.f32 %v4191_v26, %v4171_v18  ;;  %v428_v34 = vmul.f32 %v4191_v26, %v4169_v17 }
  0x84   : > { %443 = vrot.lane.b32.xlu1 %v424_v25, %s4051_s12 }
  0x88   : > { %v4193_v27 = vpop.permute.xlu1 %359 }
  0x89   : > { %v4221_v38 = vpop.permute.xlu0 %556 }
  0x8a   : > { %6135 = vst [vmem:[#allocation7_spill] sm:$0xff] %v4221_v38  ;;  %v565_v41 = vmul.f32 %v4221_v38, %v4171_v18  ;;  %v566_v43 = vmul.f32 %v4221_v38, %v4169_v17 }
  0x8c   : > { %449 = vrot.lane.b32.xlu1 %v427_v28, %s4051_s12  ;;  %v4219_v37 = vpop.permute.xlu2 %483 }
  0x8d   : > { %6134 = vst [vmem:[#allocation6_spill] sm:$0xff] %v4219_v37  ;;  %v494_v39 = vmul.f32 %v4219_v37, %v4171_v18  ;;  %v495_v40 = vmul.f32 %v4219_v37, %v4169_v17 }
  0x90   : > { %v4198_v29 = vpop.permute.xlu1 %379 }
  0x91   : > { %v4267_v55 = vpop.permute.xlu0 %544  ;;  %v396_v8 = vmul.f32 %v4169_v17, %v4198_v29  ;;  %v395_v11 = vmul.f32 %v4171_v18, %v4198_v29 }
  0x92   : > { %6140 = vst [vmem:[#allocation12_spill] sm:$0xff] %v4267_v55  ;;  %v559_v56 = vmul.f32 %v4267_v55, %v4171_v18  ;;  %v560_v57 = vmul.f32 %v4267_v55, %v4169_v17 }
  0x93   : > { %v404_v20 = vadd.f32 %v396_v8, %v4193_v27  ;;  %v403_v25 = vadd.f32 %v395_v11, %v4193_v27 }
  0x95   : > { %v4243_v46 = vpop.permute.xlu2 %552 }
  0x96   : > { %6137 = vst [vmem:[#allocation9_spill] sm:$0xff] %v4243_v46  ;;  %v563_v48 = vmul.f32 %v4243_v46, %v4171_v18  ;;  %v564_v49 = vmul.f32 %v4243_v46, %v4169_v17 }
  0x99   : > { %v4200_v30 = vpop.permute.xlu1 %414 }
  0x9a   : > { %6132 = vst [vmem:[#allocation4_spill] sm:$0xff] %v4200_v30  ;;  %v425_v31 = vmul.f32 %v4200_v30, %v4171_v18  ;;  %v426_v32 = vmul.f32 %v4200_v30, %v4169_v17  ;;  %v4275_v58 = vpop.permute.xlu0 %344 }
  0x9c   : > { %445 = vrot.lane.b32.xlu2 %v425_v31, %s4051_s12  ;;  %447 = vrot.lane.b32.xlu0 %v426_v32, %s4051_s12 }
  0x9d   : > { %v4256_v51 = vpop.permute.xlu2 %548 }
  0x9e   : > { %6139 = vst [vmem:[#allocation11_spill] sm:$0xff] %v4256_v51  ;;  %v561_v53 = vmul.f32 %v4256_v51, %v4171_v18  ;;  %v562_v54 = vmul.f32 %v4256_v51, %v4169_v17 }
  0xa2   : > { %v4208_v33 = vpop.permute.xlu1 %487  ;;  %v350_v59 = vpop.permute.xlu0 %349 }
  0xa3   : > { %6133 = vst [vmem:[#allocation5_spill] sm:$0xff] %v4208_v33  ;;  %v496_v35 = vmul.f32 %v4208_v33, %v4171_v18  ;;  %v497_v36 = vmul.f32 %v4208_v33, %v4169_v17 }
  0xa4   : > { %451 = vrot.lane.b32.xlu2 %v428_v34, %s4051_s12 }
  0xa5   : > { %518 = vrot.lane.b32.xlu0 %v496_v35, %s4052_s13  ;;  %520 = vrot.lane.b32.xlu1 %v497_v36, %s4052_s13 }
  0xaa   : > { %v4232_v42 = vpop.permute.xlu1 %479  ;;  %v4281_v62 = vpop.permute.xlu0 %374 }
  0xab   : > { %6136 = vst [vmem:[#allocation8_spill] sm:$0xff] %v4232_v42  ;;  %v492_v44 = vmul.f32 %v4232_v42, %v4171_v18  ;;  %v493_v45 = vmul.f32 %v4232_v42, %v4169_v17  ;;  %v394_v27 = vmul.f32 %v4169_v17, %v4281_v62 }
  0xac   : > { %514 = vrot.lane.b32.xlu2 %v494_v39, %s4052_s13 }
  0xad   : > { %516 = vrot.lane.b32.xlu0 %v495_v40, %s4052_s13  ;;  %587 = vrot.lane.b32.xlu1 %v565_v41, %s4053_s14 }
  0xb2   : > { %v4245_v47 = vpop.permute.xlu1 %475 }
  0xb3   : > { %6138 = vst [vmem:[#allocation10_spill] sm:$0xff] %v4245_v47  ;;  %v490_v50 = vmul.f32 %v4245_v47, %v4171_v18  ;;  %v491_v52 = vmul.f32 %v4245_v47, %v4169_v17 }
  0xb4   : > { %589 = vrot.lane.b32.xlu2 %v566_v43, %s4053_s14 }
  0xb5   : > { %510 = vrot.lane.b32.xlu0 %v492_v44, %s4052_s13  ;;  %512 = vrot.lane.b32.xlu1 %v493_v45, %s4052_s13  ;;  %v393_v45 = vmul.f32 %v4171_v18, %v4281_v62 }
  0xbc   : > { %583 = vrot.lane.b32.xlu2 %v563_v48, %s4053_s14 }
  0xbd   : > { %585 = vrot.lane.b32.xlu0 %v564_v49, %s4053_s14  ;;  %506 = vrot.lane.b32.xlu1 %v490_v50, %s4052_s13  ;;  %v402_v50 = vadd.f32 %v394_v27, %v4183_v23  ;;  %v390_v27 = vmul.f32 %v4169_v17, %v4154_v12 }
  0xc4   : > { %508 = vrot.lane.b32.xlu2 %v491_v52, %s4052_s13 }
  0xc5   : > { %579 = vrot.lane.b32.xlu0 %v561_v53, %s4053_s14  ;;  %581 = vrot.lane.b32.xlu1 %v562_v54, %s4053_s14  ;;  %v401_v53 = vadd.f32 %v393_v45, %v4183_v23 }
  0xcc   : > { %575 = vrot.lane.b32.xlu2 %v559_v56, %s4053_s14 }
  0xcd   : > { %577 = vrot.lane.b32.xlu0 %v560_v57, %s4053_s14 }
  0xd6   : > { %v4277_v60 = vpop.permute.xlu2 %439 }
  0xee   : > { %v4279_v61 = vpop.permute.xlu1 %437 }
  0xf4   : > { %v442_v2 = vpop.permute.xlu0 %441 }
  0xf6   : > { %v446_v63 = vpop.permute.xlu2 %445  ;;  %v444_v1 = vpop.permute.xlu1 %443 }
  0xfe   : > { %v452_v3 = vpop.permute.xlu2 %451  ;;  %v450_v6 = vpop.permute.xlu1 %449 }
  0xff   : > { %v457_v21 = vsel %vm453_vm0, %v450_v6, %v452_v3  ;;  %v473_v24 = vadd.f32 %v452_v3, %v404_v20 }
 0x100   : > { %v472_v31 = vadd.f32 %v457_v21, %v403_v25 }
 0x106   : > { %v515_v7 = vpop.permute.xlu2 %514 }
 0x10e   : > { %v448_v4 = vpop.permute.xlu0 %447  ;;  %v590_v34 = vpop.permute.xlu2 %589 }
 0x10f   : > { %v456_v52 = vsel %vm453_vm0, %v446_v63, %v448_v4  ;;  %v471_v56 = vadd.f32 %v448_v4, %v402_v50  ;;  %v391_v63 = vmul.f32 %v4171_v18, %v4165_v14 }
 0x110   : > { %v470_v3 = vadd.f32 %v456_v52, %v401_v53 }
 0x116   : > { %v584_v54 = vpop.permute.xlu2 %583 }
 0x117   : > { %v519_v15 = vpop.permute.xlu0 %518  ;;  %v521_v16 = vpop.permute.xlu1 %520 }
 0x118   : > { %v526_v28 = vsel %vm522_vm1, %v519_v15, %v521_v16  ;;  %v542_v32 = vadd.f32 %v521_v16, %v473_v24  ;;  %v392_v16 = vmul.f32 %v4169_v17, %v4165_v14  ;;  %v399_v24 = vadd.f32 %v391_v63, %v350_v59 }
 0x119   : > { %v541_v35 = vadd.f32 %v526_v28, %v472_v31  ;;  %v1134_v63 = vperm.slane %v4163_v13, 5 }
 0x11a   : > { %v4292_v41 = vadd.f32 %v590_v34, %v542_v32  ;;  %v400_v4 = vadd.f32 %v392_v16, %v350_v59  ;;  %v886_v16 = vld [vmem:[%s6080_s6] sm:$0xff] }
 0x11c   : > { %v469_v28 = vadd.f32 %v444_v1, %v400_v4  ;;  %v4388_v4 = vperm.slane %v1134_v63, 1 }
 0x11f   : > { %v517_v36 = vpop.permute.xlu0 %516  ;;  %v588_v39 = vpop.permute.xlu1 %587 }
 0x120   : > { %v595_v40 = vsel %vm591_vm2, %v588_v39, %v590_v34  ;;  %v525_v57 = vsel %vm522_vm1, %v515_v7, %v517_v36  ;;  %v540_v6 = vadd.f32 %v517_v36, %v471_v56  ;;  %v455_v7 = vsel %vm453_vm0, %v442_v2, %v444_v1  ;;  %v509_v34 = vpop.permute.xlu2 %508 }
 0x121   : > { %v4294_v43 = vadd.f32 %v595_v40, %v541_v35  ;;  %v539_v8 = vadd.f32 %v525_v57, %v470_v3  ;;  %v468_v32 = vadd.f32 %v455_v7, %v399_v24  ;;  %v389_v1 = vmul.f32 %v4171_v18, %v4154_v12  ;;  %v889_v7 = vld [vmem:[%s6080_s6 + $0x18] sm:$0xff] }
 0x122   : > { %v1160_v24 = vmul.f32 %v4388_v4, %v4200_v30 }
 0x123   : > { %v3314_v44 = vpack.i.bf16 %v4292_v41, %v4294_v43  ;;  %v397_v50 = vadd.f32 %v389_v1, %v4275_v58 }
 0x125   : > { %3315 = vrot.lane.b32.xlu1 %v3314_v44, %s4053_s14 }
 0x127   : > { %v511_v48 = vpop.permute.xlu0 %510  ;;  %v513_v49 = vpop.permute.xlu1 %512 }
 0x128   : > { %v524_v31 = vsel %vm522_vm1, %v511_v48, %v513_v49  ;;  %v538_v35 = vadd.f32 %v513_v49, %v469_v28  ;;  %v398_v48 = vadd.f32 %v390_v27, %v4275_v58  ;;  %v454_v49 = vsel %vm453_vm0, %v4279_v61, %v4277_v60  ;;  %v576_v56 = vpop.permute.xlu2 %575 }
 0x129   : > { %v537_v36 = vadd.f32 %v524_v31, %v468_v32  ;;  %v1158_v28 = vmul.f32 %v4388_v4, %v4181_v22  ;;  %v1214_v31 = vmul.f32 %v4388_v4, %v4208_v33  ;;  %v1266_v32 = vmul.f32 %v4388_v4, %v4221_v38 }
 0x12a   : > { %v467_v52 = vadd.f32 %v4277_v60, %v398_v48  ;;  %v1212_v27 = vmul.f32 %v4388_v4, %v4219_v37 }
 0x12c   : > { %v536_v18 = vadd.f32 %v509_v34, %v467_v52 }
 0x12f   : > { %v586_v11 = vpop.permute.xlu0 %585  ;;  %v507_v15 = vpop.permute.xlu1 %506 }
 0x130   : > { %v594_v20 = vsel %vm591_vm2, %v584_v54, %v586_v11  ;;  %v4310_v21 = vadd.f32 %v586_v11, %v540_v6  ;;  %v523_v53 = vsel %vm522_vm1, %v507_v15, %v509_v34  ;;  %v466_v54 = vadd.f32 %v454_v49, %v397_v50  ;;  %v4365_v11 = vld [vmem:[%s6078_s4 + $0x10] sm:$0xff]  ;;  %v4373_v15 = vld [vmem:[%s6078_s4] sm:$0xff] }
 0x131   : > { %v4314_v23 = vadd.f32 %v594_v20, %v539_v8  ;;  %v4357_v8 = vld [vmem:[%s6078_s4 + $0x8] sm:$0xff]  ;;  %6142 = vst [vmem:[#allocation14_spill] sm:$0xff] %v4373_v15  ;;  %v4383_v20 = vld [vmem:[%s6078_s4 + $0x18] sm:$0xff]  ;;  %v1133_v34 = vperm.slane %v4163_v13, 1 }
 0x132   : > { %v535_v57 = vadd.f32 %v523_v53, %v466_v54  ;;  %6141 = vst [vmem:[#allocation13_spill] sm:$0xff] %v4357_v8 }
 0x133   : > { %v3319_v25 = vpack.i.bf16 %v4310_v21, %v4314_v23  ;;  %6143 = vst [vmem:[#allocation15_spill] sm:$0xff] %v4383_v20 }
 0x135   : > { %3320 = vrot.lane.b32.xlu2 %v3319_v25, %s4053_s14 }
 0x137   : > { %v580_v39 = vpop.permute.xlu0 %579  ;;  %v582_v40 = vpop.permute.xlu1 %581 }
 0x138   : > { %v593_v2 = vsel %vm591_vm2, %v580_v39, %v582_v40  ;;  %v4324_v59 = vadd.f32 %v582_v40, %v538_v35  ;;  %v4414_v35 = vperm.slane %v1133_v34, 1  ;;  %v1156_v39 = vmul.f32 %v4388_v4, %v4173_v19 }
 0x139   : > { %v4328_v45 = vadd.f32 %v593_v2, %v537_v36 }
 0x13a   : > { %v1161_v36 = vmul.f32 %v4414_v35, %v4191_v26  ;;  %v1157_v40 = vmul.f32 %v4414_v35, %v4181_v22  ;;  %v1213_v2 = vmul.f32 %v4414_v35, %v4208_v33  ;;  %v1159_v1 = vmul.f32 %v4414_v35, %v4200_v30 }
 0x13b   : > { %v3324_v17 = vpack.i.bf16 %v4324_v59, %v4328_v45 }
 0x13d   : > { %3335 = vrot.lane.b32.xlu2 %v3314_v44, %s4052_s13  ;;  %3325 = vrot.lane.b32.xlu0 %v3324_v17, %s4053_s14 }
 0x13f   : > { %v578_v3 = vpop.permute.xlu0 %577 }
 0x140   : > { %v592_v61 = vsel %vm591_vm2, %v576_v56, %v578_v3  ;;  %v4342_v6 = vadd.f32 %v578_v3, %v536_v18  ;;  %v1208_v18 = vmul.f32 %v4388_v4, %v4245_v47  ;;  %v1264_v3 = vmul.f32 %v4388_v4, %v4243_v46 }
 0x141   : > { %v4344_v58 = vadd.f32 %v592_v61, %v535_v57  ;;  %v1209_v57 = vmul.f32 %v4414_v35, %v4232_v42  ;;  %v1265_v61 = vmul.f32 %v4414_v35, %v4221_v38 }
 0x143   : > { %v3349_v60 = vpack.i.bf16 %v4342_v6, %v4344_v58 }
 0x145   : > { %3340 = vrot.lane.b32.xlu0 %v3319_v25, %s4052_s13  ;;  %3350 = vrot.lane.b32.xlu2 %v3349_v60, %s4052_s13 }
 0x146   : > { %3330 = vrot.lane.b32.xlu1 %v3349_v60, %s4053_s14 }
 0x14d   : > { %3355 = vrot.lane.b32.xlu0 %v3314_v44, %s4051_s12  ;;  %3365 = vrot.lane.b32.xlu2 %v3324_v17, %s4051_s12  ;;  %v888_v44 = vld [vmem:[%s6080_s6 + $0x10] sm:$0xff] }
 0x14e   : > { %3345 = vrot.lane.b32.xlu1 %v3324_v17, %s4052_s13 }
 0x155   : > { %3370 = vrot.lane.b32.xlu0 %v3349_v60, %s4051_s12  ;;  %719 = vperm.xlu2 %3375, %v4357_v8   ;;  %v1211_v60 = vmul.f32 %v4414_v35, %v4219_v37 }
 0x156   : > { %3360 = vrot.lane.b32.xlu1 %v3319_v25, %s4051_s12  ;;  %v887_v25 = vld [vmem:[%s6080_s6 + $0x8] sm:$0xff] }
 0x15d   : > { %724 = vperm.xlu0 %3313, %v4365_v11   ;;  %902 = vperm.xlu2 %3375, %v888_v44   ;;  %v1260_v44 = vmul.f32 %v4388_v4, %v4267_v55 }
 0x15e   : > { %714 = vperm.xlu1 %3374, %v4373_v15  }
 0x165   : > { %892 = vperm.xlu0 %3313, %v886_v16   ;;  %1125 = vperm.xlu2 %3375, %v4115_v0   ;;  %v1162_v0 = vmul.f32 %v4388_v4, %v4191_v26  ;;  %v1155_v16 = vmul.f32 %v4414_v35, %v4173_v19 }
 0x166   : > { %729 = vperm.xlu1 %3374, %v4383_v20  }
 0x16d   : > { %907 = vperm.xlu0 %3313, %v889_v7   ;;  %1181 = vrot.lane.b32.xlu2 %v1160_v24, %s4051_s12 }
 0x16e   : > { %897 = vperm.xlu1 %3374, %v887_v25  }
 0x175   : > { %1185 = vrot.lane.b32.xlu0 %v1162_v0, %s4051_s12  ;;  %1177 = vrot.lane.b32.xlu2 %v1158_v28, %s4051_s12  ;;  %v1263_v28 = vmul.f32 %v4414_v35, %v4243_v46 }
 0x176   : > { %1130 = vperm.xlu1 %3374, %v4127_v5   ;;  %v1210_v5 = vmul.f32 %v4388_v4, %v4232_v42 }
 0x17d   : > { %1237 = vrot.lane.b32.xlu0 %v1214_v31, %s4052_s13  ;;  %1289 = vrot.lane.b32.xlu2 %v1266_v32, %s4053_s14 }
 0x17e   : > { %1120 = vperm.xlu1 %3374, %v4145_v10  }
 0x185   : > { %1183 = vrot.lane.b32.xlu0 %v1161_v36, %s4051_s12  ;;  %1229 = vrot.lane.b32.xlu2 %v1210_v5, %s4052_s13 }
 0x186   : > { %1115 = vperm.xlu1 %3374, %v4139_v9   ;;  %v1262_v9 = vmul.f32 %v4388_v4, %v4256_v51 }
 0x18d   : > { %1173 = vrot.lane.b32.xlu0 %v1156_v39, %s4051_s12  ;;  %1175 = vrot.lane.b32.xlu2 %v1157_v40, %s4051_s12 }
 0x18e   : > { %1233 = vrot.lane.b32.xlu1 %v1212_v27, %s4052_s13 }
 0x18f   : > { %v3321_v48 = vpop.permute.xlu2 %3320 }
 0x190   : > { %v3322_v50 = vunpack.i.l.bf16 %v3321_v48  ;;  %v3323_v53 = vunpack.i.h.bf16 %v3321_v48 }
 0x192   : > { %v694_v56 = vsel %vm591_vm2, %v3322_v50, %v3323_v53 }
 0x195   : > { %1235 = vrot.lane.b32.xlu0 %v1213_v2, %s4052_s13  ;;  %1281 = vrot.lane.b32.xlu2 %v1262_v9, %s4053_s14 }
 0x196   : > { %1179 = vrot.lane.b32.xlu1 %v1159_v1, %s4051_s12 }
 0x197   : > { %v3316_v49 = vpop.permute.xlu1 %3315  ;;  %v3336_v25 = vpop.permute.xlu2 %3335 }
 0x198   : > { %v3317_v17 = vunpack.i.l.bf16 %v3316_v49  ;;  %v3318_v52 = vunpack.i.h.bf16 %v3316_v49  ;;  %v3337_v34 = vunpack.i.l.bf16 %v3336_v25  ;;  %v3338_v39 = vunpack.i.h.bf16 %v3336_v25 }
 0x19a   : > { %761 = vmatpush.msra.mxu1 %v3318_v52  ;;  %v695_v54 = vsel %vm591_vm2, %v3317_v17, %v3318_v52  ;;  %v667_v1 = vsel %vm522_vm1, %v3337_v34, %v3338_v39 }
 0x19b   : > { %732 = vmatpush.msra.mxu0 %v695_v54 }
 0x19c   : > { %762 = vmatpush.msra.mxu1 %v3323_v53 }
 0x19d   : > { %733 = vmatpush.msra.mxu0 %v694_v56  ;;  %1225 = vrot.lane.b32.xlu0 %v1208_v18, %s4052_s13 }
 0x19e   : > { %1227 = vrot.lane.b32.xlu2 %v1209_v57, %s4052_s13  ;;  %1285 = vrot.lane.b32.xlu1 %v1264_v3, %s4053_s14 }
 0x19f   : > { %v3351_v9 = vpop.permute.xlu2 %3350 }
 0x1a0   : > { %v3352_v17 = vunpack.i.l.bf16 %v3351_v9  ;;  %v3353_v54 = vunpack.i.h.bf16 %v3351_v9 }
 0x1a2   : > { %v664_v3 = vsel %vm522_vm1, %v3352_v17, %v3353_v54 }
 0x1a5   : > { %1287 = vrot.lane.b32.xlu0 %v1265_v61, %s4053_s14 }
 0x1a6   : > { %1231 = vrot.lane.b32.xlu1 %v1211_v60, %s4052_s13 }
 0x1a7   : > { %v3366_v61 = vpop.permute.xlu2 %3365 }
 0x1a8   : > { %v3368_v25 = vunpack.i.h.bf16 %v3366_v61 }
 0x1ad   : > { %1277 = vrot.lane.b32.xlu0 %v1260_v44, %s4053_s14 }
 0x1ae   : > { %1171 = vrot.lane.b32.xlu1 %v1155_v16, %s4051_s12 }
 0x1af   : > { %v3326_v63 = vpop.permute.xlu0 %3325 }
 0x1b0   : > { %v3327_v7 = vunpack.i.l.bf16 %v3326_v63  ;;  %v3328_v24 = vunpack.i.h.bf16 %v3326_v63  ;;  %v3367_v63 = vunpack.i.l.bf16 %v3366_v61 }
 0x1b2   : > { %763 = vmatpush.msra.mxu1 %v3328_v24  ;;  %v693_v0 = vsel %vm591_vm2, %v3327_v7, %v3328_v24 }
 0x1b3   : > { %734 = vmatpush.msra.mxu0 %v693_v0 }
 0x1b6   : > { %1283 = vrot.lane.b32.xlu1 %v1263_v28, %s4053_s14 }
 0x1b7   : > { %v3341_v31 = vpop.permute.xlu0 %3340 }
 0x1b8   : > { %v3331_v32 = vpop.permute.xlu1 %3330  ;;  %v3342_v40 = vunpack.i.l.bf16 %v3341_v31  ;;  %v3343_v2 = vunpack.i.h.bf16 %v3341_v31 }
 0x1b9   : > { %v3332_v36 = vunpack.i.l.bf16 %v3331_v32  ;;  %v3333_v5 = vunpack.i.h.bf16 %v3331_v32  ;;  %v637_v32 = vsel %vm453_vm0, %v3367_v63, %v3368_v25 }
 0x1ba   : > { %v666_v49 = vsel %vm522_vm1, %v3342_v40, %v3343_v2  ;;  %v720_v40 = vpop.permute.xlu2 %719 }
 0x1bb   : > { %764 = vmatpush.msra.mxu1 %v3333_v5  ;;  %v692_v27 = vsel %vm591_vm2, %v3332_v36, %v3333_v5  ;;  %v4485_v36 = vld [vmem:[%s6077_s3] sm:$0xff] }
 0x1bc   : > { %735 = vmatpush.msra.mxu0 %v692_v27  ;;  %6144 = vst [vmem:[#allocation16_spill] sm:$0xff] %v4485_v36 }
 0x1bd   : > { %765 = vmatpush.msra.mxu1 %v3338_v39 }
 0x1be   : > { %736 = vmatpush.msra.mxu0 %v667_v1 }
 0x1bf   : > { %766 = vmatpush.msra.mxu1 %v3343_v2  ;;  %v3356_v48 = vpop.permute.xlu0 %3355 }
 0x1c0   : > { %v3346_v50 = vpop.permute.xlu1 %3345  ;;  %737 = vmatpush.msra.mxu0 %v666_v49  ;;  %v3357_v18 = vunpack.i.l.bf16 %v3356_v48  ;;  %v3358_v57 = vunpack.i.h.bf16 %v3356_v48 }
 0x1c1   : > { %v3347_v52 = vunpack.i.l.bf16 %v3346_v50  ;;  %v3348_v53 = vunpack.i.h.bf16 %v3346_v50 }
 0x1c2   : > { %v639_v60 = vsel %vm453_vm0, %v3357_v18, %v3358_v57  ;;  %v4525_v9 = vpop.permute.xlu2 %902 }
 0x1c3   : > { %767 = vmatpush.msra.mxu1 %v3348_v53  ;;  %v665_v56 = vsel %vm522_vm1, %v3347_v52, %v3348_v53  ;;  %6151 = vst [vmem:[#allocation23_spill] sm:$0xff] %v4525_v9 }
 0x1c4   : > { %738 = vmatpush.msra.mxu0 %v665_v56 }
 0x1c5   : > { %768 = vmatpush.msra.mxu1 %v3353_v54 }
 0x1c6   : > { %739 = vmatpush.msra.mxu0 %v664_v3 }
 0x1c7   : > { %769 = vmatpush.msra.mxu1 %v3358_v57  ;;  %v3371_v44 = vpop.permute.xlu0 %3370 }
 0x1c8   : > { %v3361_v16 = vpop.permute.xlu1 %3360  ;;  %740 = vmatpush.msra.mxu0 %v639_v60  ;;  %v3372_v0 = vunpack.i.l.bf16 %v3371_v44  ;;  %v3373_v31 = vunpack.i.h.bf16 %v3371_v44 }
 0x1c9   : > { %v3362_v7 = vunpack.i.l.bf16 %v3361_v16  ;;  %v3363_v24 = vunpack.i.h.bf16 %v3361_v16 }
 0x1ca   : > { %v636_v34 = vsel %vm453_vm0, %v3372_v0, %v3373_v31  ;;  %v4531_v49 = vpop.permute.xlu2 %1125 }
 0x1cb   : > { %770 = vmatpush.msra.mxu1 %v3363_v24  ;;  %v638_v28 = vsel %vm453_vm0, %v3362_v7, %v3363_v24 }
 0x1cc   : > { %741 = vmatpush.msra.mxu0 %v638_v28 }
 0x1cd   : > { %771 = vmatpush.msra.mxu1 %v3368_v25 }
 0x1ce   : > { %742 = vmatpush.msra.mxu0 %v637_v32 }
 0x1cf   : > { %772 = vmatpush.msra.mxu1 %v3373_v31 }
 0x1d0   : > { %743 = vmatpush.msra.mxu0 %v636_v34 }
 0x1d1   : > { %773 = vmatpush.msra.mxu1 %v4292_v41  ;;  %v4495_v41 = vld [vmem:[%s6077_s3 + $0x8] sm:$0xff] }
 0x1d2   : > { %744 = vmatpush.msra.mxu0 %v4294_v43  ;;  %6145 = vst [vmem:[#allocation17_spill] sm:$0xff] %v4495_v41  ;;  %v4502_v43 = vld [vmem:[%s6077_s3 + $0x10] sm:$0xff]  ;;  %v4535_v52 = vpop.permute.xlu2 %1181 }
 0x1d3   : > { %774 = vmatpush.msra.mxu1 %v4310_v21  ;;  %6146 = vst [vmem:[#allocation18_spill] sm:$0xff] %v4502_v43  ;;  %v4509_v21 = vld [vmem:[%s6077_s3 + $0x18] sm:$0xff] }
 0x1d4   : > { %745 = vmatpush.msra.mxu0 %v4314_v23  ;;  %6147 = vst [vmem:[#allocation19_spill] sm:$0xff] %v4509_v21  ;;  %v715_v23 = vpop.permute.xlu1 %714 }
 0x1d5   : > { %775 = vmatpush.msra.mxu1 %v4324_v59 }
 0x1d6   : > { %746 = vmatpush.msra.mxu0 %v4328_v45  ;;  %v725_v45 = vpop.permute.xlu0 %724 }
 0x1d7   : > { %776 = vmatpush.msra.mxu1 %v4342_v6 }
 0x1d8   : > { %747 = vmatpush.msra.mxu0 %v4344_v58  ;;  %777 = vmatmul.f32.vlgmr.msra.gmra.mxu1 %v4485_v36 }
 0x1d9   : > { %748 = vmatmul.f32.vlgmr.msra.gmra.mxu0 %v4485_v36 }
 0x1da   : > { %v4539_v56 = vpop.permute.xlu2 %1177 }
 0x1dc   : > { %v730_v59 = vpop.permute.xlu1 %729 }
 0x1de   : > { %v4515_v58 = vpop.permute.xlu0 %892 }
 0x1df   : > { %6149 = vst [vmem:[#allocation21_spill] sm:$0xff] %v4515_v58 }
 0x1e0   : > { %780 = vmatmul.f32.gmra.mxu1 %v4495_v41 }
 0x1e1   : > { %751 = vmatmul.f32.gmra.mxu0 %v4495_v41 }
 0x1e2   : > { %v4555_v0 = vpop.permute.xlu2 %1289 }
 0x1e4   : > { %v4513_v6 = vpop.permute.xlu1 %897 }
 0x1e5   : > { %6148 = vst [vmem:[#allocation20_spill] sm:$0xff] %v4513_v6 }
 0x1e6   : > { %v4519_v39 = vpop.permute.xlu0 %907 }
 0x1e7   : > { %6150 = vst [vmem:[#allocation22_spill] sm:$0xff] %v4519_v39  ;;  %v1142_v39 = vmul.f32 %v4388_v4, %v4165_v14 }
 0x1e8   : > { %783 = vmatmul.f32.gmra.mxu1 %v4502_v43 }
 0x1e9   : > { %754 = vmatmul.f32.gmra.mxu0 %v4502_v43 }
 0x1ec   : > { %v4517_v5 = vpop.permute.xlu1 %1130 }
 0x1ee   : > { %v4523_v2 = vpop.permute.xlu0 %1185 }
 0x1f0   : > { %786 = vmatmul.f32.gmra.mxu1 %v4509_v21 }
 0x1f1   : > { %757 = vmatmul.f32.gmra.mxu0 %v4509_v21 }
 0x1f4   : > { %v4521_v27 = vpop.permute.xlu1 %1120 }
 0x1f5   : > { %v1150_v9 = vadd.f32 %v1142_v39, %v4521_v27 }
 0x1f6   : > { %v4529_v48 = vpop.permute.xlu0 %1237 }
 0x1fc   : > { %v4527_v1 = vpop.permute.xlu1 %1115 }
 0x1fe   : > { %v1184_v17 = vpop.permute.xlu0 %1183 }
 0x1ff   : > { %v1190_v39 = vsel %vm453_vm0, %v1184_v17, %v4523_v2  ;;  %v1259_v17 = vmul.f32 %v4414_v35, %v4267_v55 }
 0x204   : > { %v4533_v50 = vpop.permute.xlu1 %1233 }
 0x206   : > { %v4537_v54 = vpop.permute.xlu0 %1173 }
 0x20c   : > { %v1180_v53 = vpop.permute.xlu1 %1179 }
 0x20d   : > { %v1189_v6 = vsel %vm453_vm0, %v1180_v53, %v4535_v52 }
 0x20e   : > { %v1236_v63 = vpop.permute.xlu0 %1235 }
 0x20f   : > { %v1242_v42 = vsel %vm522_vm1, %v1236_v63, %v4529_v48 }
 0x214   : > { %v4545_v60 = vpop.permute.xlu1 %1285 }
 0x21c   : > { %v1232_v31 = vpop.permute.xlu1 %1231 }
 0x255   : > { %v778_v18 = vpop.f32.mrf.mxu1 }
 0x256   : > { %v4541_v57 = vadd.f32 %v778_v18, %v715_v23  ;;  %v749_v3 = vpop.f32.mrf.mxu0 }
 0x257   : > { %v4543_v61 = vadd.f32 %v749_v3, %v715_v23 }
 0x259   : > { %v3381_v44 = vpack.i.bf16 %v4541_v57, %v4543_v61 }
 0x25b   : > { %3382 = vrot.lane.b32.xlu1 %v3381_v44, %s4052_s13  ;;  %3377 = vrot.lane.b32.xlu2 %v3381_v44, %s4051_s12 }
 0x25d   : > { %v781_v16 = vpop.f32.mrf.mxu1 }
 0x25e   : > { %v4551_v7 = vadd.f32 %v781_v16, %v720_v40  ;;  %v752_v24 = vpop.f32.mrf.mxu0  ;;  %v4570_v16 = vpop.permute.xlu2 %1229 }
 0x25f   : > { %v4553_v25 = vadd.f32 %v752_v24, %v720_v40  ;;  %v4566_v40 = vpop.permute.xlu0 %1225 }
 0x261   : > { %v3401_v28 = vpack.i.bf16 %v4551_v7, %v4553_v25 }
 0x263   : > { %3402 = vrot.lane.b32.xlu0 %v3401_v28, %s4053_s14  ;;  %3392 = vrot.lane.b32.xlu1 %v3401_v28, %s4051_s12 }
 0x264   : > { %3387 = vrot.lane.b32.xlu2 %v3381_v44, %s4053_s14  ;;  %v4575_v44 = vpop.permute.xlu1 %1171 }
 0x265   : > { %v784_v32 = vpop.f32.mrf.mxu1 }
 0x266   : > { %v4562_v34 = vadd.f32 %v784_v32, %v725_v45  ;;  %v755_v23 = vpop.f32.mrf.mxu0 }
 0x267   : > { %v4564_v18 = vadd.f32 %v755_v23, %v725_v45  ;;  %v1288_v43 = vpop.permute.xlu0 %1287 }
 0x268   : > { %v1294_v8 = vsel %vm591_vm2, %v1288_v43, %v4555_v0 }
 0x269   : > { %v3411_v3 = vpack.i.bf16 %v4562_v34, %v4564_v18 }
 0x26b   : > { %3412 = vrot.lane.b32.xlu0 %v3411_v3, %s4052_s13  ;;  %3417 = vrot.lane.b32.xlu1 %v3411_v3, %s4053_s14 }
 0x26c   : > { %3397 = vrot.lane.b32.xlu2 %v3401_v28, %s4052_s13  ;;  %v4588_v28 = vpop.permute.xlu2 %1175  ;;  %v1284_v36 = vpop.permute.xlu1 %1283 }
 0x26d   : > { %v787_v24 = vpop.f32.mrf.mxu1  ;;  %v1293_v63 = vsel %vm591_vm2, %v1284_v36, %v4545_v60 }
 0x26e   : > { %v4577_v32 = vadd.f32 %v787_v24, %v730_v59  ;;  %v758_v45 = vpop.f32.mrf.mxu0  ;;  %v1145_v24 = vmul.f32 %v4414_v35, %v4198_v29 }
 0x26f   : > { %v4579_v23 = vadd.f32 %v758_v45, %v730_v59  ;;  %v1143_v59 = vmul.f32 %v4414_v35, %v4281_v62  ;;  %v1202_v45 = vadd.f32 %v4539_v56, %v1150_v9  ;;  %v1241_v9 = vsel %vm522_vm1, %v1232_v31, %v4533_v50 }
 0x270   : > { %v1153_v58 = vadd.f32 %v1145_v24, %v4517_v5 }
 0x271   : > { %v3421_v21 = vpack.i.bf16 %v4577_v32, %v4579_v23  ;;  %v1151_v41 = vadd.f32 %v1143_v59, %v4531_v49  ;;  %v1261_v59 = vmul.f32 %v4414_v35, %v4256_v51  ;;  %v1254_v24 = vadd.f32 %v4570_v16, %v1202_v45 }
 0x272   : > { %v1205_v22 = vadd.f32 %v1190_v39, %v1153_v58 }
 0x273   : > { %3422 = vrot.lane.b32.xlu0 %v3421_v21, %s4051_s12  ;;  %3427 = vrot.lane.b32.xlu1 %v3421_v21, %s4052_s13  ;;  %v1203_v33 = vadd.f32 %v1189_v6, %v1151_v41  ;;  %v1146_v41 = vmul.f32 %v4388_v4, %v4198_v29  ;;  %v4623_v6 = vpop.permute.xlu0 %1277 }
 0x274   : > { %3407 = vrot.lane.b32.xlu2 %v3411_v3, %s4051_s12  ;;  %v1140_v3 = vmul.f32 %v4388_v4, %v4154_v12  ;;  %v1257_v15 = vadd.f32 %v1242_v42, %v1205_v22  ;;  %v1144_v22 = vmul.f32 %v4388_v4, %v4281_v62  ;;  %v4634_v42 = vpop.permute.xlu2 %1281 }
 0x275   : > { %v1255_v20 = vadd.f32 %v1241_v9, %v1203_v33  ;;  %v1154_v33 = vadd.f32 %v1146_v41, %v4517_v5  ;;  %v4637_v45 = vadd.f32 %v4634_v42, %v1254_v24  ;;  %v1207_v5 = vmul.f32 %v4414_v35, %v4245_v47 }
 0x276   : > { %v1148_v53 = vadd.f32 %v1140_v3, %v4527_v1  ;;  %v4627_v58 = vadd.f32 %v1294_v8, %v1257_v15 }
 0x277   : > { %v4629_v36 = vadd.f32 %v1293_v63, %v1255_v20  ;;  %v1206_v4 = vadd.f32 %v4523_v2, %v1154_v33 }
 0x278   : > { %v1200_v31 = vadd.f32 %v4537_v54, %v1148_v53  ;;  %v3441_v8 = vpack.i.bf16 %v4627_v58, %v4637_v45 }
 0x27a   : > { %v1252_v43 = vadd.f32 %v4566_v40, %v1200_v31 }
 0x27b   : > { %1279 = vrot.lane.b32.xlu0 %v1261_v59, %s4053_s14  ;;  %1275 = vrot.lane.b32.xlu1 %v1259_v17, %s4053_s14 }
 0x27c   : > { %3432 = vrot.lane.b32.xlu2 %v3421_v21, %s4053_s14  ;;  %v4640_v39 = vadd.f32 %v4623_v6, %v1252_v43  ;;  %v1152_v21 = vadd.f32 %v1144_v22, %v4531_v49  ;;  %v1258_v49 = vadd.f32 %v4529_v48, %v1206_v4  ;;  %v1834_v48 = vperm.slane %v4163_v13, 6 }
 0x27e   : > { %v4647_v15 = vpack.i.bf16 %v4629_v36, %v4640_v39  ;;  %v1204_v20 = vadd.f32 %v4535_v52, %v1152_v21  ;;  %v4663_v52 = vadd.f32 %v4555_v0, %v1258_v49 }
 0x280   : > { %v1256_v3 = vadd.f32 %v4533_v50, %v1204_v20  ;;  %v4679_v50 = vpop.permute.xlu2 %1227 }
 0x282   : > { %v4660_v9 = vadd.f32 %v4545_v60, %v1256_v3  ;;  %v4681_v60 = vperm.slane %v1834_v48, 2 }
 0x283   : > { %3442 = vrot.lane.b32.xlu0 %v3441_v8, %s4053_s14  ;;  %3447 = vrot.lane.b32.xlu1 %v4647_v15, %s4053_s14 }
 0x284   : > { %1223 = vrot.lane.b32.xlu2 %v1207_v5, %s4052_s13  ;;  %v4667_v2 = vpack.i.bf16 %v4660_v9, %v4663_v52  ;;  %v1862_v0 = vmul.f32 %v4681_v60, %v4191_v26  ;;  %v1860_v53 = vmul.f32 %v4681_v60, %v4200_v30  ;;  %v1966_v22 = vmul.f32 %v4681_v60, %v4221_v38 }
 0x285   : > { %v1856_v4 = vmul.f32 %v4681_v60, %v4173_v19 }
 0x28b   : > { %3462 = vrot.lane.b32.xlu1 %v3441_v8, %s4052_s13 }
 0x28c   : > { %3437 = vrot.lane.b32.xlu2 %v4667_v2, %s4053_s14 }
 0x294   : > { %3452 = vrot.lane.b32.xlu2 %v4667_v2, %s4052_s13 }
 0x29c   : > { %3467 = vrot.lane.b32.xlu2 %v4647_v15, %s4052_s13 }
 0x2a4   : > { %3482 = vrot.lane.b32.xlu2 %v3441_v8, %s4051_s12 }
 0x2ac   : > { %1423 = vperm.xlu2 %3375, %v4365_v11   ;;  %v1833_v11 = vperm.slane %v4163_v13, 2 }
 0x2ae   : > { %v4695_v63 = vperm.slane %v1833_v11, 2 }
 0x2b0   : > { %v1911_v31 = vmul.f32 %v4695_v63, %v4219_v37 }
 0x2b4   : > { %1885 = vrot.lane.b32.xlu2 %v1862_v0, %s4051_s12 }
 0x2b5   : > { %v4686_v17 = vpop.permute.xlu2 %3377 }
 0x2bc   : > { %1881 = vrot.lane.b32.xlu2 %v1860_v53, %s4051_s12 }
 0x2be   : > { %v3388_v59 = vpop.permute.xlu2 %3387 }
 0x2bf   : > { %v3389_v11 = vunpack.i.l.bf16 %v3388_v59 }
 0x2c4   : > { %1820 = vperm.xlu2 %3375, %v4145_v10  }
 0x2c6   : > { %v4693_v24 = vpop.permute.xlu2 %3397 }
 0x2cc   : > { %1931 = vrot.lane.b32.xlu2 %v1911_v31, %s4052_s13 }
 0x2cd   : > { %v4700_v41 = vpop.permute.xlu1 %3382 }
 0x2ce   : > { %v4702_v43 = vpop.permute.xlu2 %3407 }
 0x2d4   : > { %1989 = vrot.lane.b32.xlu2 %v1966_v22, %s4053_s14  ;;  %v3390_v22 = vunpack.i.h.bf16 %v3388_v59 }
 0x2d5   : > { %v3403_v10 = vpop.permute.xlu0 %3402  ;;  %v4707_v13 = vpop.permute.xlu1 %3392 }
 0x2d6   : > { %v3433_v33 = vpop.permute.xlu2 %3432  ;;  %v3404_v3 = vunpack.i.l.bf16 %v3403_v10  ;;  %v3405_v53 = vunpack.i.h.bf16 %v3403_v10  ;;  %v1141_v10 = vmul.f32 %v4414_v35, %v4165_v14 }
 0x2d7   : > { %v3434_v21 = vunpack.i.l.bf16 %v3433_v33  ;;  %v3435_v8 = vunpack.i.h.bf16 %v3433_v33  ;;  %v1963_v33 = vmul.f32 %v4695_v63, %v4243_v46 }
 0x2d9   : > { %939 = vmatpush.msra.mxu3 %v3435_v8  ;;  %v873_v20 = vsel %vm591_vm2, %v3434_v21, %v3435_v8  ;;  %v871_v21 = vsel %vm591_vm2, %v3404_v3, %v3405_v53  ;;  %v870_v8 = vsel %vm591_vm2, %v3389_v11, %v3390_v22  ;;  %v1139_v3 = vmul.f32 %v4414_v35, %v4154_v12 }
 0x2da   : > { %910 = vmatpush.msra.mxu2 %v873_v20  ;;  %v1187_v11 = vsel %vm453_vm0, %v4575_v44, %v4537_v54  ;;  %v1240_v35 = vsel %vm522_vm1, %v4679_v50, %v4570_v16  ;;  %v3384_v54 = vunpack.i.l.bf16 %v4700_v41 }
 0x2dc   : > { %1873 = vrot.lane.b32.xlu2 %v1856_v4, %s4051_s12 }
 0x2dd   : > { %v3413_v5 = vpop.permute.xlu0 %3412  ;;  %v3418_v49 = vpop.permute.xlu1 %3417 }
 0x2de   : > { %v3419_v48 = vunpack.i.l.bf16 %v3418_v49  ;;  %v3420_v0 = vunpack.i.h.bf16 %v3418_v49  ;;  %v3414_v59 = vunpack.i.l.bf16 %v3413_v5 }
 0x2e0   : > { %940 = vmatpush.msra.mxu3 %v3420_v0  ;;  %v872_v31 = vsel %vm591_vm2, %v3419_v48, %v3420_v0  ;;  %v3415_v0 = vunpack.i.h.bf16 %v3413_v5  ;;  %v1188_v5 = vsel %vm453_vm0, %v4588_v28, %v4539_v56 }
 0x2e1   : > { %911 = vmatpush.msra.mxu2 %v872_v31  ;;  %v1149_v31 = vadd.f32 %v1141_v10, %v4521_v27  ;;  %v1147_v27 = vadd.f32 %v1139_v3, %v4527_v1 }
 0x2e2   : > { %941 = vmatpush.msra.mxu3 %v3405_v53  ;;  %v1224_v53 = vpop.permute.xlu2 %1223 }
 0x2e3   : > { %912 = vmatpush.msra.mxu2 %v871_v21  ;;  %v3400_v21 = vunpack.i.h.bf16 %v4693_v24  ;;  %v1239_v44 = vsel %vm522_vm1, %v1224_v53, %v4566_v40  ;;  %v1201_v10 = vadd.f32 %v1188_v5, %v1149_v31 }
 0x2e4   : > { %1983 = vrot.lane.b32.xlu2 %v1963_v33, %s4053_s14  ;;  %942 = vmatpush.msra.mxu3 %v3390_v22  ;;  %v3399_v22 = vunpack.i.l.bf16 %v4693_v24  ;;  %v3385_v24 = vunpack.i.h.bf16 %v4700_v41 }
 0x2e5   : > { %v3423_v20 = vpop.permute.xlu0 %3422  ;;  %v3428_v4 = vpop.permute.xlu1 %3427  ;;  %913 = vmatpush.msra.mxu2 %v870_v8  ;;  %v844_v8 = vsel %vm522_vm1, %v3414_v59, %v3415_v0  ;;  %v1253_v1 = vadd.f32 %v1240_v35, %v1201_v10 }
 0x2e6   : > { %v3429_v49 = vunpack.i.l.bf16 %v3428_v4  ;;  %v3430_v48 = vunpack.i.h.bf16 %v3428_v4  ;;  %v1199_v4 = vadd.f32 %v1187_v11, %v1147_v27  ;;  %v3424_v56 = vunpack.i.l.bf16 %v3423_v20 }
 0x2e7   : > { %v843_v16 = vsel %vm522_vm1, %v3399_v22, %v3400_v21  ;;  %v3425_v28 = vunpack.i.h.bf16 %v3423_v20  ;;  %v842_v41 = vsel %vm522_vm1, %v3384_v54, %v3385_v24  ;;  %v3410_v20 = vunpack.i.h.bf16 %v4702_v43 }
 0x2e8   : > { %943 = vmatpush.msra.mxu3 %v3430_v48  ;;  %v845_v33 = vsel %vm522_vm1, %v3429_v49, %v3430_v48  ;;  %v1251_v50 = vadd.f32 %v1239_v44, %v1199_v4  ;;  %v3395_v11 = vunpack.i.h.bf16 %v4707_v13  ;;  %v3379_v22 = vunpack.i.l.bf16 %v4686_v17  ;;  %v6153_v4 = vld [vmem:[#allocation14_spill] sm:$0xff] }
 0x2e9   : > { %914 = vmatpush.msra.mxu2 %v845_v33  ;;  %v817_v53 = vsel %vm453_vm0, %v3424_v56, %v3425_v28  ;;  %v6154_v56 = vld [vmem:[#allocation13_spill] sm:$0xff] }
 0x2ea   : > { %944 = vmatpush.msra.mxu3 %v3415_v0  ;;  %v3409_v0 = vunpack.i.l.bf16 %v4702_v43  ;;  %v3438_v33 = vpop.permute.xlu2 %3437 }
 0x2eb   : > { %915 = vmatpush.msra.mxu2 %v844_v8  ;;  %v3439_v27 = vunpack.i.l.bf16 %v3438_v33 }
 0x2ec   : > { %945 = vmatpush.msra.mxu3 %v3400_v21  ;;  %v816_v43 = vsel %vm453_vm0, %v3409_v0, %v3410_v20  ;;  %v3380_v21 = vunpack.i.h.bf16 %v4686_v17 }
 0x2ed   : > { %v1280_v49 = vpop.permute.xlu0 %1279  ;;  %v1276_v48 = vpop.permute.xlu1 %1275  ;;  %916 = vmatpush.msra.mxu2 %v843_v16 }
 0x2ee   : > { %v1292_v40 = vsel %vm591_vm2, %v1280_v49, %v4634_v42  ;;  %v1291_v59 = vsel %vm591_vm2, %v1276_v48, %v4623_v6  ;;  %946 = vmatpush.msra.mxu3 %v3385_v24  ;;  %v3394_v42 = vunpack.i.l.bf16 %v4707_v13  ;;  %v814_v8 = vsel %vm453_vm0, %v3379_v22, %v3380_v21  ;;  %v885_v48 = vld [vmem:[%s6079_s5 + $0x18] sm:$0xff] }
 0x2ef   : > { %v4749_v31 = vadd.f32 %v1292_v40, %v1253_v1  ;;  %v4751_v3 = vadd.f32 %v1291_v59, %v1251_v50  ;;  %917 = vmatpush.msra.mxu2 %v842_v41  ;;  %v3440_v24 = vunpack.i.h.bf16 %v3438_v33  ;;  %v4824_v50 = vld [vmem:[%s6076_s2 + $0x18] sm:$0xff]  ;;  %v1861_v49 = vmul.f32 %v4695_v63, %v4191_v26  ;;  %v4836_v40 = vld [vmem:[%s6076_s2 + $0x10] sm:$0xff]  ;;  %v4863_v33 = vld [vmem:[%s6076_s2] sm:$0xff] }
 0x2f0   : > { %947 = vmatpush.msra.mxu3 %v3425_v28  ;;  %v815_v13 = vsel %vm453_vm0, %v3394_v42, %v3395_v11  ;;  %v884_v28 = vld [vmem:[%s6079_s5 + $0x10] sm:$0xff]  ;;  %v1859_v59 = vmul.f32 %v4695_v63, %v4200_v30  ;;  %v6156_v41 = vld [vmem:[#allocation5_spill] sm:$0xff]  ;;  %v1912_v22 = vmul.f32 %v4681_v60, %v4219_v37  ;;  %6158 = vst [vmem:[#allocation14_spill] sm:$0xff] %v4863_v33 }
 0x2f1   : > { %918 = vmatpush.msra.mxu2 %v817_v53  ;;  %v3476_v6 = vpack.i.bf16 %v4751_v3, %v4749_v31  ;;  %v1914_v0 = vmul.f32 %v4681_v60, %v6156_v41  ;;  %v6157_v53 = vld [vmem:[#allocation3_spill] sm:$0xff] }
 0x2f2   : > { %948 = vmatpush.msra.mxu3 %v3410_v20  ;;  %v1913_v20 = vmul.f32 %v4695_v63, %v6156_v41  ;;  %v1858_v42 = vmul.f32 %v4681_v60, %v6157_v53 }
 0x2f3   : > { %3477 = vrot.lane.b32.xlu1 %v3476_v6, %s4052_s13  ;;  %3457 = vrot.lane.b32.xlu0 %v3476_v6, %s4053_s14 }
 0x2f4   : > { %919 = vmatpush.msra.mxu2 %v816_v43  ;;  %949 = vmatpush.msra.mxu3 %v3395_v11  ;;  %v1965_v11 = vmul.f32 %v4695_v63, %v4221_v38  ;;  %v1855_v43 = vmul.f32 %v4695_v63, %v4173_v19 }
 0x2f5   : > { %v4764_v5 = vpop.permute.xlu0 %3442  ;;  %v4766_v35 = vpop.permute.xlu1 %3447 }
 0x2f6   : > { %v3445_v54 = vunpack.i.h.bf16 %v4764_v5  ;;  %920 = vmatpush.msra.mxu2 %v815_v13  ;;  %950 = vmatpush.msra.mxu3 %v3380_v21  ;;  %v3450_v44 = vunpack.i.h.bf16 %v4766_v35  ;;  %v6159_v21 = vld [vmem:[#allocation8_spill] sm:$0xff] }
 0x2f7   : > { %v1909_v13 = vmul.f32 %v4695_v63, %v6159_v21 }
 0x2f8   : > { %921 = vmatpush.msra.mxu2 %v814_v8  ;;  %951 = vmatpush.msra.mxu3 %v4577_v32  ;;  %v1394_v17 = vsel %vm591_vm2, %v3445_v54, %v3439_v27  ;;  %v1393_v10 = vsel %vm591_vm2, %v3450_v44, %v3440_v24  ;;  %v882_v32 = vld [vmem:[%s6079_s5] sm:$0xff]  ;;  %v1964_v54 = vmul.f32 %v4681_v60, %v4243_v46 }
 0x2f9   : > { %1431 = vmatpush.msrb.mxu1 %v1394_v17 }
 0x2fa   : > { %922 = vmatpush.msra.mxu2 %v4579_v23  ;;  %952 = vmatpush.msra.mxu3 %v4562_v34  ;;  %v4788_v34 = vpop.permute.xlu2 %3452  ;;  %v6152_v23 = vld [vmem:[#allocation15_spill] sm:$0xff] }
 0x2fb   : > { %3492 = vrot.lane.b32.xlu1 %v3476_v6, %s4051_s12  ;;  %3472 = vrot.lane.b32.xlu0 %v4667_v2, %s4051_s12  ;;  %6155 = vst [vmem:[#allocation15_spill] sm:$0xff] %v4836_v40  ;;  %v1857_v6 = vmul.f32 %v4695_v63, %v6157_v53 }
 0x2fc   : > { %923 = vmatpush.msra.mxu2 %v4564_v18  ;;  %1432 = vmatpush.msrb.mxu1 %v1393_v10 }
 0x2fd   : > { %953 = vmatpush.msra.mxu3 %v4551_v7  ;;  %v3444_v7 = vunpack.i.l.bf16 %v4764_v5  ;;  %v4801_v18 = vpop.permute.xlu1 %3462  ;;  %v1910_v5 = vmul.f32 %v4681_v60, %v6159_v21 }
 0x2fe   : > { %924 = vmatpush.msra.mxu2 %v4553_v25  ;;  %v883_v25 = vld [vmem:[%s6079_s5 + $0x8] sm:$0xff]  ;;  %v3464_v16 = vunpack.i.l.bf16 %v4801_v18 }
 0x2ff   : > { %954 = vmatpush.msra.mxu3 %v4541_v57  ;;  %v3449_v57 = vunpack.i.l.bf16 %v4766_v35 }
 0x300   : > { %925 = vmatpush.msra.mxu2 %v4543_v61  ;;  %955 = vmatmul.f32.vlgmr.msra.gmra.mxu3 %v882_v32  ;;  %v3454_v61 = vunpack.i.l.bf16 %v4788_v34 }
 0x301   : > { %926 = vmatmul.f32.vlgmr.msra.gmra.mxu2 %v882_v32 }
 0x302   : > { %1460 = vmatpush.msrb.mxu2 %v3439_v27  ;;  %v4806_v2 = vpop.permute.xlu2 %3467  ;;  %v1907_v27 = vmul.f32 %v4695_v63, %v4245_v47 }
 0x303   : > { %1428 = vperm.xlu1 %3374, %v6152_v23   ;;  %3487 = vrot.lane.b32.xlu0 %v4647_v15, %s4051_s12  ;;  %v3455_v15 = vunpack.i.h.bf16 %v4788_v34  ;;  %v3469_v1 = vunpack.i.l.bf16 %v4806_v2  ;;  %v3470_v23 = vunpack.i.h.bf16 %v4806_v2 }
 0x304   : > { %1461 = vmatpush.msrb.mxu2 %v3440_v24  ;;  %v3465_v24 = vunpack.i.h.bf16 %v4801_v18 }
 0x306   : > { %1462 = vmatpush.msrb.mxu2 %v3444_v7 }
 0x308   : > { %1463 = vmatpush.msrb.mxu2 %v3449_v57  ;;  %958 = vmatmul.f32.gmra.mxu3 %v883_v25 }
 0x309   : > { %929 = vmatmul.f32.gmra.mxu2 %v883_v25 }
 0x30a   : > { %1464 = vmatpush.msrb.mxu2 %v3454_v61 }
 0x30b   : > { %1413 = vperm.xlu1 %3374, %v6153_v4   ;;  %1418 = vperm.xlu0 %3313, %v6154_v56   ;;  %v1366_v56 = vsel %vm522_vm1, %v3465_v24, %v3454_v61  ;;  %v6165_v24 = vld [vmem:[#allocation23_spill] sm:$0xff] }
 0x30c   : > { %1465 = vmatpush.msrb.mxu2 %v3455_v15 }
 0x30e   : > { %1466 = vmatpush.msrb.mxu2 %v3464_v16 }
 0x310   : > { %1467 = vmatpush.msrb.mxu2 %v3469_v1  ;;  %961 = vmatmul.f32.gmra.mxu3 %v884_v28 }
 0x311   : > { %932 = vmatmul.f32.gmra.mxu2 %v884_v28 }
 0x313   : > { %1883 = vrot.lane.b32.xlu1 %v1861_v49, %s4051_s12  ;;  %1830 = vperm.xlu0 %3313, %v4824_v50  }
 0x318   : > { %964 = vmatmul.f32.gmra.mxu3 %v885_v48 }
 0x319   : > { %935 = vmatmul.f32.gmra.mxu2 %v885_v48 }
 0x31b   : > { %1879 = vrot.lane.b32.xlu1 %v1859_v59, %s4051_s12  ;;  %1825 = vperm.xlu0 %3313, %v4836_v40   ;;  %v3483_v59 = vpop.permute.xlu2 %3482 }
 0x323   : > { %1937 = vrot.lane.b32.xlu1 %v1914_v0, %s4052_s13  ;;  %1935 = vrot.lane.b32.xlu0 %v1913_v20, %s4052_s13  ;;  %v3485_v0 = vunpack.i.h.bf16 %v3483_v59  ;;  %v3484_v20 = vunpack.i.l.bf16 %v3483_v59 }
 0x32b   : > { %1877 = vrot.lane.b32.xlu1 %v1858_v42, %s4051_s12  ;;  %1875 = vrot.lane.b32.xlu0 %v1857_v6, %s4051_s12 }
 0x333   : > { %1987 = vrot.lane.b32.xlu1 %v1965_v11, %s4053_s14  ;;  %1933 = vrot.lane.b32.xlu0 %v1912_v22, %s4052_s13 }
 0x33b   : > { %1871 = vrot.lane.b32.xlu1 %v1855_v43, %s4051_s12  ;;  %1815 = vperm.xlu0 %3313, %v4863_v33   ;;  %v6160_v43 = vld [vmem:[#allocation16_spill] sm:$0xff] }
 0x343   : > { %1929 = vrot.lane.b32.xlu1 %v1910_v5, %s4052_s13  ;;  %1927 = vrot.lane.b32.xlu0 %v1909_v13, %s4052_s13 }
 0x34b   : > { %1923 = vrot.lane.b32.xlu1 %v1907_v27, %s4052_s13  ;;  %1985 = vrot.lane.b32.xlu0 %v1964_v54, %s4053_s14 }
 0x365   : > { %v3458_v44 = vpop.permute.xlu0 %3457  ;;  %v3478_v32 = vpop.permute.xlu1 %3477 }
 0x366   : > { %v3460_v8 = vunpack.i.h.bf16 %v3458_v44  ;;  %v3459_v17 = vunpack.i.l.bf16 %v3458_v44  ;;  %v3479_v4 = vunpack.i.l.bf16 %v3478_v32  ;;  %v3480_v49 = vunpack.i.h.bf16 %v3478_v32 }
 0x368   : > { %v1392_v10 = vsel %vm591_vm2, %v3459_v17, %v3444_v7  ;;  %v1391_v25 = vsel %vm591_vm2, %v3460_v8, %v3449_v57  ;;  %v1365_v7 = vsel %vm522_vm1, %v3470_v23, %v3455_v15  ;;  %v1364_v35 = vsel %vm522_vm1, %v3479_v4, %v3464_v16  ;;  %v6164_v8 = vld [vmem:[#allocation18_spill] sm:$0xff] }
 0x369   : > { %1433 = vmatpush.msrb.mxu1 %v1392_v10  ;;  %v1363_v61 = vsel %vm522_vm1, %v3480_v49, %v3469_v1  ;;  %v6167_v49 = vld [vmem:[#allocation22_spill] sm:$0xff] }
 0x36b   : > { %1434 = vmatpush.msrb.mxu1 %v1391_v25  ;;  %v4936_v25 = vpop.permute.xlu2 %1423 }
 0x36d   : > { %v3473_v28 = vpop.permute.xlu0 %3472  ;;  %1435 = vmatpush.msrb.mxu1 %v1366_v56  ;;  %v3493_v34 = vpop.permute.xlu1 %3492  ;;  %v6166_v56 = vld [vmem:[#allocation19_spill] sm:$0xff] }
 0x36e   : > { %v3474_v48 = vunpack.i.l.bf16 %v3473_v28  ;;  %v3475_v57 = vunpack.i.h.bf16 %v3473_v28  ;;  %v3494_v6 = vunpack.i.l.bf16 %v3493_v34  ;;  %v3495_v22 = vunpack.i.h.bf16 %v3493_v34 }
 0x36f   : > { %1436 = vmatpush.msrb.mxu1 %v1365_v7  ;;  %v1961_v34 = vmul.f32 %v4695_v63, %v4256_v51 }
 0x370   : > { %1468 = vmatpush.msrb.mxu2 %v3474_v48  ;;  %v1338_v15 = vsel %vm453_vm0, %v3485_v0, %v3474_v48  ;;  %v1336_v2 = vsel %vm453_vm0, %v3494_v6, %v3484_v20 }
 0x371   : > { %1437 = vmatpush.msrb.mxu1 %v1364_v35  ;;  %v1962_v35 = vmul.f32 %v4681_v60, %v4256_v51 }
 0x372   : > { %1469 = vmatpush.msrb.mxu2 %v3475_v57 }
 0x373   : > { %1438 = vmatpush.msrb.mxu1 %v1363_v61  ;;  %v4952_v0 = vpop.permute.xlu2 %1885 }
 0x374   : > { %1470 = vmatpush.msrb.mxu2 %v3484_v20 }
 0x375   : > { %v3488_v42 = vpop.permute.xlu0 %3487  ;;  %1439 = vmatpush.msrb.mxu1 %v1338_v15  ;;  %v4957_v61 = vpop.permute.xlu1 %1428 }
 0x376   : > { %v3490_v18 = vunpack.i.h.bf16 %v3488_v42  ;;  %v3489_v11 = vunpack.i.l.bf16 %v3488_v42 }
 0x378   : > { %1471 = vmatpush.msrb.mxu2 %v3489_v11  ;;  %v1337_v16 = vsel %vm453_vm0, %v3490_v18, %v3475_v57  ;;  %v1335_v1 = vsel %vm453_vm0, %v3495_v22, %v3489_v11  ;;  %v1960_v18 = vmul.f32 %v4681_v60, %v4267_v55  ;;  %v1908_v11 = vmul.f32 %v4681_v60, %v4245_v47 }
 0x379   : > { %1440 = vmatpush.msrb.mxu1 %v1337_v16 }
 0x37a   : > { %1472 = vmatpush.msrb.mxu2 %v4663_v52  ;;  %v6161_v52 = vld [vmem:[#allocation21_spill] sm:$0xff] }
 0x37b   : > { %1441 = vmatpush.msrb.mxu1 %v1336_v2  ;;  %v4962_v15 = vpop.permute.xlu2 %1881 }
 0x37c   : > { %1473 = vmatpush.msrb.mxu2 %v4660_v9 }
 0x37d   : > { %1442 = vmatpush.msrb.mxu1 %v1335_v1  ;;  %v1419_v20 = vpop.permute.xlu0 %1418  ;;  %v4965_v42 = vpop.permute.xlu1 %1413  ;;  %v1959_v1 = vmul.f32 %v4695_v63, %v4267_v55 }
 0x37e   : > { %1474 = vmatpush.msrb.mxu2 %v4637_v45 }
 0x37f   : > { %1443 = vmatpush.msrb.mxu1 %v4627_v58 }
 0x380   : > { %1475 = vmatpush.msrb.mxu2 %v4640_v39  ;;  %v6163_v39 = vld [vmem:[#allocation20_spill] sm:$0xff] }
 0x381   : > { %1444 = vmatpush.msrb.mxu1 %v4629_v36  ;;  %1476 = vmatmul.f32.vlgmr.msrb.gmra.mxu2 %v6160_v43  ;;  %v6162_v36 = vld [vmem:[#allocation17_spill] sm:$0xff] }
 0x383   : > { %v956_v5 = vpop.f32.mrf.mxu3  ;;  %1445 = vmatpush.msrb.mxu1 %v4749_v31  ;;  %v4975_v16 = vpop.permute.xlu2 %1820 }
 0x384   : > { %v957_v13 = vadd.f32 %v956_v5, %v6161_v52  ;;  %v927_v27 = vpop.f32.mrf.mxu2 }
 0x385   : > { %v4913_v9 = vadd.f32 %v927_v27, %v6161_v52  ;;  %1446 = vmatpush.msrb.mxu1 %v4751_v3  ;;  %v4967_v6 = vpop.permute.xlu0 %1830  ;;  %v4977_v22 = vpop.permute.xlu1 %1883 }
 0x386   : > { %1447 = vmatmul.f32.vlgmr.msrb.gmra.mxu1 %v6160_v43 }
 0x387   : > { %v3506_v58 = vpack.i.bf16 %v957_v13, %v4913_v9 }
 0x389   : > { %3507 = vrot.lane.b32.xlu1 %v3506_v58, %s4053_s14  ;;  %3502 = vrot.lane.b32.xlu0 %v3506_v58, %s4052_s13 }
 0x38a   : > { %3497 = vrot.lane.b32.xlu2 %v3506_v58, %s4051_s12  ;;  %1479 = vmatmul.f32.gmra.mxu2 %v6162_v36 }
 0x38b   : > { %v959_v45 = vpop.f32.mrf.mxu3  ;;  %v4984_v43 = vpop.permute.xlu2 %1931 }
 0x38c   : > { %v960_v31 = vadd.f32 %v959_v45, %v6163_v39  ;;  %v930_v54 = vpop.f32.mrf.mxu2 }
 0x38d   : > { %v4924_v44 = vadd.f32 %v930_v54, %v6163_v39  ;;  %v4979_v2 = vpop.permute.xlu0 %1825  ;;  %v4986_v5 = vpop.permute.xlu1 %1879 }
 0x38e   : > { %1450 = vmatmul.f32.gmra.mxu1 %v6162_v36 }
 0x38f   : > { %v3516_v3 = vpack.i.bf16 %v960_v31, %v4924_v44 }
 0x391   : > { %3517 = vrot.lane.b32.xlu1 %v3516_v3, %s4052_s13  ;;  %3512 = vrot.lane.b32.xlu0 %v3516_v3, %s4051_s12 }
 0x392   : > { %3522 = vrot.lane.b32.xlu2 %v3516_v3, %s4053_s14  ;;  %1482 = vmatmul.f32.gmra.mxu2 %v6164_v8 }
 0x393   : > { %v962_v17 = vpop.f32.mrf.mxu3  ;;  %v4990_v13 = vpop.permute.xlu2 %1989 }
 0x394   : > { %v963_v10 = vadd.f32 %v962_v17, %v6165_v24  ;;  %v933_v32 = vpop.f32.mrf.mxu2 }
 0x395   : > { %v4934_v23 = vadd.f32 %v933_v32, %v6165_v24  ;;  %v4988_v52 = vpop.permute.xlu0 %1935  ;;  %v4992_v27 = vpop.permute.xlu1 %1937 }
 0x396   : > { %1453 = vmatmul.f32.gmra.mxu1 %v6164_v8 }
 0x397   : > { %v3526_v4 = vpack.i.bf16 %v963_v10, %v4934_v23 }
 0x399   : > { %3527 = vrot.lane.b32.xlu1 %v3526_v4, %s4051_s12  ;;  %3537 = vrot.lane.b32.xlu0 %v3526_v4, %s4053_s14 }
 0x39a   : > { %3532 = vrot.lane.b32.xlu2 %v3526_v4, %s4052_s13  ;;  %1485 = vmatmul.f32.gmra.mxu2 %v6166_v56 }
 0x39b   : > { %v965_v28 = vpop.f32.mrf.mxu3  ;;  %v4996_v36 = vpop.permute.xlu2 %1873 }
 0x39c   : > { %v966_v7 = vadd.f32 %v965_v28, %v6167_v49  ;;  %v936_v48 = vpop.f32.mrf.mxu2 }
 0x39d   : > { %v4946_v59 = vadd.f32 %v936_v48, %v6167_v49  ;;  %v4994_v58 = vpop.permute.xlu0 %1875  ;;  %v4998_v45 = vpop.permute.xlu1 %1877 }
 0x39e   : > { %1456 = vmatmul.f32.gmra.mxu1 %v6166_v56 }
 0x39f   : > { %v3546_v57 = vpack.i.bf16 %v966_v7, %v4946_v59 }
 0x3a1   : > { %1981 = vrot.lane.b32.xlu1 %v1962_v35, %s4053_s14  ;;  %3547 = vrot.lane.b32.xlu0 %v3546_v57, %s4052_s13 }
 0x3a2   : > { %3542 = vrot.lane.b32.xlu2 %v3546_v57, %s4051_s12 }
 0x3a3   : > { %v5002_v31 = vpop.permute.xlu2 %1983 }
 0x3a5   : > { %v5000_v39 = vpop.permute.xlu0 %1933  ;;  %v5004_v54 = vpop.permute.xlu1 %1987 }
 0x3a9   : > { %1979 = vrot.lane.b32.xlu0 %v1961_v34, %s4053_s14 }
 0x3aa   : > { %3552 = vrot.lane.b32.xlu2 %v3546_v57, %s4053_s14 }
 0x3ad   : > { %v5006_v3 = vpop.permute.xlu0 %1815  ;;  %v5010_v17 = vpop.permute.xlu1 %1871 }
 0x3b1   : > { %1977 = vrot.lane.b32.xlu0 %v1960_v18, %s4053_s14 }
 0x3b2   : > { %1925 = vrot.lane.b32.xlu2 %v1908_v11, %s4052_s13 }
 0x3b5   : > { %v5012_v24 = vpop.permute.xlu0 %1927  ;;  %v5014_v32 = vpop.permute.xlu1 %1929 }
 0x3ba   : > { %1975 = vrot.lane.b32.xlu2 %v1959_v1, %s4053_s14 }
 0x3bd   : > { %v5016_v4 = vpop.permute.xlu0 %1985  ;;  %v5020_v7 = vpop.permute.xlu1 %1923 }
 0x3e4   : > { %v5008_v8 = vpop.permute.xlu2 %3497 }
 0x3ec   : > { %v3523_v10 = vpop.permute.xlu2 %3522 }
 0x3ed   : > { %v3525_v47 = vunpack.i.h.bf16 %v3523_v10  ;;  %v3524_v46 = vunpack.i.l.bf16 %v3523_v10 }
 0x3f4   : > { %v3533_v56 = vpop.permute.xlu2 %3532 }
 0x3fb   : > { %v3503_v28 = vpop.permute.xlu0 %3502  ;;  %v3508_v34 = vpop.permute.xlu1 %3507 }
 0x3fc   : > { %v5018_v49 = vpop.permute.xlu2 %3542  ;;  %v3510_v53 = vunpack.i.h.bf16 %v3508_v34  ;;  %v3509_v40 = vunpack.i.l.bf16 %v3508_v34 }
 0x403   : > { %v5022_v48 = vpop.permute.xlu0 %3512  ;;  %v5024_v57 = vpop.f32.mrf.mxu1 }
 0x404   : > { %v3553_v35 = vpop.permute.xlu2 %3552  ;;  %v5026_v1 = vpop.f32.mrf.mxu2 }
 0x405   : > { %v3555_v18 = vunpack.i.h.bf16 %v3553_v35  ;;  %v3554_v11 = vunpack.i.l.bf16 %v3553_v35  ;;  %v3518_v30 = vpop.permute.xlu1 %3517 }
 0x407   : > { %v1043_v55 = vsel %vm591_vm2, %v3554_v11, %v3555_v18  ;;  %v1041_v18 = vsel %vm591_vm2, %v3524_v46, %v3525_v47  ;;  %v3520_v47 = vunpack.i.h.bf16 %v3518_v30  ;;  %v3519_v11 = vunpack.i.l.bf16 %v3518_v30 }
 0x408   : > { %1076 = vmatpush.msrb.mxu0 %v1043_v55  ;;  %v3544_v30 = vunpack.i.l.bf16 %v5018_v49 }
 0x40b   : > { %v3538_v51 = vpop.permute.xlu0 %3537  ;;  %v1451_v19 = vpop.f32.mrf.mxu1 }
 0x40c   : > { %v3540_v21 = vunpack.i.h.bf16 %v3538_v51  ;;  %v3539_v33 = vunpack.i.l.bf16 %v3538_v51  ;;  %v5029_v38 = vadd.f32 %v1451_v19, %v1419_v20  ;;  %v1040_v19 = vsel %vm591_vm2, %v3509_v40, %v3510_v53 }
 0x40d   : > { %v1480_v37 = vpop.f32.mrf.mxu2  ;;  %v3505_v40 = vunpack.i.h.bf16 %v3503_v28  ;;  %v3504_v53 = vunpack.i.l.bf16 %v3503_v28 }
 0x40e   : > { %v5031_v41 = vadd.f32 %v1480_v37, %v1419_v20  ;;  %v1042_v35 = vsel %vm591_vm2, %v3539_v33, %v3540_v21  ;;  %v3535_v37 = vunpack.i.h.bf16 %v3533_v56  ;;  %v3534_v20 = vunpack.i.l.bf16 %v3533_v56 }
 0x40f   : > { %1077 = vmatpush.msrb.mxu0 %v1042_v35 }
 0x410   : > { %v5037_v55 = vpack.i.bf16 %v5031_v41, %v5029_v38 }
 0x411   : > { %1078 = vmatpush.msrb.mxu0 %v1041_v18 }
 0x412   : > { %3557 = vrot.lane.b32.xlu0 %v5037_v55, %s4053_s14 }
 0x413   : > { %v3548_v51 = vpop.permute.xlu0 %3547  ;;  %1079 = vmatpush.msrb.mxu0 %v1040_v19  ;;  %v1454_v21 = vpop.f32.mrf.mxu1  ;;  %v1018_v19 = vsel %vm522_vm1, %v3534_v20, %v3535_v37 }
 0x414   : > { %v3550_v10 = vunpack.i.h.bf16 %v3548_v51  ;;  %v3549_v33 = vunpack.i.l.bf16 %v3548_v51  ;;  %v5043_v34 = vadd.f32 %v1454_v21, %v4936_v25  ;;  %v3528_v51 = vpop.permute.xlu1 %3527  ;;  %v3545_v21 = vunpack.i.h.bf16 %v5018_v49 }
 0x415   : > { %v1483_v46 = vpop.f32.mrf.mxu2  ;;  %v3530_v28 = vunpack.i.h.bf16 %v3528_v51  ;;  %v3529_v37 = vunpack.i.l.bf16 %v3528_v51  ;;  %v3515_v49 = vunpack.i.h.bf16 %v5022_v48  ;;  %v3499_v51 = vunpack.i.l.bf16 %v5008_v8 }
 0x416   : > { %v5046_v35 = vadd.f32 %v1483_v46, %v4936_v25  ;;  %v1019_v18 = vsel %vm522_vm1, %v3549_v33, %v3550_v10  ;;  %v1017_v25 = vsel %vm522_vm1, %v3519_v11, %v3520_v47  ;;  %v1016_v10 = vsel %vm522_vm1, %v3504_v53, %v3505_v40 }
 0x417   : > { %1080 = vmatpush.msrb.mxu0 %v1019_v18  ;;  %v3514_v18 = vunpack.i.l.bf16 %v5022_v48  ;;  %v995_v47 = vsel %vm453_vm0, %v3544_v30, %v3545_v21  ;;  %v3500_v11 = vunpack.i.h.bf16 %v5008_v8  ;;  %v994_v40 = vsel %vm453_vm0, %v3529_v37, %v3530_v28 }
 0x418   : > { %v5052_v56 = vpack.i.bf16 %v5046_v35, %v5043_v34  ;;  %v1841_v48 = vmul.f32 %v4695_v63, %v4165_v14  ;;  %v5084_v8 = vadd.f32 %v5024_v57, %v4965_v42  ;;  %v5088_v21 = vadd.f32 %v5026_v1, %v4965_v42 }
 0x419   : > { %1081 = vmatpush.msrb.mxu0 %v1018_v19  ;;  %v992_v30 = vsel %vm453_vm0, %v3499_v51, %v3500_v11  ;;  %v1842_v28 = vmul.f32 %v4681_v60, %v4165_v14  ;;  %v1940_v57 = vsel %vm522_vm1, %v5012_v24, %v5014_v32 }
 0x41a   : > { %3577 = vrot.lane.b32.xlu0 %v5052_v56, %s4052_s13  ;;  %3562 = vrot.lane.b32.xlu2 %v5052_v56, %s4053_s14  ;;  %v1849_v37 = vadd.f32 %v1841_v48, %v4975_v16 }
 0x41b   : > { %1082 = vmatpush.msrb.mxu0 %v1017_v25  ;;  %v1457_v20 = vpop.f32.mrf.mxu1  ;;  %v1888_v25 = vsel %vm453_vm0, %v4994_v58, %v4998_v45  ;;  %v1850_v42 = vadd.f32 %v1842_v28, %v4975_v16  ;;  %v3571_v58 = vpack.i.bf16 %v5088_v21, %v5084_v8  ;;  %v1942_v28 = vsel %vm522_vm1, %v4988_v52, %v4992_v27 }
 0x41c   : > { %v5063_v33 = vadd.f32 %v1457_v20, %v4957_v61  ;;  %v1980_v20 = vpop.permute.xlu0 %1979  ;;  %v1901_v1 = vadd.f32 %v1888_v25, %v1849_v37  ;;  %v1926_v25 = vpop.permute.xlu2 %1925 }
 0x41d   : > { %1083 = vmatpush.msrb.mxu0 %v1016_v10  ;;  %v1486_v46 = vpop.f32.mrf.mxu2  ;;  %v1982_v10 = vpop.permute.xlu1 %1981  ;;  %v1902_v24 = vadd.f32 %v4998_v45, %v1850_v42  ;;  %v1889_v45 = vsel %vm453_vm0, %v4986_v5, %v4962_v15  ;;  %v1993_v5 = vsel %vm591_vm2, %v5002_v31, %v5016_v4  ;;  %v1840_v42 = vmul.f32 %v4681_v60, %v4154_v12 }
 0x41e   : > { %v5068_v19 = vadd.f32 %v1486_v46, %v4957_v61  ;;  %v993_v61 = vsel %vm453_vm0, %v3514_v18, %v3515_v49  ;;  %v1843_v46 = vmul.f32 %v4695_v63, %v4281_v62  ;;  %v1992_v49 = vsel %vm591_vm2, %v1980_v20, %v1982_v10 }
 0x41f   : > { %1084 = vmatpush.msrb.mxu0 %v995_v47  ;;  %v1844_v18 = vmul.f32 %v4681_v60, %v4281_v62  ;;  %v1839_v20 = vmul.f32 %v4695_v63, %v4154_v12 }
 0x420   : > { %v3566_v53 = vpack.i.bf16 %v5068_v19, %v5063_v33  ;;  %v1851_v16 = vadd.f32 %v1843_v46, %v4979_v2 }
 0x421   : > { %1085 = vmatpush.msrb.mxu0 %v994_v40  ;;  %v1852_v47 = vadd.f32 %v1844_v18, %v4979_v2  ;;  %v1847_v52 = vadd.f32 %v1839_v20, %v5006_v3 }
 0x422   : > { %3567 = vrot.lane.b32.xlu1 %v3566_v53, %s4053_s14  ;;  %3607 = vrot.lane.b32.xlu0 %v3566_v53, %s4051_s12  ;;  %v1903_v40 = vadd.f32 %v1889_v45, %v1851_v16  ;;  %v1588_v16 = vld [vmem:[%s6080_s6 + $0x18] sm:$0xff] }
 0x423   : > { %3587 = vrot.lane.b32.xlu2 %v3566_v53, %s4052_s13  ;;  %1086 = vmatpush.msrb.mxu0 %v993_v61  ;;  %v1904_v53 = vadd.f32 %v4962_v15, %v1852_v47  ;;  %v2110_v47 = vld [vmem:[%s6078_s4 + $0x18] sm:$0xff] }
 0x425   : > { %1087 = vmatpush.msrb.mxu0 %v992_v30  ;;  %v1956_v48 = vadd.f32 %v5000_v39, %v1904_v53 }
 0x427   : > { %1088 = vmatpush.msrb.mxu0 %v4946_v59  ;;  %v1953_v59 = vadd.f32 %v1940_v57, %v1901_v1  ;;  %v5150_v31 = vadd.f32 %v5016_v4, %v1956_v48  ;;  %v1994_v4 = vsel %vm591_vm2, %v5004_v54, %v4990_v13  ;;  %v1848_v54 = vadd.f32 %v1840_v42, %v5006_v3  ;;  %v5268_v42 = vld [vmem:[%s6081_s7 + $0x8] sm:$0xff] }
 0x429   : > { %1089 = vmatpush.msrb.mxu0 %v4934_v23  ;;  %v1954_v23 = vadd.f32 %v5014_v32, %v1902_v24  ;;  %v5118_v11 = vadd.f32 %v1992_v49, %v1953_v59  ;;  %v1845_v32 = vmul.f32 %v4695_v63, %v4198_v29  ;;  %v1887_v63 = vsel %vm453_vm0, %v5010_v17, %v4996_v36  ;;  %v2109_v24 = vld [vmem:[%s6078_s4 + $0x10] sm:$0xff] }
 0x42a   : > { %3572 = vrot.lane.b32.xlu1 %v3571_v58, %s4053_s14  ;;  %3612 = vrot.lane.b32.xlu0 %v3571_v58, %s4051_s12  ;;  %v1899_v1 = vadd.f32 %v1887_v63, %v1847_v52  ;;  %v1587_v59 = vld [vmem:[%s6080_s6 + $0x10] sm:$0xff]  ;;  %v2510_v52 = vld [vmem:[%s6076_s2 + $0x8] sm:$0xff] }
 0x42b   : > { %3592 = vrot.lane.b32.xlu2 %v3571_v58, %s4052_s13  ;;  %1090 = vmatpush.msrb.mxu0 %v4924_v44  ;;  %v5124_v51 = vadd.f32 %v1982_v10, %v1954_v23  ;;  %v1941_v44 = vsel %vm522_vm1, %v4984_v43, %v5000_v39  ;;  %v1853_v15 = vadd.f32 %v1845_v32, %v4967_v6  ;;  %v1976_v58 = vpop.permute.xlu2 %1975  ;;  %v4036_v23 = vld [vmem:[%s4160_s11] sm:$0xff]  ;;  %v6173_v63 = vld [vmem:[#allocation7_spill] sm:$0xff] }
 0x42c   : > { %v1955_v61 = vadd.f32 %v1941_v44, %v1903_v40  ;;  %v1890_v39 = vsel %vm453_vm0, %v4977_v22, %v4952_v0  ;;  %v1900_v10 = vadd.f32 %v4996_v36, %v1848_v54  ;;  %v2534_v45 = vperm.slane %v4036_v23, 7  ;;  %v1585_v40 = vld [vmem:[%s6080_s6] sm:$0xff] }
 0x42d   : > { %1091 = vmatpush.msrb.mxu0 %v4913_v9  ;;  %v3626_v2 = vpack.i.bf16 %v5124_v51, %v5118_v11  ;;  %v1846_v9 = vmul.f32 %v4681_v60, %v4198_v29  ;;  %v1905_v37 = vadd.f32 %v1890_v39, %v1853_v15  ;;  %v1978_v60 = vpop.permute.xlu0 %1977  ;;  %v6169_v15 = vld [vmem:[#allocation5_spill] sm:$0xff] }
 0x42e   : > { %v5147_v30 = vadd.f32 %v1993_v5, %v1955_v61  ;;  %v1991_v3 = vsel %vm591_vm2, %v1976_v58, %v1978_v60  ;;  %v1952_v18 = vadd.f32 %v1926_v25, %v1900_v10  ;;  %v5221_v44 = vperm.slane %v2534_v45, 3  ;;  %v2108_v5 = vld [vmem:[%s6078_s4 + $0x8] sm:$0xff] }
 0x42f   : > { %v1854_v43 = vadd.f32 %v1846_v9, %v4967_v6  ;;  %v1957_v57 = vadd.f32 %v1942_v28, %v1905_v37  ;;  %v6168_v9 = vld [vmem:[#allocation4_spill] sm:$0xff]  ;;  %v6170_v28 = vld [vmem:[#allocation15_spill] sm:$0xff] }
 0x430   : > { %v3641_v6 = vpack.i.bf16 %v5150_v31, %v5147_v30  ;;  %v5194_v17 = vadd.f32 %v1978_v60, %v1952_v18  ;;  %v2562_v53 = vmul.f32 %v5221_v44, %v4191_v26  ;;  %v2666_v60 = vmul.f32 %v5221_v44, %v6173_v63 }
 0x432   : > { %3582 = vrot.lane.b32.xlu1 %v5037_v55, %s4052_s13  ;;  %3627 = vrot.lane.b32.xlu0 %v3626_v2, %s4053_s14 }
 0x433   : > { %3602 = vrot.lane.b32.xlu2 %v5037_v55, %s4051_s12  ;;  %v1906_v55 = vadd.f32 %v4952_v0, %v1854_v43  ;;  %v5173_v0 = vadd.f32 %v1994_v4, %v1957_v57  ;;  %v2614_v43 = vmul.f32 %v5221_v44, %v6169_v15  ;;  %v6172_v4 = vld [vmem:[#allocation6_spill] sm:$0xff] }
 0x434   : > { %v2612_v54 = vmul.f32 %v5221_v44, %v6172_v4 }
 0x435   : > { %v1958_v22 = vadd.f32 %v4992_v27, %v1906_v55  ;;  %v6171_v55 = vld [vmem:[#allocation3_spill] sm:$0xff] }
 0x436   : > { %v2558_v58 = vmul.f32 %v5221_v44, %v6171_v55 }
 0x437   : > { %v5181_v27 = vadd.f32 %v4990_v13, %v1958_v22 }
 0x439   : > { %v3616_v46 = vpack.i.bf16 %v5181_v27, %v5173_v0 }
 0x43a   : > { %3597 = vrot.lane.b32.xlu1 %v5052_v56, %s4051_s12  ;;  %3642 = vrot.lane.b32.xlu0 %v3641_v6, %s4052_s13  ;;  %v1939_v56 = vsel %vm522_vm1, %v5020_v7, %v1926_v25  ;;  %v1586_v7 = vld [vmem:[%s6080_s6 + $0x8] sm:$0xff] }
 0x43b   : > { %3622 = vrot.lane.b32.xlu2 %v3641_v6, %s4053_s14  ;;  %v1951_v49 = vadd.f32 %v1939_v56, %v1899_v1  ;;  %v1050_v1 = vld [vmem:[%s6081_s7 + $0x10] sm:$0xff] }
 0x43d   : > { %v5192_v13 = vadd.f32 %v1991_v3, %v1951_v49  ;;  %v6175_v49 = vld [vmem:[#allocation14_spill] sm:$0xff] }
 0x43f   : > { %v3671_v36 = vpack.i.bf16 %v5194_v17, %v5192_v13 }
 0x442   : > { %3617 = vrot.lane.b32.xlu1 %v3616_v46, %s4053_s14  ;;  %3657 = vrot.lane.b32.xlu0 %v3616_v46, %s4051_s12 }
 0x443   : > { %3637 = vrot.lane.b32.xlu2 %v3616_v46, %s4052_s13  ;;  %v6174_v46 = vld [vmem:[#allocation2_spill] sm:$0xff] }
 0x444   : > { %v2556_v3 = vmul.f32 %v5221_v44, %v6174_v46 }
 0x44a   : > { %3672 = vrot.lane.b32.xlu0 %v3671_v36, %s4051_s12  ;;  %3632 = vrot.lane.b32.xlu1 %v3671_v36, %s4053_s14 }
 0x44b   : > { %3652 = vrot.lane.b32.xlu2 %v3671_v36, %s4052_s13 }
 0x452   : > { %1596 = vperm.xlu0 %3313, %v1586_v7   ;;  %3647 = vrot.lane.b32.xlu1 %v3626_v2, %s4052_s13  ;;  %v1051_v7 = vld [vmem:[%s6081_s7 + $0x18] sm:$0xff] }
 0x453   : > { %3667 = vrot.lane.b32.xlu2 %v3626_v2, %s4051_s12  ;;  %v2107_v2 = vld [vmem:[%s6078_s4] sm:$0xff] }
 0x45a   : > { %2123 = vperm.xlu0 %3313, %v2109_v24   ;;  %3662 = vrot.lane.b32.xlu1 %v3641_v6, %s4051_s12  ;;  %v2560_v6 = vmul.f32 %v5221_v44, %v6168_v9 }
 0x45b   : > { %1601 = vperm.xlu2 %3375, %v1587_v59  }
 0x462   : > { %2530 = vperm.xlu0 %3313, %v4824_v50   ;;  %1606 = vperm.xlu1 %3374, %v1588_v16   ;;  %v2533_v50 = vperm.slane %v4036_v23, 3 }
 0x463   : > { %2128 = vperm.xlu2 %3375, %v2110_v47  }
 0x464   : > { %v5232_v32 = vperm.slane %v2533_v50, 3 }
 0x466   : > { %v2559_v61 = vmul.f32 %v5232_v32, %v6168_v9  ;;  %v2561_v48 = vmul.f32 %v5232_v32, %v4191_v26  ;;  %v2613_v25 = vmul.f32 %v5232_v32, %v6169_v15  ;;  %v5253_v26 = vld [vmem:[%s6081_s7] sm:$0xff]  ;;  %v2557_v37 = vmul.f32 %v5232_v32, %v6171_v55  ;;  %v6177_v9 = vld [vmem:[#allocation9_spill] sm:$0xff] }
 0x467   : > { %1092 = vmatmul.f32.vlgmr.msrb.gmra.mxu0 %v5253_v26  ;;  %v2611_v20 = vmul.f32 %v5232_v32, %v6172_v4 }
 0x46a   : > { %2585 = vrot.lane.b32.xlu0 %v2562_v53, %s4051_s12  ;;  %1591 = vperm.xlu1 %3374, %v1585_v40  }
 0x46b   : > { %2113 = vperm.xlu2 %3375, %v2107_v2   ;;  %v6176_v2 = vld [vmem:[#allocation8_spill] sm:$0xff] }
 0x46c   : > { %v2609_v50 = vmul.f32 %v5232_v32, %v6176_v2 }
 0x46f   : > { %1095 = vmatmul.f32.gmra.mxu0 %v5268_v42 }
 0x472   : > { %2579 = vrot.lane.b32.xlu0 %v2559_v61, %s4051_s12  ;;  %2118 = vperm.xlu1 %3374, %v2108_v5   ;;  %v2665_v5 = vmul.f32 %v5232_v32, %v6173_v63  ;;  %v2663_v61 = vmul.f32 %v5232_v32, %v6177_v9 }
 0x473   : > { %2583 = vrot.lane.b32.xlu2 %v2561_v48, %s4051_s12 }
 0x474   : > { %v3563_v39 = vpop.permute.xlu2 %3562 }
 0x475   : > { %v3565_v16 = vunpack.i.h.bf16 %v3563_v39  ;;  %v3564_v47 = vunpack.i.l.bf16 %v3563_v39 }
 0x477   : > { %1098 = vmatmul.f32.gmra.mxu0 %v1050_v1  ;;  %v1571_v48 = vsel %vm591_vm2, %v3564_v47, %v3565_v16 }
 0x47a   : > { %2637 = vrot.lane.b32.xlu0 %v2614_v43, %s4052_s13  ;;  %2525 = vperm.xlu1 %3374, %v6170_v28  }
 0x47b   : > { %2635 = vrot.lane.b32.xlu2 %v2613_v25, %s4052_s13 }
 0x47d   : > { %v3588_v22 = vpop.permute.xlu2 %3587 }
 0x47e   : > { %v3590_v25 = vunpack.i.h.bf16 %v3588_v22  ;;  %v3589_v28 = vunpack.i.l.bf16 %v3588_v22 }
 0x47f   : > { %1101 = vmatmul.f32.gmra.mxu0 %v1051_v7  ;;  %v2610_v7 = vmul.f32 %v5221_v44, %v6176_v2 }
 0x482   : > { %2575 = vrot.lane.b32.xlu0 %v2557_v37, %s4051_s12  ;;  %2581 = vrot.lane.b32.xlu1 %v2560_v6, %s4051_s12 }
 0x483   : > { %2631 = vrot.lane.b32.xlu2 %v2611_v20, %s4052_s13 }
 0x484   : > { %v3558_v57 = vpop.permute.xlu0 %3557 }
 0x485   : > { %v5283_v10 = vpop.permute.xlu2 %3592  ;;  %v3560_v40 = vunpack.i.h.bf16 %v3558_v57  ;;  %v3559_v53 = vunpack.i.l.bf16 %v3558_v57  ;;  %v2555_v57 = vmul.f32 %v5232_v32, %v6174_v46 }
 0x486   : > { %v3594_v1 = vunpack.i.l.bf16 %v5283_v10 }
 0x487   : > { %v1570_v39 = vsel %vm591_vm2, %v3559_v53, %v3560_v40 }
 0x48a   : > { %2633 = vrot.lane.b32.xlu0 %v2612_v54, %s4052_s13  ;;  %2520 = vperm.xlu1 %3374, %v2510_v52   ;;  %v1544_v54 = vsel %vm522_vm1, %v3589_v28, %v3590_v25 }
 0x48b   : > { %2689 = vrot.lane.b32.xlu2 %v2666_v60, %s4053_s14 }
 0x48c   : > { %v3578_v56 = vpop.permute.xlu0 %3577 }
 0x48d   : > { %v5297_v23 = vpop.permute.xlu2 %3602  ;;  %v3580_v6 = vunpack.i.h.bf16 %v3578_v56  ;;  %v3579_v4 = vunpack.i.l.bf16 %v3578_v56  ;;  %v3595_v56 = vunpack.i.h.bf16 %v5283_v10 }
 0x48e   : > { %v3605_v47 = vunpack.i.h.bf16 %v5297_v23 }
 0x48f   : > { %v1543_v22 = vsel %vm522_vm1, %v3579_v4, %v3580_v6 }
 0x492   : > { %2515 = vperm.xlu0 %3313, %v6175_v49   ;;  %2577 = vrot.lane.b32.xlu1 %v2558_v58, %s4051_s12 }
 0x493   : > { %2573 = vrot.lane.b32.xlu2 %v2556_v3, %s4051_s12 }
 0x494   : > { %v3568_v18 = vpop.permute.xlu1 %3567  ;;  %v5292_v36 = vpop.permute.xlu0 %3607 }
 0x495   : > { %v3570_v24 = vunpack.i.h.bf16 %v3568_v18  ;;  %v3569_v59 = vunpack.i.l.bf16 %v3568_v18  ;;  %v5314_v52 = vpop.permute.xlu2 %3622  ;;  %v3610_v3 = vunpack.i.h.bf16 %v5292_v36  ;;  %v3609_v49 = vunpack.i.l.bf16 %v5292_v36 }
 0x497   : > { %1638 = vmatpush.msra.mxu0 %v3570_v24  ;;  %v1572_v45 = vsel %vm591_vm2, %v3569_v59, %v3570_v24  ;;  %v1541_v24 = vsel %vm522_vm1, %v3594_v1, %v3595_v56  ;;  %v1516_v59 = vsel %vm453_vm0, %v3609_v49, %v3610_v3 }
 0x498   : > { %1609 = vmatpush.msrb.mxu3 %v1572_v45  ;;  %v3604_v45 = vunpack.i.l.bf16 %v5297_v23  ;;  %v3625_v23 = vunpack.i.h.bf16 %v5314_v52 }
 0x499   : > { %1639 = vmatpush.msra.mxu0 %v3565_v16 }
 0x49a   : > { %2627 = vrot.lane.b32.xlu0 %v2609_v50, %s4052_s13  ;;  %2687 = vrot.lane.b32.xlu1 %v2665_v5, %s4053_s14 }
 0x49b   : > { %2683 = vrot.lane.b32.xlu2 %v2663_v61, %s4053_s14  ;;  %1610 = vmatpush.msrb.mxu3 %v1571_v48  ;;  %v1514_v61 = vsel %vm453_vm0, %v3604_v45, %v3605_v47 }
 0x49c   : > { %1640 = vmatpush.msra.mxu0 %v3560_v40  ;;  %v3573_v15 = vpop.permute.xlu1 %3572  ;;  %v3613_v43 = vpop.permute.xlu0 %3612 }
 0x49d   : > { %v3575_v55 = vunpack.i.h.bf16 %v3573_v15  ;;  %v3574_v37 = vunpack.i.l.bf16 %v3573_v15  ;;  %1611 = vmatpush.msrb.mxu3 %v1570_v39  ;;  %v5330_v10 = vpop.permute.xlu2 %3637  ;;  %v3615_v2 = vunpack.i.h.bf16 %v3613_v43  ;;  %v3614_v50 = vunpack.i.l.bf16 %v3613_v43 }
 0x49f   : > { %1641 = vmatpush.msra.mxu0 %v3575_v55  ;;  %v1569_v20 = vsel %vm591_vm2, %v3574_v37, %v3575_v55  ;;  %v1513_v48 = vsel %vm453_vm0, %v3614_v50, %v3615_v2 }
 0x4a0   : > { %1612 = vmatpush.msrb.mxu3 %v1569_v20 }
 0x4a1   : > { %1642 = vmatpush.msra.mxu0 %v3590_v25  ;;  %v3624_v25 = vunpack.i.l.bf16 %v5314_v52 }
 0x4a2   : > { %2571 = vrot.lane.b32.xlu1 %v2555_v57, %s4051_s12  ;;  %1613 = vmatpush.msrb.mxu3 %v1544_v54  ;;  %v3639_v57 = vunpack.i.l.bf16 %v5330_v10 }
 0x4a3   : > { %1643 = vmatpush.msra.mxu0 %v3580_v6  ;;  %v2093_v20 = vsel %vm591_vm2, %v3624_v25, %v3625_v23 }
 0x4a4   : > { %v3583_v63 = vpop.permute.xlu1 %3582  ;;  %v5319_v60 = vpop.permute.xlu0 %3627  ;;  %1614 = vmatpush.msrb.mxu3 %v1543_v22 }
 0x4a5   : > { %v3585_v58 = vunpack.i.h.bf16 %v3583_v63  ;;  %v3584_v46 = vunpack.i.l.bf16 %v3583_v63  ;;  %v3653_v43 = vpop.permute.xlu2 %3652  ;;  %v3630_v6 = vunpack.i.h.bf16 %v5319_v60  ;;  %v3629_v4 = vunpack.i.l.bf16 %v5319_v60  ;;  %v5375_v60 = vld [vmem:[%s6079_s5 + $0x8] sm:$0xff] }
 0x4a7   : > { %1644 = vmatpush.msra.mxu0 %v3585_v58  ;;  %v1542_v18 = vsel %vm522_vm1, %v3584_v46, %v3585_v58  ;;  %v3655_v46 = vunpack.i.h.bf16 %v3653_v43 }
 0x4a8   : > { %1615 = vmatpush.msrb.mxu3 %v1542_v18 }
 0x4a9   : > { %1645 = vmatpush.msra.mxu0 %v3595_v56 }
 0x4aa   : > { %2629 = vrot.lane.b32.xlu1 %v2610_v7, %s4052_s13  ;;  %1616 = vmatpush.msrb.mxu3 %v1541_v24 }
 0x4ab   : > { %1646 = vmatpush.msra.mxu0 %v3610_v3  ;;  %v3654_v3 = vunpack.i.l.bf16 %v3653_v43 }
 0x4ac   : > { %v3598_v16 = vpop.permute.xlu1 %3597  ;;  %v5333_v36 = vpop.permute.xlu0 %3642  ;;  %1617 = vmatpush.msrb.mxu3 %v1516_v59 }
 0x4ad   : > { %v3600_v40 = vunpack.i.h.bf16 %v3598_v16  ;;  %v3599_v53 = vunpack.i.l.bf16 %v3598_v16  ;;  %v3645_v22 = vunpack.i.h.bf16 %v5333_v36  ;;  %v2063_v16 = vsel %vm522_vm1, %v3654_v3, %v3655_v46 }
 0x4ae   : > { %v2541_v3 = vmul.f32 %v5232_v32, %v4165_v14 }
 0x4af   : > { %1647 = vmatpush.msra.mxu0 %v3600_v40  ;;  %v1515_v5 = vsel %vm453_vm0, %v3599_v53, %v3600_v40 }
 0x4b0   : > { %1618 = vmatpush.msrb.mxu3 %v1515_v5 }
 0x4b1   : > { %1648 = vmatpush.msra.mxu0 %v3605_v47 }
 0x4b2   : > { %1619 = vmatpush.msrb.mxu3 %v1514_v61 }
 0x4b3   : > { %1649 = vmatpush.msra.mxu0 %v3615_v2 }
 0x4b4   : > { %v3618_v15 = vpop.permute.xlu1 %3617  ;;  %v5340_v39 = vpop.permute.xlu0 %3657  ;;  %1620 = vmatpush.msrb.mxu3 %v1513_v48 }
 0x4b5   : > { %v3620_v28 = vunpack.i.h.bf16 %v3618_v15  ;;  %v3619_v55 = vunpack.i.l.bf16 %v3618_v15  ;;  %1650 = vmatpush.msra.mxu0 %v5068_v19  ;;  %v5356_v19 = vld [vmem:[%s6079_s5] sm:$0xff]  ;;  %v3660_v24 = vunpack.i.h.bf16 %v5340_v39 }
 0x4b6   : > { %1621 = vmatpush.msrb.mxu3 %v5063_v33 }
 0x4b7   : > { %1651 = vmatpush.msra.mxu0 %v5046_v35  ;;  %v2094_v37 = vsel %vm591_vm2, %v3619_v55, %v3620_v28 }
 0x4b8   : > { %1622 = vmatpush.msrb.mxu3 %v5043_v34  ;;  %2131 = vmatpush.msra.mxu2 %v2094_v37  ;;  %v3640_v34 = vunpack.i.h.bf16 %v5330_v10  ;;  %v3659_v10 = vunpack.i.l.bf16 %v5340_v39  ;;  %v5424_v37 = vld [vmem:[%s6077_s3] sm:$0xff] }
 0x4b9   : > { %1652 = vmatpush.msra.mxu0 %v5031_v41  ;;  %v2092_v41 = vsel %vm591_vm2, %v3629_v4, %v3630_v6 }
 0x4ba   : > { %1623 = vmatpush.msrb.mxu3 %v5029_v38  ;;  %2132 = vmatpush.msra.mxu2 %v2093_v20  ;;  %v3668_v38 = vpop.permute.xlu2 %3667  ;;  %v2066_v63 = vsel %vm522_vm1, %v3639_v57, %v3640_v34  ;;  %v2038_v40 = vsel %vm453_vm0, %v3659_v10, %v3660_v24 }
 0x4bb   : > { %1653 = vmatpush.msra.mxu0 %v5088_v21  ;;  %v3670_v53 = vunpack.i.h.bf16 %v3668_v38  ;;  %v3669_v2 = vunpack.i.l.bf16 %v3668_v38 }
 0x4bc   : > { %v5360_v35 = vpop.permute.xlu0 %3672  ;;  %v3633_v33 = vpop.permute.xlu1 %3632  ;;  %1624 = vmatpush.msrb.mxu3 %v5084_v8  ;;  %1654 = vmatmul.f32.vlgmr.msra.gmra.mxu0 %v5356_v19  ;;  %v3644_v8 = vunpack.i.l.bf16 %v5333_v36  ;;  %v5391_v36 = vld [vmem:[%s6079_s5 + $0x10] sm:$0xff] }
 0x4bd   : > { %v3635_v52 = vunpack.i.h.bf16 %v3633_v33  ;;  %v3634_v54 = vunpack.i.l.bf16 %v3633_v33  ;;  %2133 = vmatpush.msra.mxu2 %v2092_v41  ;;  %1625 = vmatmul.f32.vlgmr.msrb.gmra.mxu3 %v5356_v19  ;;  %v3675_v48 = vunpack.i.h.bf16 %v5360_v35  ;;  %v3674_v15 = vunpack.i.l.bf16 %v5360_v35  ;;  %v5464_v41 = vld [vmem:[%s6077_s3 + $0x18] sm:$0xff] }
 0x4be   : > { %2160 = vmatpush.msra.mxu3 %v3620_v28  ;;  %v2065_v58 = vsel %vm522_vm1, %v3644_v8, %v3645_v22  ;;  %v2036_v39 = vsel %vm453_vm0, %v3669_v2, %v3670_v53  ;;  %v2544_v35 = vmul.f32 %v5221_v44, %v4281_v62  ;;  %v2543_v33 = vmul.f32 %v5232_v32, %v4281_v62 }
 0x4bf   : > { %v2091_v21 = vsel %vm591_vm2, %v3634_v54, %v3635_v52  ;;  %v2035_v55 = vsel %vm453_vm0, %v3674_v15, %v3675_v48  ;;  %6179 = vst [vmem:[#allocation16_spill] sm:$0xff] %v5464_v41 }
 0x4c0   : > { %2161 = vmatpush.msra.mxu3 %v3625_v23  ;;  %2134 = vmatpush.msra.mxu2 %v2091_v21  ;;  %v5405_v23 = vld [vmem:[%s6079_s5 + $0x18] sm:$0xff] }
 0x4c2   : > { %2162 = vmatpush.msra.mxu3 %v3630_v6  ;;  %2135 = vmatpush.msra.mxu2 %v2066_v63  ;;  %v5385_v59 = vpop.permute.xlu2 %1601 }
 0x4c4   : > { %2163 = vmatpush.msra.mxu3 %v3635_v52  ;;  %v5377_v56 = vpop.permute.xlu0 %1596  ;;  %v3648_v1 = vpop.permute.xlu1 %3647  ;;  %1657 = vmatmul.f32.gmra.mxu0 %v5375_v60 }
 0x4c5   : > { %v3650_v49 = vunpack.i.h.bf16 %v3648_v1  ;;  %v3649_v18 = vunpack.i.l.bf16 %v3648_v1  ;;  %2136 = vmatpush.msra.mxu2 %v2065_v58  ;;  %1628 = vmatmul.f32.gmra.mxu3 %v5375_v60 }
 0x4c6   : > { %2164 = vmatpush.msra.mxu3 %v3640_v34 }
 0x4c7   : > { %v2064_v7 = vsel %vm522_vm1, %v3649_v18, %v3650_v49 }
 0x4c8   : > { %2165 = vmatpush.msra.mxu3 %v3645_v22  ;;  %2137 = vmatpush.msra.mxu2 %v2064_v7 }
 0x4ca   : > { %2166 = vmatpush.msra.mxu3 %v3650_v49  ;;  %2138 = vmatpush.msra.mxu2 %v2063_v16  ;;  %v5407_v25 = vpop.permute.xlu2 %2128 }
 0x4cc   : > { %2167 = vmatpush.msra.mxu3 %v3655_v46  ;;  %v5393_v47 = vpop.permute.xlu0 %2123  ;;  %v3663_v45 = vpop.permute.xlu1 %3662  ;;  %1660 = vmatmul.f32.gmra.mxu0 %v5391_v36  ;;  %v2542_v46 = vmul.f32 %v5221_v44, %v4165_v14 }
 0x4cd   : > { %v3665_v50 = vunpack.i.h.bf16 %v3663_v45  ;;  %v3664_v5 = vunpack.i.l.bf16 %v3663_v45  ;;  %2139 = vmatpush.msra.mxu2 %v2038_v40  ;;  %1631 = vmatmul.f32.gmra.mxu3 %v5391_v36 }
 0x4ce   : > { %2168 = vmatpush.msra.mxu3 %v3660_v24 }
 0x4cf   : > { %v2037_v61 = vsel %vm453_vm0, %v3664_v5, %v3665_v50 }
 0x4d0   : > { %2169 = vmatpush.msra.mxu3 %v3665_v50  ;;  %2140 = vmatpush.msra.mxu2 %v2037_v61 }
 0x4d2   : > { %2170 = vmatpush.msra.mxu3 %v3670_v53  ;;  %2141 = vmatpush.msra.mxu2 %v2036_v39  ;;  %v5430_v4 = vpop.permute.xlu2 %2113 }
 0x4d4   : > { %2171 = vmatpush.msra.mxu3 %v3675_v48  ;;  %v5409_v43 = vpop.permute.xlu0 %2530  ;;  %v5411_v28 = vpop.permute.xlu1 %1606  ;;  %1663 = vmatmul.f32.gmra.mxu0 %v5405_v23 }
 0x4d5   : > { %2142 = vmatpush.msra.mxu2 %v2035_v55  ;;  %1634 = vmatmul.f32.gmra.mxu3 %v5405_v23 }
 0x4d6   : > { %2172 = vmatpush.msra.mxu3 %v5181_v27 }
 0x4d7   : > { %2143 = vmatpush.msra.mxu2 %v5173_v0  ;;  %v5449_v0 = vld [vmem:[%s6077_s3 + $0x10] sm:$0xff] }
 0x4d8   : > { %2173 = vmatpush.msra.mxu3 %v5150_v31  ;;  %6178 = vst [vmem:[#allocation13_spill] sm:$0xff] %v5449_v0 }
 0x4d9   : > { %2144 = vmatpush.msra.mxu2 %v5147_v30 }
 0x4da   : > { %2174 = vmatpush.msra.mxu3 %v5124_v51  ;;  %v5438_v51 = vld [vmem:[%s6077_s3 + $0x8] sm:$0xff]  ;;  %v5444_v31 = vpop.permute.xlu2 %2583 }
 0x4db   : > { %2145 = vmatpush.msra.mxu2 %v5118_v11 }
 0x4dc   : > { %2175 = vmatpush.msra.mxu3 %v5194_v17  ;;  %v5428_v6 = vpop.permute.xlu0 %2585  ;;  %v1592_v27 = vpop.permute.xlu1 %1591 }
 0x4dd   : > { %2146 = vmatpush.msra.mxu2 %v5192_v13  ;;  %2176 = vmatmul.f32.vlgmr.msra.gmra.mxu3 %v5424_v37 }
 0x4de   : > { %2147 = vmatmul.f32.vlgmr.msra.gmra.mxu2 %v5424_v37 }
 0x4e2   : > { %v5455_v20 = vpop.permute.xlu2 %2635 }
 0x4e4   : > { %v2580_v30 = vpop.permute.xlu0 %2579  ;;  %v5440_v11 = vpop.permute.xlu1 %2118 }
 0x4e5   : > { %2179 = vmatmul.f32.gmra.mxu3 %v5438_v51  ;;  %v5486_v45 = vpop.f32.mrf.mxu0 }
 0x4e6   : > { %2150 = vmatmul.f32.gmra.mxu2 %v5438_v51  ;;  %6180 = vst [vmem:[#allocation21_spill] sm:$0xff] %v5486_v45 }
 0x4ea   : > { %v2632_v8 = vpop.permute.xlu2 %2631 }
 0x4ec   : > { %v5451_v13 = vpop.permute.xlu0 %2637  ;;  %v2526_v17 = vpop.permute.xlu1 %2525 }
 0x4ed   : > { %2182 = vmatmul.f32.gmra.mxu3 %v5449_v0  ;;  %v2552_v34 = vadd.f32 %v2544_v35, %v2526_v17  ;;  %v2551_v57 = vadd.f32 %v2543_v33, %v2526_v17  ;;  %v5488_v40 = vpop.f32.mrf.mxu0 }
 0x4ee   : > { %2153 = vmatmul.f32.gmra.mxu2 %v5449_v0  ;;  %6181 = vst [vmem:[#allocation17_spill] sm:$0xff] %v5488_v40 }
 0x4f4   : > { %v2576_v52 = vpop.permute.xlu0 %2575  ;;  %v2582_v54 = vpop.permute.xlu1 %2581 }
 0x4f5   : > { %v2589_v38 = vsel %vm453_vm0, %v2580_v30, %v2582_v54  ;;  %v5467_v21 = vadd.f32 %v2582_v54, %v2552_v34  ;;  %2185 = vmatmul.f32.gmra.mxu3 %v5464_v41  ;;  %v5490_v53 = vpop.f32.mrf.mxu0 }
 0x4f6   : > { %v2603_v22 = vadd.f32 %v2589_v38, %v2551_v57  ;;  %2156 = vmatmul.f32.gmra.mxu2 %v5464_v41  ;;  %6182 = vst [vmem:[#allocation20_spill] sm:$0xff] %v5490_v53 }
 0x4fc   : > { %v5471_v62 = vpop.permute.xlu0 %2633  ;;  %v2521_v63 = vpop.permute.xlu1 %2520 }
 0x4fd   : > { %v2641_v1 = vsel %vm522_vm1, %v2632_v8, %v5471_v62  ;;  %v2550_v49 = vadd.f32 %v2542_v46, %v2521_v63  ;;  %v2549_v18 = vadd.f32 %v2541_v3, %v2521_v63  ;;  %v5492_v2 = vpop.f32.mrf.mxu0  ;;  %v6184_v63 = vld [vmem:[#allocation10_spill] sm:$0xff]  ;;  %v2664_v46 = vmul.f32 %v5221_v44, %v6177_v9 }
 0x4fe   : > { %v5475_v58 = vadd.f32 %v2641_v1, %v2603_v22  ;;  %6183 = vst [vmem:[#allocation18_spill] sm:$0xff] %v5492_v2  ;;  %v2608_v1 = vmul.f32 %v5221_v44, %v6184_v63  ;;  %v2656_v45 = vadd.f32 %v5471_v62, %v5467_v21 }
 0x504   : > { %v2578_v7 = vpop.permute.xlu1 %2577 }
 0x505   : > { %v2588_v24 = vsel %vm453_vm0, %v2576_v52, %v2578_v7  ;;  %v5482_v10 = vadd.f32 %v2578_v7, %v2550_v49  ;;  %v2607_v49 = vmul.f32 %v5232_v32, %v6184_v63  ;;  %v2590_v63 = vsel %vm453_vm0, %v5444_v31, %v5428_v6 }
 0x506   : > { %v5484_v16 = vadd.f32 %v2588_v24, %v2549_v18  ;;  %v6185_v18 = vld [vmem:[#allocation11_spill] sm:$0xff] }
 0x507   : > { %v2661_v7 = vmul.f32 %v5232_v32, %v6185_v18 }
 0x539   : > { %v1655_v50 = vpop.f32.mrf.mxu0 }
 0x53a   : > { %v1656_v14 = vadd.f32 %v1655_v50, %v1592_v27  ;;  %v6186_v50 = vld [vmem:[#allocation12_spill] sm:$0xff] }
 0x540   : > { %v1626_v5 = vpop.f32.mrf.mxu3 }
 0x541   : > { %v5494_v61 = vadd.f32 %v1626_v5, %v1592_v27  ;;  %v1658_v48 = vpop.f32.mrf.mxu0  ;;  %v2659_v5 = vmul.f32 %v5232_v32, %v6186_v50 }
 0x542   : > { %v1659_v55 = vadd.f32 %v1658_v48, %v5377_v56  ;;  %v2660_v48 = vmul.f32 %v5221_v44, %v6186_v50  ;;  %v5618_v50 = vpop.permute.xlu0 %2515 }
 0x543   : > { %v3686_v15 = vpack.i.bf16 %v1656_v14, %v5494_v61  ;;  %v2662_v14 = vmul.f32 %v5221_v44, %v6185_v18 }
 0x545   : > { %3687 = vrot.lane.b32.xlu2 %v3686_v15, %s4051_s12  ;;  %3682 = vrot.lane.b32.xlu1 %v3686_v15, %s4052_s13 }
 0x546   : > { %3677 = vrot.lane.b32.xlu0 %v3686_v15, %s4053_s14 }
 0x548   : > { %v1629_v39 = vpop.f32.mrf.mxu3 }
 0x549   : > { %v5502_v30 = vadd.f32 %v1629_v39, %v5377_v56  ;;  %v1661_v35 = vpop.f32.mrf.mxu0 }
 0x54a   : > { %v1662_v33 = vadd.f32 %v1661_v35, %v5385_v59 }
 0x54b   : > { %v3691_v17 = vpack.i.bf16 %v1659_v55, %v5502_v30 }
 0x54d   : > { %3692 = vrot.lane.b32.xlu2 %v3691_v17, %s4053_s14 }
 0x54e   : > { %3697 = vrot.lane.b32.xlu0 %v3691_v17, %s4052_s13 }
 0x550   : > { %v1632_v27 = vpop.f32.mrf.mxu3 }
 0x551   : > { %v5509_v34 = vadd.f32 %v1632_v27, %v5385_v59  ;;  %v1664_v56 = vpop.f32.mrf.mxu0 }
 0x552   : > { %v1665_v54 = vadd.f32 %v1664_v56, %v5411_v28 }
 0x553   : > { %v3706_v57 = vpack.i.bf16 %v1662_v33, %v5509_v34 }
 0x555   : > { %3702 = vrot.lane.b32.xlu2 %v3691_v17, %s4051_s12  ;;  %3707 = vrot.lane.b32.xlu1 %v3706_v57, %s4053_s14 }
 0x558   : > { %v1635_v52 = vpop.f32.mrf.mxu3 }
 0x559   : > { %v5516_v38 = vadd.f32 %v1635_v52, %v5411_v28 }
 0x55b   : > { %v3721_v22 = vpack.i.bf16 %v1665_v54, %v5516_v38 }
 0x55d   : > { %3712 = vrot.lane.b32.xlu2 %v3706_v57, %s4052_s13  ;;  %3717 = vrot.lane.b32.xlu1 %v3706_v57, %s4051_s12 }
 0x55e   : > { %3722 = vrot.lane.b32.xlu0 %v3721_v22, %s4053_s14 }
 0x560   : > { %v2177_v59 = vpop.f32.mrf.mxu3 }
 0x561   : > { %v2148_v8 = vpop.f32.mrf.mxu2 }
 0x565   : > { %2625 = vrot.lane.b32.xlu2 %v2608_v1, %s4052_s13  ;;  %3727 = vrot.lane.b32.xlu1 %v3721_v22, %s4052_s13 }
 0x566   : > { %2685 = vrot.lane.b32.xlu0 %v2664_v46, %s4053_s14 }
 0x568   : > { %v2180_v28 = vpop.f32.mrf.mxu3 }
 0x569   : > { %v2151_v3 = vpop.f32.mrf.mxu2  ;;  %v5555_v17 = vadd.f32 %v2180_v28, %v5440_v11  ;;  %v2688_v28 = vpop.permute.xlu1 %2687 }
 0x56a   : > { %v5552_v55 = vadd.f32 %v2151_v3, %v5440_v11  ;;  %v5573_v11 = vadd.f32 %v2148_v8, %v5430_v4  ;;  %v2642_v3 = vsel %vm522_vm1, %v5455_v20, %v5451_v13 }
 0x56c   : > { %v3736_v52 = vpack.i.bf16 %v5555_v17, %v5552_v55 }
 0x56d   : > { %3732 = vrot.lane.b32.xlu2 %v3721_v22, %s4051_s12  ;;  %2623 = vrot.lane.b32.xlu1 %v2607_v49, %s4052_s13  ;;  %v2690_v22 = vpop.permute.xlu2 %2689 }
 0x56e   : > { %2679 = vrot.lane.b32.xlu0 %v2661_v7, %s4053_s14 }
 0x570   : > { %v2183_v9 = vpop.f32.mrf.mxu3 }
 0x571   : > { %v2154_v24 = vpop.f32.mrf.mxu2  ;;  %v5549_v39 = vadd.f32 %v2183_v9, %v5393_v47 }
 0x572   : > { %v5546_v15 = vadd.f32 %v2154_v24, %v5393_v47 }
 0x574   : > { %v3741_v56 = vpack.i.bf16 %v5549_v39, %v5546_v15 }
 0x575   : > { %2675 = vrot.lane.b32.xlu2 %v2659_v5, %s4053_s14  ;;  %2681 = vrot.lane.b32.xlu1 %v2662_v14, %s4053_s14  ;;  %v5590_v8 = vpop.permute.xlu2 %2573  ;;  %v5620_v5 = vpop.permute.xlu1 %2571 }
 0x576   : > { %2677 = vrot.lane.b32.xlu0 %v2660_v48, %s4053_s14  ;;  %v5622_v14 = vpop.permute.xlu0 %2627 }
 0x578   : > { %v2186_v35 = vpop.f32.mrf.mxu3 }
 0x579   : > { %v2157_v27 = vpop.f32.mrf.mxu2  ;;  %v5558_v33 = vadd.f32 %v2186_v35, %v5407_v25 }
 0x57a   : > { %v5561_v57 = vadd.f32 %v2157_v27, %v5407_v25  ;;  %v5576_v25 = vadd.f32 %v2177_v59, %v5430_v4  ;;  %v2545_v4 = vmul.f32 %v5232_v32, %v4198_v29  ;;  %v2546_v59 = vmul.f32 %v5221_v44, %v4198_v29 }
 0x57b   : > { %v2694_v29 = vsel %vm591_vm2, %v2688_v28, %v2690_v22 }
 0x57c   : > { %v3746_v47 = vpack.i.bf16 %v5558_v33, %v5561_v57  ;;  %v3751_v54 = vpack.i.bf16 %v5576_v25, %v5573_v11  ;;  %v2553_v1 = vadd.f32 %v2545_v4, %v5409_v43  ;;  %v2554_v46 = vadd.f32 %v2546_v59, %v5409_v43 }
 0x57d   : > { %3742 = vrot.lane.b32.xlu2 %v3741_v56, %s4053_s14  ;;  %v2684_v24 = vpop.permute.xlu2 %2683  ;;  %v5626_v35 = vpop.permute.xlu1 %2629 }
 0x57e   : > { %3747 = vrot.lane.b32.xlu1 %v3746_v47, %s4053_s14  ;;  %3737 = vrot.lane.b32.xlu0 %v3736_v52, %s4053_s14  ;;  %v2605_v49 = vadd.f32 %v2590_v63, %v2553_v1  ;;  %v2606_v18 = vadd.f32 %v5428_v6, %v2554_v46 }
 0x580   : > { %v2657_v7 = vadd.f32 %v2642_v3, %v2605_v49  ;;  %v2658_v9 = vadd.f32 %v5451_v13, %v2606_v18 }
 0x582   : > { %v5606_v43 = vadd.f32 %v2694_v29, %v2657_v7  ;;  %v5608_v31 = vadd.f32 %v2690_v22, %v2658_v9 }
 0x584   : > { %v5612_v20 = vpack.i.bf16 %v5608_v31, %v5606_v43 }
 0x585   : > { %3767 = vrot.lane.b32.xlu2 %v3746_v47, %s4052_s13 }
 0x586   : > { %3752 = vrot.lane.b32.xlu1 %v3751_v54, %s4053_s14  ;;  %3757 = vrot.lane.b32.xlu0 %v3741_v56, %s4052_s13 }
 0x58d   : > { %3772 = vrot.lane.b32.xlu2 %v3751_v54, %s4052_s13 }
 0x58e   : > { %3762 = vrot.lane.b32.xlu1 %v3736_v52, %s4052_s13  ;;  %3787 = vrot.lane.b32.xlu0 %v3746_v47, %s4051_s12 }
 0x595   : > { %3782 = vrot.lane.b32.xlu2 %v3736_v52, %s4051_s12 }
 0x596   : > { %3777 = vrot.lane.b32.xlu1 %v3741_v56, %s4051_s12  ;;  %3792 = vrot.lane.b32.xlu0 %v3751_v54, %s4051_s12 }
 0x59e   : > { %3797 = vrot.lane.b32.xlu1 %v5612_v20, %s4053_s14 }
 0x59f   : > { %v5616_v6 = vpop.permute.xlu2 %3687 }
 0x5a7   : > { %v3693_v13 = vpop.permute.xlu2 %3692 }
 0x5a8   : > { %v3695_v3 = vunpack.i.h.bf16 %v3693_v13  ;;  %v3694_v49 = vunpack.i.l.bf16 %v3693_v13 }
 0x5aa   : > { %v1740_v40 = vsel %vm591_vm2, %v3694_v49, %v3695_v3 }
 0x5af   : > { %v5624_v48 = vpop.permute.xlu2 %3702 }
 0x5b7   : > { %v3683_v56 = vpop.permute.xlu1 %3682  ;;  %v3713_v47 = vpop.permute.xlu2 %3712 }
 0x5b8   : > { %v3678_v27 = vpop.permute.xlu0 %3677  ;;  %v3714_v13 = vunpack.i.l.bf16 %v3713_v47 }
 0x5b9   : > { %v3680_v7 = vunpack.i.h.bf16 %v3678_v27  ;;  %v3679_v9 = vunpack.i.l.bf16 %v3678_v27 }
 0x5bb   : > { %v1739_v27 = vsel %vm591_vm2, %v3679_v9, %v3680_v7  ;;  %v2539_v7 = vmul.f32 %v5232_v32, %v4154_v12  ;;  %v3705_v9 = vunpack.i.h.bf16 %v5624_v48  ;;  %v3689_v32 = vunpack.i.l.bf16 %v5616_v6 }
 0x5bf   : > { %v5628_v22 = vpop.permute.xlu2 %2625 }
 0x5c0   : > { %v3698_v54 = vpop.permute.xlu0 %3697 }
 0x5c1   : > { %v3700_v62 = vunpack.i.h.bf16 %v3698_v54 }
 0x5c7   : > { %v3708_v52 = vpop.permute.xlu1 %3707  ;;  %v3733_v29 = vpop.permute.xlu2 %3732 }
 0x5c8   : > { %v3710_v63 = vunpack.i.h.bf16 %v3708_v52  ;;  %v3709_v1 = vunpack.i.l.bf16 %v3708_v52  ;;  %v3715_v52 = vunpack.i.h.bf16 %v3713_v47  ;;  %v3684_v47 = vunpack.i.l.bf16 %v3683_v56 }
 0x5ca   : > { %v1741_v2 = vsel %vm591_vm2, %v3709_v1, %v3710_v63  ;;  %v3699_v63 = vunpack.i.l.bf16 %v3698_v54 }
 0x5cc   : > { %v1716_v1 = vsel %vm522_vm1, %v3699_v63, %v3700_v62 }
 0x5cf   : > { %v5630_v4 = vpop.permute.xlu1 %3717 }
 0x5d0   : > { %v3723_v59 = vpop.permute.xlu0 %3722 }
 0x5d1   : > { %v3725_v46 = vunpack.i.h.bf16 %v3723_v59  ;;  %v3724_v28 = vunpack.i.l.bf16 %v3723_v59 }
 0x5d3   : > { %v1742_v18 = vsel %vm591_vm2, %v3724_v28, %v3725_v46 }
 0x5d4   : > { %1775 = vmatpush.msra.mxu1 %v1742_v18  ;;  %v3719_v18 = vunpack.i.l.bf16 %v5630_v4 }
 0x5d6   : > { %1776 = vmatpush.msra.mxu1 %v1741_v2 }
 0x5d7   : > { %v3728_v53 = vpop.permute.xlu1 %3727 }
 0x5d8   : > { %v3730_v41 = vunpack.i.h.bf16 %v3728_v53  ;;  %v3729_v59 = vunpack.i.l.bf16 %v3728_v53  ;;  %v2686_v0 = vpop.permute.xlu0 %2685  ;;  %1777 = vmatpush.msra.mxu1 %v1740_v40  ;;  %v3685_v40 = vunpack.i.h.bf16 %v3683_v56  ;;  %v3720_v56 = vunpack.i.h.bf16 %v5630_v4 }
 0x5d9   : > { %v2693_v46 = vsel %vm591_vm2, %v2684_v24, %v2686_v0  ;;  %v5638_v28 = vadd.f32 %v2686_v0, %v2656_v45  ;;  %v1717_v0 = vsel %vm522_vm1, %v3714_v13, %v3715_v52  ;;  %v2540_v45 = vmul.f32 %v5221_v44, %v4154_v12  ;;  %v2676_v24 = vpop.permute.xlu2 %2675 }
 0x5da   : > { %v5642_v2 = vadd.f32 %v2693_v46, %v5475_v58  ;;  %1778 = vmatpush.msra.mxu1 %v1739_v27  ;;  %v1718_v21 = vsel %vm522_vm1, %v3729_v59, %v3730_v41  ;;  %v3735_v41 = vunpack.i.h.bf16 %v3733_v29  ;;  %v3734_v58 = vunpack.i.l.bf16 %v3733_v29 }
 0x5db   : > { %v2548_v3 = vadd.f32 %v2540_v45, %v5618_v50  ;;  %v1715_v44 = vsel %vm522_vm1, %v3684_v47, %v3685_v40  ;;  %v2587_v29 = vsel %vm453_vm0, %v5620_v5, %v5590_v8  ;;  %v3704_v52 = vunpack.i.l.bf16 %v5624_v48 }
 0x5dc   : > { %1779 = vmatpush.msra.mxu1 %v1718_v21  ;;  %v5647_v53 = vpack.i.bf16 %v5638_v28, %v5642_v2  ;;  %v1694_v59 = vsel %vm453_vm0, %v3734_v58, %v3735_v41  ;;  %v2547_v13 = vadd.f32 %v2539_v7, %v5618_v50  ;;  %v2640_v4 = vsel %vm522_vm1, %v5622_v14, %v5626_v35 }
 0x5dd   : > { %v2600_v46 = vadd.f32 %v5590_v8, %v2548_v3  ;;  %v3690_v12 = vunpack.i.h.bf16 %v5616_v6  ;;  %v1693_v48 = vsel %vm453_vm0, %v3719_v18, %v3720_v56  ;;  %v2654_v50 = vadd.f32 %v5626_v35, %v5482_v10 }
 0x5de   : > { %3802 = vrot.lane.b32.xlu2 %v5647_v53, %s4053_s14  ;;  %1780 = vmatpush.msra.mxu1 %v1717_v0  ;;  %v2599_v27 = vadd.f32 %v2587_v29, %v2547_v13  ;;  %v2653_v8 = vadd.f32 %v2640_v4, %v5484_v16  ;;  %v1692_v6 = vsel %vm453_vm0, %v3704_v52, %v3705_v9 }
 0x5df   : > { %v2624_v54 = vpop.permute.xlu1 %2623  ;;  %v2652_v14 = vadd.f32 %v5628_v22, %v2600_v46  ;;  %v1691_v16 = vsel %vm453_vm0, %v3689_v32, %v3690_v12  ;;  %v5722_v32 = vld [vmem:[%s6080_s6 + $0x10] sm:$0xff] }
 0x5e0   : > { %v2680_v49 = vpop.permute.xlu0 %2679  ;;  %1781 = vmatpush.msra.mxu1 %v1716_v1  ;;  %v2639_v5 = vsel %vm522_vm1, %v2624_v54, %v5628_v22 }
 0x5e1   : > { %v3743_v62 = vpop.permute.xlu2 %3742  ;;  %v2651_v63 = vadd.f32 %v2639_v5, %v2599_v27 }
 0x5e2   : > { %1782 = vmatpush.msra.mxu1 %v1715_v44  ;;  %v3745_v1 = vunpack.i.h.bf16 %v3743_v62  ;;  %v3744_v3 = vunpack.i.l.bf16 %v3743_v62 }
 0x5e4   : > { %1783 = vmatpush.msra.mxu1 %v1694_v59  ;;  %v2271_v29 = vsel %vm591_vm2, %v3744_v3, %v3745_v1 }
 0x5e6   : > { %3817 = vrot.lane.b32.xlu2 %v5612_v20, %s4052_s13  ;;  %1784 = vmatpush.msra.mxu1 %v1693_v48 }
 0x5e7   : > { %v2682_v21 = vpop.permute.xlu1 %2681 }
 0x5e8   : > { %v2692_v40 = vsel %vm591_vm2, %v2680_v49, %v2682_v21  ;;  %v5685_v47 = vadd.f32 %v2682_v21, %v2654_v50  ;;  %v2678_v0 = vpop.permute.xlu0 %2677  ;;  %1785 = vmatpush.msra.mxu1 %v1692_v6 }
 0x5e9   : > { %v5687_v10 = vadd.f32 %v2692_v40, %v2653_v8  ;;  %v2691_v35 = vsel %vm591_vm2, %v2676_v24, %v2678_v0  ;;  %v5690_v45 = vadd.f32 %v2678_v0, %v2652_v14  ;;  %v3768_v56 = vpop.permute.xlu2 %3767 }
 0x5ea   : > { %v5693_v22 = vadd.f32 %v2691_v35, %v2651_v63  ;;  %1786 = vmatpush.msra.mxu1 %v1691_v16  ;;  %v3770_v9 = vunpack.i.h.bf16 %v3768_v56  ;;  %v3769_v52 = vunpack.i.l.bf16 %v3768_v56  ;;  %v5739_v63 = vld [vmem:[%s6080_s6 + $0x18] sm:$0xff]  ;;  %v4037_v35 = vld [vmem:[%s6081_s7 + $0x10] sm:$0xff] }
 0x5eb   : > { %v3806_v41 = vpack.i.bf16 %v5685_v47, %v5687_v10 }
 0x5ec   : > { %1787 = vmatpush.msra.mxu1 %v5516_v38  ;;  %v5700_v58 = vpack.i.bf16 %v5690_v45, %v5693_v22  ;;  %v2244_v5 = vsel %vm522_vm1, %v3769_v52, %v3770_v9 }
 0x5ed   : > { %3807 = vrot.lane.b32.xlu0 %v3806_v41, %s4053_s14 }
 0x5ee   : > { %3832 = vrot.lane.b32.xlu2 %v5700_v58, %s4052_s13  ;;  %3812 = vrot.lane.b32.xlu1 %v5700_v58, %s4053_s14 }
 0x5ef   : > { %1788 = vmatpush.msra.mxu1 %v5509_v34 }
 0x5f0   : > { %v3748_v24 = vpop.permute.xlu1 %3747  ;;  %v3738_v54 = vpop.permute.xlu0 %3737 }
 0x5f1   : > { %v3750_v49 = vunpack.i.h.bf16 %v3748_v24  ;;  %v3749_v38 = vunpack.i.l.bf16 %v3748_v24  ;;  %1789 = vmatpush.msra.mxu1 %v5502_v30  ;;  %v3740_v18 = vunpack.i.h.bf16 %v3738_v54  ;;  %v3739_v44 = vunpack.i.l.bf16 %v3738_v54  ;;  %v3773_v12 = vpop.permute.xlu2 %3772 }
 0x5f2   : > { %v3775_v8 = vunpack.i.h.bf16 %v3773_v12  ;;  %v3774_v14 = vunpack.i.l.bf16 %v3773_v12 }
 0x5f3   : > { %1790 = vmatpush.msra.mxu1 %v5494_v61  ;;  %v2272_v7 = vsel %vm591_vm2, %v3749_v38, %v3750_v49  ;;  %v2270_v30 = vsel %vm591_vm2, %v3739_v44, %v3740_v18  ;;  %v2807_v44 = vld [vmem:[%s6078_s4] sm:$0xff] }
 0x5f4   : > { %2309 = vmatpush.msrb.mxu0 %v2272_v7  ;;  %1791 = vmatmul.f32.vlgmr.msra.gmra.mxu1 %v5253_v26  ;;  %v2241_v40 = vsel %vm522_vm1, %v3774_v14, %v3775_v8  ;;  %v5761_v7 = vld [vmem:[%s6080_s6] sm:$0xff] }
 0x5f5   : > { %2338 = vmatpush.msrb.mxu1 %v3750_v49  ;;  %3822 = vrot.lane.b32.xlu0 %v5647_v53, %s4052_s13  ;;  %v5752_v49 = vld [vmem:[%s6080_s6 + $0x8] sm:$0xff] }
 0x5f6   : > { %2310 = vmatpush.msrb.mxu0 %v2271_v29  ;;  %3847 = vrot.lane.b32.xlu2 %v3806_v41, %s4051_s12 }
 0x5f7   : > { %2339 = vmatpush.msrb.mxu1 %v3745_v1  ;;  %3827 = vrot.lane.b32.xlu1 %v3806_v41, %s4052_s13 }
 0x5f8   : > { %v3753_v61 = vpop.permute.xlu1 %3752  ;;  %v3758_v34 = vpop.permute.xlu0 %3757  ;;  %2311 = vmatpush.msrb.mxu0 %v2270_v30  ;;  %v4038_v30 = vld [vmem:[%s6081_s7 + $0x18] sm:$0xff] }
 0x5f9   : > { %2340 = vmatpush.msrb.mxu1 %v3740_v18  ;;  %v3755_v59 = vunpack.i.h.bf16 %v3753_v61  ;;  %v3754_v13 = vunpack.i.l.bf16 %v3753_v61  ;;  %v3760_v4 = vunpack.i.h.bf16 %v3758_v34  ;;  %v3759_v46 = vunpack.i.l.bf16 %v3758_v34  ;;  %v3783_v0 = vpop.permute.xlu2 %3782 }
 0x5fa   : > { %v3785_v54 = vunpack.i.h.bf16 %v3783_v0 }
 0x5fb   : > { %2341 = vmatpush.msrb.mxu1 %v3755_v59  ;;  %v2269_v26 = vsel %vm591_vm2, %v3754_v13, %v3755_v59  ;;  %v2243_v48 = vsel %vm522_vm1, %v3759_v46, %v3760_v4  ;;  %v2809_v59 = vld [vmem:[%s6078_s4 + $0x10] sm:$0xff] }
 0x5fc   : > { %2312 = vmatpush.msrb.mxu0 %v2269_v26  ;;  %1794 = vmatmul.f32.gmra.mxu1 %v5268_v42 }
 0x5fd   : > { %2342 = vmatpush.msrb.mxu1 %v3770_v9  ;;  %3837 = vrot.lane.b32.xlu0 %v5612_v20, %s4051_s12 }
 0x5fe   : > { %2313 = vmatpush.msrb.mxu0 %v2244_v5  ;;  %2301 = vperm.xlu2 %3375, %v5722_v32  }
 0x5ff   : > { %3842 = vrot.lane.b32.xlu1 %v5647_v53, %s4051_s12  ;;  %2343 = vmatpush.msrb.mxu1 %v3760_v4  ;;  %v2810_v53 = vld [vmem:[%s6078_s4 + $0x18] sm:$0xff]  ;;  %v2808_v4 = vld [vmem:[%s6078_s4 + $0x8] sm:$0xff] }
 0x600   : > { %v3763_v27 = vpop.permute.xlu1 %3762  ;;  %v3788_v50 = vpop.permute.xlu0 %3787  ;;  %2314 = vmatpush.msrb.mxu0 %v2243_v48 }
 0x601   : > { %v3765_v21 = vunpack.i.h.bf16 %v3763_v27  ;;  %v3764_v20 = vunpack.i.l.bf16 %v3763_v27  ;;  %v3790_v6 = vunpack.i.h.bf16 %v3788_v50  ;;  %v3789_v62 = vunpack.i.l.bf16 %v3788_v50 }
 0x603   : > { %2344 = vmatpush.msrb.mxu1 %v3765_v21  ;;  %v2242_v42 = vsel %vm522_vm1, %v3764_v20, %v3765_v21  ;;  %v2216_v16 = vsel %vm453_vm0, %v3789_v62, %v3790_v6 }
 0x604   : > { %2315 = vmatpush.msrb.mxu0 %v2242_v42  ;;  %1797 = vmatmul.f32.gmra.mxu1 %v4037_v35 }
 0x605   : > { %2345 = vmatpush.msrb.mxu1 %v3775_v8  ;;  %3852 = vrot.lane.b32.xlu0 %v5700_v58, %s4051_s12  ;;  %v3784_v58 = vunpack.i.l.bf16 %v3783_v0 }
 0x606   : > { %2316 = vmatpush.msrb.mxu0 %v2241_v40  ;;  %2828 = vperm.xlu2 %3375, %v2810_v53  }
 0x607   : > { %2306 = vperm.xlu1 %3374, %v5739_v63   ;;  %2346 = vmatpush.msrb.mxu1 %v3790_v6  ;;  %v2214_v29 = vsel %vm453_vm0, %v3784_v58, %v3785_v54 }
 0x608   : > { %v3778_v41 = vpop.permute.xlu1 %3777  ;;  %v3793_v24 = vpop.permute.xlu0 %3792  ;;  %2317 = vmatpush.msrb.mxu0 %v2216_v16 }
 0x609   : > { %v3780_v1 = vunpack.i.h.bf16 %v3778_v41  ;;  %v3779_v3 = vunpack.i.l.bf16 %v3778_v41  ;;  %v3795_v38 = vunpack.i.h.bf16 %v3793_v24  ;;  %v3794_v56 = vunpack.i.l.bf16 %v3793_v24 }
 0x60b   : > { %2347 = vmatpush.msrb.mxu1 %v3780_v1  ;;  %v2215_v18 = vsel %vm453_vm0, %v3779_v3, %v3780_v1  ;;  %v2213_v61 = vsel %vm453_vm0, %v3794_v56, %v3795_v38 }
 0x60c   : > { %2318 = vmatpush.msrb.mxu0 %v2215_v18  ;;  %1800 = vmatmul.f32.gmra.mxu1 %v4038_v30 }
 0x60d   : > { %2348 = vmatpush.msrb.mxu1 %v3785_v54  ;;  %2296 = vperm.xlu0 %3313, %v5752_v49  }
 0x60e   : > { %2319 = vmatpush.msrb.mxu0 %v2214_v29  ;;  %2813 = vperm.xlu2 %3375, %v2807_v44  }
 0x60f   : > { %2291 = vperm.xlu1 %3374, %v5761_v7   ;;  %2349 = vmatpush.msrb.mxu1 %v3795_v38 }
 0x610   : > { %v3798_v34 = vpop.permute.xlu1 %3797  ;;  %2320 = vmatpush.msrb.mxu0 %v2213_v61 }
 0x611   : > { %v3800_v9 = vunpack.i.h.bf16 %v3798_v34  ;;  %v3799_v52 = vunpack.i.l.bf16 %v3798_v34  ;;  %2350 = vmatpush.msrb.mxu1 %v5558_v33 }
 0x612   : > { %2321 = vmatpush.msrb.mxu0 %v5561_v57 }
 0x613   : > { %v2794_v13 = vsel %vm591_vm2, %v3799_v52, %v3800_v9  ;;  %2351 = vmatpush.msrb.mxu1 %v5549_v39 }
 0x614   : > { %2322 = vmatpush.msrb.mxu0 %v5546_v15  ;;  %2831 = vmatpush.msrb.mxu3 %v2794_v13 }
 0x615   : > { %2823 = vperm.xlu0 %3313, %v2809_v59   ;;  %2352 = vmatpush.msrb.mxu1 %v5555_v17 }
 0x616   : > { %2323 = vmatpush.msrb.mxu0 %v5552_v55 }
 0x617   : > { %2818 = vperm.xlu1 %3374, %v2808_v4   ;;  %2353 = vmatpush.msrb.mxu1 %v5576_v25 }
 0x618   : > { %2324 = vmatpush.msrb.mxu0 %v5573_v11  ;;  %2354 = vmatmul.f32.vlgmr.msrb.gmra.mxu1 %v5356_v19 }
 0x619   : > { %2325 = vmatmul.f32.vlgmr.msrb.gmra.mxu0 %v5356_v19 }
 0x61a   : > { %2860 = vmatpush.msra.mxu0 %v3800_v9 }
 0x620   : > { %2357 = vmatmul.f32.gmra.mxu1 %v5375_v60 }
 0x621   : > { %2328 = vmatmul.f32.gmra.mxu0 %v5375_v60 }
 0x628   : > { %2360 = vmatmul.f32.gmra.mxu1 %v5391_v36 }
 0x629   : > { %2331 = vmatmul.f32.gmra.mxu0 %v5391_v36 }
 0x630   : > { %2363 = vmatmul.f32.gmra.mxu1 %v5405_v23 }
 0x631   : > { %2334 = vmatmul.f32.gmra.mxu0 %v5405_v23 }
 0x638   : > { %v3803_v15 = vpop.permute.xlu2 %3802 }
 0x639   : > { %v3805_v39 = vunpack.i.h.bf16 %v3803_v15  ;;  %v3804_v55 = vunpack.i.l.bf16 %v3803_v15 }
 0x63b   : > { %2861 = vmatpush.msra.mxu0 %v3805_v39  ;;  %v2793_v17 = vsel %vm591_vm2, %v3804_v55, %v3805_v39 }
 0x63c   : > { %2832 = vmatpush.msrb.mxu3 %v2793_v17 }
 0x640   : > { %v3818_v19 = vpop.permute.xlu2 %3817 }
 0x641   : > { %v3820_v26 = vunpack.i.h.bf16 %v3818_v19  ;;  %v3819_v36 = vunpack.i.l.bf16 %v3818_v19 }
 0x643   : > { %v2766_v48 = vsel %vm522_vm1, %v3819_v36, %v3820_v26 }
 0x648   : > { %v3833_v23 = vpop.permute.xlu2 %3832 }
 0x649   : > { %v3835_v14 = vunpack.i.h.bf16 %v3833_v23  ;;  %v3834_v20 = vunpack.i.l.bf16 %v3833_v23 }
 0x64b   : > { %v2763_v0 = vsel %vm522_vm1, %v3834_v20, %v3835_v14 }
 0x650   : > { %v3848_v40 = vpop.permute.xlu2 %3847 }
 0x651   : > { %v3850_v24 = vunpack.i.h.bf16 %v3848_v40  ;;  %v3849_v58 = vunpack.i.l.bf16 %v3848_v40 }
 0x653   : > { %v2736_v44 = vsel %vm453_vm0, %v3849_v58, %v3850_v24 }
 0x65f   : > { %v3808_v33 = vpop.permute.xlu0 %3807 }
 0x660   : > { %v3813_v57 = vpop.permute.xlu1 %3812  ;;  %v3810_v11 = vunpack.i.h.bf16 %v3808_v33  ;;  %v3809_v60 = vunpack.i.l.bf16 %v3808_v33 }
 0x661   : > { %v3815_v25 = vunpack.i.h.bf16 %v3813_v57  ;;  %v3814_v46 = vunpack.i.l.bf16 %v3813_v57 }
 0x662   : > { %2862 = vmatpush.msra.mxu0 %v3810_v11  ;;  %v2792_v12 = vsel %vm591_vm2, %v3809_v60, %v3810_v11 }
 0x663   : > { %2833 = vmatpush.msrb.mxu3 %v2792_v12  ;;  %v2791_v5 = vsel %vm591_vm2, %v3814_v46, %v3815_v25 }
 0x664   : > { %2863 = vmatpush.msra.mxu0 %v3815_v25 }
 0x665   : > { %2834 = vmatpush.msrb.mxu3 %v2791_v5 }
 0x666   : > { %2864 = vmatpush.msra.mxu0 %v3820_v26 }
 0x667   : > { %v3823_v27 = vpop.permute.xlu0 %3822  ;;  %2835 = vmatpush.msrb.mxu3 %v2766_v48 }
 0x668   : > { %v3825_v50 = vunpack.i.h.bf16 %v3823_v27  ;;  %v3824_v8 = vunpack.i.l.bf16 %v3823_v27 }
 0x669   : > { %v3828_v21 = vpop.permute.xlu1 %3827 }
 0x66a   : > { %v3830_v6 = vunpack.i.h.bf16 %v3828_v21  ;;  %v3829_v62 = vunpack.i.l.bf16 %v3828_v21  ;;  %2865 = vmatpush.msra.mxu0 %v3825_v50  ;;  %v2765_v42 = vsel %vm522_vm1, %v3824_v8, %v3825_v50 }
 0x66b   : > { %2836 = vmatpush.msrb.mxu3 %v2765_v42 }
 0x66c   : > { %2866 = vmatpush.msra.mxu0 %v3830_v6  ;;  %v2764_v53 = vsel %vm522_vm1, %v3829_v62, %v3830_v6 }
 0x66d   : > { %2837 = vmatpush.msrb.mxu3 %v2764_v53 }
 0x66e   : > { %2867 = vmatpush.msra.mxu0 %v3835_v14 }
 0x66f   : > { %v3838_v35 = vpop.permute.xlu0 %3837  ;;  %2838 = vmatpush.msrb.mxu3 %v2763_v0 }
 0x670   : > { %v3840_v16 = vunpack.i.h.bf16 %v3838_v35  ;;  %v3839_v41 = vunpack.i.l.bf16 %v3838_v35 }
 0x671   : > { %v3843_v54 = vpop.permute.xlu1 %3842  ;;  %v5801_v56 = vpop.f32.mrf.mxu1 }
 0x672   : > { %v3845_v1 = vunpack.i.h.bf16 %v3843_v54  ;;  %v3844_v3 = vunpack.i.l.bf16 %v3843_v54  ;;  %2868 = vmatpush.msra.mxu0 %v3840_v16  ;;  %v2738_v38 = vsel %vm453_vm0, %v3839_v41, %v3840_v16 }
 0x673   : > { %2839 = vmatpush.msrb.mxu3 %v2738_v38 }
 0x674   : > { %2869 = vmatpush.msra.mxu0 %v3845_v1  ;;  %v2737_v18 = vsel %vm453_vm0, %v3844_v3, %v3845_v1 }
 0x675   : > { %2840 = vmatpush.msrb.mxu3 %v2737_v18 }
 0x676   : > { %2870 = vmatpush.msra.mxu0 %v3850_v24 }
 0x677   : > { %v3853_v29 = vpop.permute.xlu0 %3852  ;;  %2841 = vmatpush.msrb.mxu3 %v2736_v44 }
 0x678   : > { %v3855_v30 = vunpack.i.h.bf16 %v3853_v29  ;;  %v3854_v61 = vunpack.i.l.bf16 %v3853_v29 }
 0x679   : > { %v5806_v9 = vpop.f32.mrf.mxu1  ;;  %v2307_v19 = vpop.permute.xlu1 %2306 }
 0x67a   : > { %2871 = vmatpush.msra.mxu0 %v3855_v30  ;;  %v2735_v34 = vsel %vm453_vm0, %v3854_v61, %v3855_v30 }
 0x67b   : > { %2842 = vmatpush.msrb.mxu3 %v2735_v34 }
 0x67c   : > { %2872 = vmatpush.msra.mxu0 %v5608_v31  ;;  %v6187_v31 = vld [vmem:[#allocation13_spill] sm:$0xff] }
 0x67d   : > { %2843 = vmatpush.msrb.mxu3 %v5606_v43 }
 0x67e   : > { %2873 = vmatpush.msra.mxu0 %v5638_v28 }
 0x67f   : > { %2844 = vmatpush.msrb.mxu3 %v5642_v2 }
 0x680   : > { %2874 = vmatpush.msra.mxu0 %v5685_v47  ;;  %v6188_v47 = vld [vmem:[#allocation16_spill] sm:$0xff] }
 0x681   : > { %2845 = vmatpush.msrb.mxu3 %v5687_v10  ;;  %v5817_v52 = vpop.f32.mrf.mxu1  ;;  %v2297_v10 = vpop.permute.xlu0 %2296 }
 0x682   : > { %2875 = vmatpush.msra.mxu0 %v5690_v45  ;;  %v2292_v46 = vpop.permute.xlu1 %2291 }
 0x683   : > { %2846 = vmatpush.msrb.mxu3 %v5693_v22  ;;  %2876 = vmatmul.f32.vlgmr.msra.gmra.mxu0 %v5424_v37 }
 0x684   : > { %2847 = vmatmul.f32.vlgmr.msrb.gmra.mxu3 %v5424_v37 }
 0x689   : > { %v5821_v43 = vpop.f32.mrf.mxu1  ;;  %v2824_v20 = vpop.permute.xlu0 %2823 }
 0x68a   : > { %v2819_v14 = vpop.permute.xlu1 %2818 }
 0x68b   : > { %2879 = vmatmul.f32.gmra.mxu0 %v5438_v51 }
 0x68c   : > { %2850 = vmatmul.f32.gmra.mxu3 %v5438_v51  ;;  %v2302_v51 = vpop.permute.xlu2 %2301 }
 0x693   : > { %2882 = vmatmul.f32.gmra.mxu0 %v6187_v31 }
 0x694   : > { %2853 = vmatmul.f32.gmra.mxu3 %v6187_v31  ;;  %v2829_v27 = vpop.permute.xlu2 %2828 }
 0x695   : > { %v2355_v28 = vpop.f32.mrf.mxu1 }
 0x696   : > { %v2326_v2 = vpop.f32.mrf.mxu0  ;;  %v2356_v26 = vadd.f32 %v2355_v28, %v2292_v46 }
 0x697   : > { %v5843_v36 = vadd.f32 %v2326_v2, %v2292_v46 }
 0x699   : > { %v3911_v12 = vpack.i.bf16 %v2356_v26, %v5843_v36 }
 0x69b   : > { %2885 = vmatmul.f32.gmra.mxu0 %v6188_v47 }
 0x69c   : > { %2856 = vmatmul.f32.gmra.mxu3 %v6188_v47  ;;  %v2814_v21 = vpop.permute.xlu2 %2813 }
 0x69d   : > { %v2358_v45 = vpop.f32.mrf.mxu1 }
 0x69e   : > { %v2329_v22 = vpop.f32.mrf.mxu0  ;;  %v2359_v37 = vadd.f32 %v2358_v45, %v2297_v10 }
 0x69f   : > { %v5828_v59 = vadd.f32 %v2329_v22, %v2297_v10 }
 0x6a1   : > { %v3856_v13 = vpack.i.bf16 %v2359_v37, %v5828_v59 }
 0x6a3   : > { %3857 = vrot.lane.b32.xlu2 %v3856_v13, %s4053_s14 }
 0x6a5   : > { %v2361_v4 = vpop.f32.mrf.mxu1 }
 0x6a6   : > { %v2332_v15 = vpop.f32.mrf.mxu0  ;;  %v2362_v39 = vadd.f32 %v2361_v4, %v2302_v51 }
 0x6a7   : > { %v5832_v55 = vadd.f32 %v2332_v15, %v2302_v51 }
 0x6a9   : > { %v3861_v17 = vpack.i.bf16 %v2362_v39, %v5832_v55 }
 0x6ab   : > { %3862 = vrot.lane.b32.xlu1 %v3861_v17, %s4053_s14  ;;  %3877 = vrot.lane.b32.xlu2 %v3861_v17, %s4052_s13 }
 0x6ad   : > { %v2364_v33 = vpop.f32.mrf.mxu1 }
 0x6ae   : > { %v2335_v57 = vpop.f32.mrf.mxu0  ;;  %v2365_v11 = vadd.f32 %v2364_v33, %v2307_v19 }
 0x6af   : > { %v5837_v60 = vadd.f32 %v2335_v57, %v2307_v19 }
 0x6b1   : > { %v3866_v25 = vpack.i.bf16 %v2365_v11, %v5837_v60 }
 0x6b3   : > { %3867 = vrot.lane.b32.xlu0 %v3866_v25, %s4053_s14  ;;  %3887 = vrot.lane.b32.xlu1 %v3866_v25, %s4052_s13 }
 0x6b4   : > { %3907 = vrot.lane.b32.xlu2 %v3866_v25, %s4051_s12 }
 0x6bb   : > { %3892 = vrot.lane.b32.xlu1 %v3911_v12, %s4052_s13  ;;  %3872 = vrot.lane.b32.xlu0 %v3911_v12, %s4053_s14 }
 0x6bc   : > { %3912 = vrot.lane.b32.xlu2 %v3911_v12, %s4051_s12 }
 0x6c3   : > { %3902 = vrot.lane.b32.xlu1 %v3856_v13, %s4051_s12  ;;  %3882 = vrot.lane.b32.xlu0 %v3856_v13, %s4052_s13 }
 0x6cb   : > { %3897 = vrot.lane.b32.xlu0 %v3861_v17, %s4051_s12 }
 0x6fd   : > { %v3858_v24 = vpop.permute.xlu2 %3857 }
 0x6fe   : > { %v3860_v31 = vunpack.i.h.bf16 %v3858_v24  ;;  %v3859_v28 = vunpack.i.l.bf16 %v3858_v24 }
 0x700   : > { %v2877_v23 = vpop.f32.mrf.mxu0  ;;  %v2440_v37 = vsel %vm591_vm2, %v3859_v28, %v3860_v31 }
 0x701   : > { %v5852_v62 = vadd.f32 %v2877_v23, %v2814_v21 }
 0x705   : > { %v3878_v10 = vpop.permute.xlu2 %3877 }
 0x706   : > { %v3880_v17 = vunpack.i.h.bf16 %v3878_v10  ;;  %v3879_v19 = vunpack.i.l.bf16 %v3878_v10 }
 0x707   : > { %v2848_v5 = vpop.f32.mrf.mxu3 }
 0x708   : > { %v2880_v48 = vpop.f32.mrf.mxu0  ;;  %v5880_v2 = vadd.f32 %v2848_v5, %v2814_v21  ;;  %v2417_v46 = vsel %vm522_vm1, %v3879_v19, %v3880_v17 }
 0x709   : > { %v5869_v58 = vadd.f32 %v2880_v48, %v2819_v14 }
 0x70e   : > { %v3908_v25 = vpop.permute.xlu2 %3907 }
 0x70f   : > { %v2851_v50 = vpop.f32.mrf.mxu3 }
 0x710   : > { %v2883_v8 = vpop.f32.mrf.mxu0  ;;  %v5877_v38 = vadd.f32 %v2851_v50, %v2819_v14  ;;  %v3909_v50 = vunpack.i.l.bf16 %v3908_v25 }
 0x711   : > { %v5856_v40 = vadd.f32 %v2883_v8, %v2824_v20 }
 0x712   : > { %v3951_v22 = vpack.i.bf16 %v5880_v2, %v5877_v38 }
 0x717   : > { %v2854_v6 = vpop.f32.mrf.mxu3 }
 0x718   : > { %v5854_v42 = vadd.f32 %v2854_v6, %v2824_v20  ;;  %v2886_v53 = vpop.f32.mrf.mxu0  ;;  %v3913_v6 = vpop.permute.xlu2 %3912 }
 0x719   : > { %v5858_v0 = vadd.f32 %v2886_v53, %v2829_v27 }
 0x71a   : > { %v5862_v35 = vpack.i.bf16 %v5854_v42, %v5852_v62 }
 0x71b   : > { %v3936_v16 = vpack.i.bf16 %v5856_v40, %v5858_v0 }
 0x71c   : > { %3917 = vrot.lane.b32.xlu2 %v5862_v35, %s4053_s14 }
 0x71d   : > { %v3863_v41 = vpop.permute.xlu1 %3862  ;;  %3937 = vrot.lane.b32.xlu0 %v3936_v16, %s4053_s14 }
 0x71e   : > { %v3865_v44 = vunpack.i.h.bf16 %v3863_v41  ;;  %v3864_v29 = vunpack.i.l.bf16 %v3863_v41 }
 0x71f   : > { %v2857_v54 = vpop.f32.mrf.mxu3 }
 0x720   : > { %v5871_v1 = vadd.f32 %v2857_v54, %v2829_v27  ;;  %v2441_v45 = vsel %vm591_vm2, %v3864_v29, %v3865_v44  ;;  %v3910_v27 = vunpack.i.h.bf16 %v3908_v25 }
 0x722   : > { %v3931_v3 = vpack.i.bf16 %v5871_v1, %v5869_v58  ;;  %v2394_v20 = vsel %vm453_vm0, %v3909_v50, %v3910_v27 }
 0x724   : > { %3932 = vrot.lane.b32.xlu2 %v3931_v3, %s4052_s13  ;;  %3922 = vrot.lane.b32.xlu1 %v3931_v3, %s4053_s14 }
 0x725   : > { %v3868_v18 = vpop.permute.xlu0 %3867  ;;  %3942 = vrot.lane.b32.xlu0 %v3936_v16, %s4052_s13  ;;  %v3888_v34 = vpop.permute.xlu1 %3887 }
 0x726   : > { %v3870_v30 = vunpack.i.h.bf16 %v3868_v18  ;;  %v3869_v61 = vunpack.i.l.bf16 %v3868_v18  ;;  %v3890_v51 = vunpack.i.h.bf16 %v3888_v34  ;;  %v3889_v4 = vunpack.i.l.bf16 %v3888_v34 }
 0x727   : > { %v3914_v18 = vunpack.i.l.bf16 %v3913_v6 }
 0x728   : > { %v2442_v47 = vsel %vm591_vm2, %v3869_v61, %v3870_v30  ;;  %v2418_v11 = vsel %vm522_vm1, %v3889_v4, %v3890_v51 }
 0x729   : > { %2475 = vmatpush.msrb.mxu2 %v2442_v47 }
 0x72b   : > { %2476 = vmatpush.msrb.mxu2 %v2441_v45 }
 0x72c   : > { %3952 = vrot.lane.b32.xlu2 %v3951_v22, %s4052_s13  ;;  %3927 = vrot.lane.b32.xlu1 %v3951_v22, %s4053_s14 }
 0x72d   : > { %2477 = vmatpush.msrb.mxu2 %v2440_v37  ;;  %v3873_v13 = vpop.permute.xlu0 %3872  ;;  %3947 = vrot.lane.b32.xlu0 %v5862_v35, %s4052_s13  ;;  %v3893_v57 = vpop.permute.xlu1 %3892 }
 0x72e   : > { %v3875_v15 = vunpack.i.h.bf16 %v3873_v13  ;;  %v3874_v39 = vunpack.i.l.bf16 %v3873_v13  ;;  %v3895_v12 = vunpack.i.h.bf16 %v3893_v57  ;;  %v3894_v23 = vunpack.i.l.bf16 %v3893_v57 }
 0x730   : > { %v2439_v33 = vsel %vm591_vm2, %v3874_v39, %v3875_v15  ;;  %v2415_v14 = vsel %vm522_vm1, %v3894_v23, %v3895_v12 }
 0x731   : > { %2478 = vmatpush.msrb.mxu2 %v2439_v33 }
 0x733   : > { %2479 = vmatpush.msrb.mxu2 %v2418_v11 }
 0x734   : > { %3972 = vrot.lane.b32.xlu2 %v3951_v22, %s4051_s12  ;;  %3962 = vrot.lane.b32.xlu1 %v3936_v16, %s4051_s12 }
 0x735   : > { %v3883_v26 = vpop.permute.xlu0 %3882  ;;  %2480 = vmatpush.msrb.mxu2 %v2417_v46  ;;  %3957 = vrot.lane.b32.xlu0 %v3931_v3, %s4051_s12  ;;  %v3903_v21 = vpop.permute.xlu1 %3902  ;;  %v3915_v3 = vunpack.i.h.bf16 %v3913_v6 }
 0x736   : > { %v3885_v5 = vunpack.i.h.bf16 %v3883_v26  ;;  %v3884_v48 = vunpack.i.l.bf16 %v3883_v26  ;;  %v3905_v16 = vunpack.i.h.bf16 %v3903_v21  ;;  %v3904_v41 = vunpack.i.l.bf16 %v3903_v21 }
 0x738   : > { %v2416_v8 = vsel %vm522_vm1, %v3884_v48, %v3885_v5 }
 0x739   : > { %2481 = vmatpush.msrb.mxu2 %v2416_v8 }
 0x73b   : > { %2482 = vmatpush.msrb.mxu2 %v2415_v14 }
 0x73c   : > { %2996 = vperm.xlu2 %3375, %v5752_v49   ;;  %3967 = vrot.lane.b32.xlu1 %v5862_v35, %s4051_s12  ;;  %v2392_v49 = vsel %vm453_vm0, %v3904_v41, %v3905_v16  ;;  %v2391_v35 = vsel %vm453_vm0, %v3914_v18, %v3915_v3 }
 0x73d   : > { %v3898_v53 = vpop.permute.xlu0 %3897  ;;  %2483 = vmatpush.msrb.mxu2 %v2394_v20  ;;  %3006 = vperm.xlu0 %3313, %v5739_v63   ;;  %v5916_v63 = vld [vmem:[%s6081_s7] sm:$0xff] }
 0x73e   : > { %v3900_v24 = vunpack.i.h.bf16 %v3898_v53  ;;  %v3899_v54 = vunpack.i.l.bf16 %v3898_v53 }
 0x740   : > { %v2393_v44 = vsel %vm453_vm0, %v3899_v54, %v3900_v24 }
 0x741   : > { %2484 = vmatpush.msrb.mxu2 %v2393_v44 }
 0x743   : > { %2485 = vmatpush.msrb.mxu2 %v2392_v49 }
 0x744   : > { %3001 = vperm.xlu1 %3374, %v5722_v32   ;;  %v5922_v32 = vld [vmem:[%s6081_s7 + $0x8] sm:$0xff] }
 0x745   : > { %2486 = vmatpush.msrb.mxu2 %v2391_v35  ;;  %2991 = vperm.xlu0 %3313, %v5761_v7   ;;  %v5928_v7 = vld [vmem:[%s6081_s7 + $0x10] sm:$0xff] }
 0x747   : > { %2487 = vmatpush.msrb.mxu2 %v5837_v60 }
 0x749   : > { %2488 = vmatpush.msrb.mxu2 %v5832_v55 }
 0x74b   : > { %2489 = vmatpush.msrb.mxu2 %v5828_v59 }
 0x74d   : > { %2490 = vmatpush.msrb.mxu2 %v5843_v36  ;;  %v5934_v36 = vld [vmem:[%s6081_s7 + $0x18] sm:$0xff] }
 0x74e   : > { %2491 = vmatmul.f32.vlgmr.msrb.gmra.mxu2 %v5916_v63 }
 0x756   : > { %2494 = vmatmul.f32.gmra.mxu2 %v5922_v32 }
 0x75e   : > { %2497 = vmatmul.f32.gmra.mxu2 %v5928_v7 }
 0x766   : > { %2500 = vmatmul.f32.gmra.mxu2 %v5934_v36 }
 0x776   : > { %v3918_v59 = vpop.permute.xlu2 %3917 }
 0x777   : > { %v3920_v47 = vunpack.i.h.bf16 %v3918_v59  ;;  %v3919_v10 = vunpack.i.l.bf16 %v3918_v59  ;;  %v2981_v59 = vld [vmem:[%s6079_s5] sm:$0xff] }
 0x77e   : > { %v3933_v28 = vpop.permute.xlu2 %3932 }
 0x77f   : > { %v3934_v4 = vunpack.i.l.bf16 %v3933_v28  ;;  %v3935_v11 = vunpack.i.h.bf16 %v3933_v28 }
 0x786   : > { %v3953_v57 = vpop.permute.xlu2 %3952 }
 0x787   : > { %v3954_v26 = vunpack.i.l.bf16 %v3953_v57  ;;  %v3955_v50 = vunpack.i.h.bf16 %v3953_v57 }
 0x789   : > { %v2942_v21 = vsel %vm522_vm1, %v3954_v26, %v3934_v4  ;;  %v2451_v26 = vld [vmem:[%s6082_s8] sm:$0xff] }
 0x78e   : > { %v3973_v16 = vpop.permute.xlu2 %3972 }
 0x78f   : > { %v3938_v55 = vpop.permute.xlu0 %3937  ;;  %v3974_v3 = vunpack.i.l.bf16 %v3973_v16  ;;  %v3975_v44 = vunpack.i.h.bf16 %v3973_v16 }
 0x790   : > { %v3939_v60 = vunpack.i.l.bf16 %v3938_v55  ;;  %v3940_v29 = vunpack.i.h.bf16 %v3938_v55 }
 0x792   : > { %3038 = vmatpush.msra.mxu2 %v3939_v60  ;;  %v2971_v37 = vsel %vm591_vm2, %v3920_v47, %v3940_v29 }
 0x794   : > { %3039 = vmatpush.msra.mxu2 %v3940_v29 }
 0x796   : > { %v3923_v30 = vpop.permute.xlu1 %3922 }
 0x797   : > { %v3925_v61 = vunpack.i.h.bf16 %v3923_v30  ;;  %v3924_v34 = vunpack.i.l.bf16 %v3923_v30  ;;  %v3943_v31 = vpop.permute.xlu0 %3942 }
 0x798   : > { %v3944_v22 = vunpack.i.l.bf16 %v3943_v31  ;;  %v3945_v13 = vunpack.i.h.bf16 %v3943_v31 }
 0x799   : > { %3040 = vmatpush.msra.mxu2 %v3924_v34  ;;  %v2972_v45 = vsel %vm591_vm2, %v3925_v61, %v3939_v60  ;;  %v2997_v60 = vpop.permute.xlu2 %2996 }
 0x79a   : > { %3009 = vmatpush.msra.mxu1 %v2972_v45  ;;  %v2944_v12 = vsel %vm522_vm1, %v3935_v11, %v3944_v22 }
 0x79b   : > { %3041 = vmatpush.msra.mxu2 %v3919_v10 }
 0x79c   : > { %3010 = vmatpush.msra.mxu1 %v2971_v37 }
 0x79d   : > { %3042 = vmatpush.msra.mxu2 %v3944_v22 }
 0x79e   : > { %v3928_v51 = vpop.permute.xlu1 %3927 }
 0x79f   : > { %v3930_v15 = vunpack.i.h.bf16 %v3928_v51  ;;  %v3929_v39 = vunpack.i.l.bf16 %v3928_v51  ;;  %v3948_v17 = vpop.permute.xlu0 %3947  ;;  %3043 = vmatpush.msra.mxu2 %v3945_v13 }
 0x7a0   : > { %v3949_v19 = vunpack.i.l.bf16 %v3948_v17  ;;  %v3950_v25 = vunpack.i.h.bf16 %v3948_v17 }
 0x7a1   : > { %3044 = vmatpush.msra.mxu2 %v3934_v4  ;;  %v2970_v33 = vsel %vm591_vm2, %v3929_v39, %v3924_v34  ;;  %v2969_v46 = vsel %vm591_vm2, %v3930_v15, %v3919_v10 }
 0x7a2   : > { %3011 = vmatpush.msra.mxu1 %v2970_v33  ;;  %v2943_v27 = vsel %vm522_vm1, %v3950_v25, %v3945_v13  ;;  %v2941_v6 = vsel %vm522_vm1, %v3955_v50, %v3949_v19  ;;  %v1054_v25 = vld [vmem:[%s6082_s8 + $0x10] sm:$0xff] }
 0x7a3   : > { %3045 = vmatpush.msra.mxu2 %v3949_v19 }
 0x7a4   : > { %3012 = vmatpush.msra.mxu1 %v2969_v46  ;;  %v1752_v46 = vld [vmem:[%s6082_s8 + $0x8] sm:$0xff] }
 0x7a6   : > { %v3963_v23 = vpop.permute.xlu1 %3962  ;;  %3013 = vmatpush.msra.mxu1 %v2944_v12  ;;  %v2454_v12 = vld [vmem:[%s6082_s8 + $0x18] sm:$0xff] }
 0x7a7   : > { %v3964_v5 = vunpack.i.l.bf16 %v3963_v23  ;;  %v3958_v48 = vpop.permute.xlu0 %3957  ;;  %v3965_v8 = vunpack.i.h.bf16 %v3963_v23 }
 0x7a8   : > { %3014 = vmatpush.msra.mxu1 %v2943_v27  ;;  %v3960_v14 = vunpack.i.h.bf16 %v3958_v48  ;;  %v3959_v20 = vunpack.i.l.bf16 %v3958_v48 }
 0x7a9   : > { %3046 = vmatpush.msra.mxu2 %v3964_v5 }
 0x7aa   : > { %3015 = vmatpush.msra.mxu1 %v2942_v21  ;;  %v2916_v53 = vsel %vm453_vm0, %v3960_v14, %v3964_v5  ;;  %v2914_v49 = vsel %vm453_vm0, %v3974_v3, %v3959_v20 }
 0x7ab   : > { %3047 = vmatpush.msra.mxu2 %v3965_v8 }
 0x7ac   : > { %3016 = vmatpush.msra.mxu1 %v2941_v6 }
 0x7ad   : > { %3048 = vmatpush.msra.mxu2 %v3959_v20 }
 0x7ae   : > { %v3968_v41 = vpop.permute.xlu1 %3967  ;;  %3017 = vmatpush.msra.mxu1 %v2916_v53 }
 0x7af   : > { %v3970_v24 = vunpack.i.h.bf16 %v3968_v41  ;;  %v3969_v54 = vunpack.i.l.bf16 %v3968_v41  ;;  %v3007_v13 = vpop.permute.xlu0 %3006 }
 0x7b1   : > { %3049 = vmatpush.msra.mxu2 %v3969_v54  ;;  %v2915_v18 = vsel %vm453_vm0, %v3970_v24, %v3965_v8  ;;  %v2913_v35 = vsel %vm453_vm0, %v3975_v44, %v3969_v54  ;;  %v6189_v24 = vld [vmem:[#allocation17_spill] sm:$0xff] }
 0x7b2   : > { %3018 = vmatpush.msra.mxu1 %v2915_v18 }
 0x7b3   : > { %3050 = vmatpush.msra.mxu2 %v5858_v0  ;;  %v2983_v0 = vld [vmem:[%s6079_s5 + $0x10] sm:$0xff] }
 0x7b4   : > { %3019 = vmatpush.msra.mxu1 %v2914_v49 }
 0x7b5   : > { %3051 = vmatpush.msra.mxu2 %v5856_v40  ;;  %v2982_v40 = vld [vmem:[%s6079_s5 + $0x8] sm:$0xff] }
 0x7b6   : > { %3020 = vmatpush.msra.mxu1 %v2913_v35  ;;  %v3002_v28 = vpop.permute.xlu1 %3001 }
 0x7b7   : > { %3052 = vmatpush.msra.mxu2 %v5869_v58  ;;  %v2992_v19 = vpop.permute.xlu0 %2991 }
 0x7b8   : > { %3021 = vmatpush.msra.mxu1 %v5871_v1 }
 0x7b9   : > { %3053 = vmatpush.msra.mxu2 %v5852_v62  ;;  %v2984_v62 = vld [vmem:[%s6079_s5 + $0x18] sm:$0xff] }
 0x7ba   : > { %3022 = vmatpush.msra.mxu1 %v5854_v42  ;;  %3054 = vmatmul.f32.vlgmr.msra.gmra.mxu2 %v2981_v59 }
 0x7bc   : > { %3023 = vmatpush.msra.mxu1 %v5877_v38 }
 0x7be   : > { %3024 = vmatpush.msra.mxu1 %v5880_v2 }
 0x7bf   : > { %3025 = vmatmul.f32.vlgmr.msra.gmra.mxu1 %v2981_v59 }
 0x7c2   : > { %3057 = vmatmul.f32.gmra.mxu2 %v2982_v40 }
 0x7c7   : > { %3028 = vmatmul.f32.gmra.mxu1 %v2982_v40 }
 0x7ca   : > { %3060 = vmatmul.f32.gmra.mxu2 %v2983_v0 }
 0x7cf   : > { %3031 = vmatmul.f32.gmra.mxu1 %v2983_v0 }
 0x7d1   : > { %v5969_v42 = vpop.f32.mrf.mxu2 }
 0x7d2   : > { %3063 = vmatmul.f32.gmra.mxu2 %v2984_v62 }
 0x7d7   : > { %3034 = vmatmul.f32.gmra.mxu1 %v2984_v62 }
 0x7d9   : > { %v5971_v58 = vpop.f32.mrf.mxu2 }
 0x7e1   : > { %v5973_v1 = vpop.f32.mrf.mxu2 }
 0x7e9   : > { %v5975_v38 = vpop.f32.mrf.mxu2 }
 0x83c   : > { %v3026_v2 = vpop.f32.mrf.mxu1 }
 0x83d   : > { %v3055_v55 = vpop.f32.mrf.mxu2  ;;  %v5992_v33 = vadd.f32 %v3026_v2, %v2992_v19 }
 0x83e   : > { %v3056_v57 = vadd.f32 %v3055_v55, %v2992_v19 }
 0x840   : > { %v4031_v11 = vpack.i.bf16 %v3056_v57, %v5992_v33 }
 0x844   : > { %v3029_v29 = vpop.f32.mrf.mxu1 }
 0x845   : > { %v5977_v30 = vadd.f32 %v3029_v29, %v2997_v60  ;;  %v3058_v61 = vpop.f32.mrf.mxu2 }
 0x846   : > { %v3059_v34 = vadd.f32 %v3058_v61, %v2997_v60 }
 0x848   : > { %v4021_v31 = vpack.i.bf16 %v3059_v34, %v5977_v30 }
 0x84a   : > { %3977 = vrot.lane.b32.xlu0 %v4021_v31, %s4053_s14 }
 0x84c   : > { %v3032_v47 = vpop.f32.mrf.mxu1 }
 0x84d   : > { %v5981_v10 = vadd.f32 %v3032_v47, %v3002_v28  ;;  %v3061_v45 = vpop.f32.mrf.mxu2 }
 0x84e   : > { %v3062_v22 = vadd.f32 %v3061_v45, %v3002_v28 }
 0x850   : > { %v4016_v37 = vpack.i.bf16 %v3062_v22, %v5981_v10 }
 0x852   : > { %3982 = vrot.lane.b32.xlu2 %v4016_v37, %s4053_s14  ;;  %3997 = vrot.lane.b32.xlu0 %v4016_v37, %s4052_s13 }
 0x854   : > { %v3035_v51 = vpop.f32.mrf.mxu1 }
 0x855   : > { %v5986_v4 = vadd.f32 %v3035_v51, %v3007_v13  ;;  %v3064_v15 = vpop.f32.mrf.mxu2 }
 0x856   : > { %v3065_v39 = vadd.f32 %v3064_v15, %v3007_v13 }
 0x858   : > { %v4026_v17 = vpack.i.bf16 %v3065_v39, %v5986_v4 }
 0x85a   : > { %3987 = vrot.lane.b32.xlu1 %v4026_v17, %s4053_s14  ;;  %4007 = vrot.lane.b32.xlu2 %v4026_v17, %s4052_s13 }
 0x85b   : > { %4027 = vrot.lane.b32.xlu0 %v4026_v17, %s4051_s12  ;;  %v6190_v17 = vld [vmem:[#allocation20_spill] sm:$0xff] }
 0x862   : > { %4012 = vrot.lane.b32.xlu2 %v4031_v11, %s4052_s13  ;;  %3992 = vrot.lane.b32.xlu1 %v4031_v11, %s4053_s14 }
 0x863   : > { %4032 = vrot.lane.b32.xlu0 %v4031_v11, %s4051_s12 }
 0x86a   : > { %4022 = vrot.lane.b32.xlu2 %v4021_v31, %s4051_s12  ;;  %4002 = vrot.lane.b32.xlu1 %v4021_v31, %s4052_s13 }
 0x86b   : > { %1068 = vperm.xlu0 %3313, %v1054_v25  }
 0x872   : > { %1063 = vperm.xlu2 %3375, %v1752_v46   ;;  %4017 = vrot.lane.b32.xlu1 %v4016_v37, %s4051_s12  ;;  %s3288_s12 = sshll.u32 %s6194_s10, 7 }
 0x873   : > { %1762 = vperm.xlu0 %3313, %v1752_v46   ;;  %s6019_s29 = scalar_lea.vmem %s6083_s9, %s3288_s12 }
 0x87a   : > { %1757 = vperm.xlu2 %3375, %v2451_v26   ;;  %1058 = vperm.xlu1 %3374, %v2451_v26  }
 0x87b   : > { %2457 = vperm.xlu0 %3313, %v2451_v26  }
 0x882   : > { %1772 = vperm.xlu2 %3375, %v2454_v12   ;;  %1073 = vperm.xlu1 %3374, %v2454_v12  }
 0x883   : > { %2472 = vperm.xlu0 %3313, %v2454_v12  }
 0x88a   : > { %2467 = vperm.xlu2 %3375, %v1054_v25   ;;  %1767 = vperm.xlu1 %3374, %v1054_v25  }
 0x88b   : > { %3167 = vperm.xlu0 %3313, %v1054_v25  }
 0x892   : > { %3162 = vperm.xlu2 %3375, %v1752_v46   ;;  %2462 = vperm.xlu1 %3374, %v1752_v46  }
 0x89a   : > { %3157 = vperm.xlu1 %3374, %v2451_v26  }
 0x8a2   : > { %3172 = vperm.xlu1 %3374, %v2454_v12  }
 0x8ac   : > { %v3983_v23 = vpop.permute.xlu2 %3982 }
 0x8ad   : > { %v3985_v14 = vunpack.i.h.bf16 %v3983_v23  ;;  %v3984_v6 = vunpack.i.l.bf16 %v3983_v23 }
 0x8af   : > { %v3141_v49 = vsel %vm591_vm2, %v3984_v6, %v3985_v14 }
 0x8b4   : > { %v4008_v5 = vpop.permute.xlu2 %4007 }
 0x8b5   : > { %v4010_v59 = vunpack.i.h.bf16 %v4008_v5  ;;  %v4009_v62 = vunpack.i.l.bf16 %v4008_v5 }
 0x8b7   : > { %v3118_v28 = vsel %vm522_vm1, %v4009_v62, %v4010_v59 }
 0x8bc   : > { %v3978_v48 = vpop.permute.xlu0 %3977  ;;  %v4013_v27 = vpop.permute.xlu2 %4012 }
 0x8bd   : > { %v3980_v3 = vunpack.i.h.bf16 %v3978_v48  ;;  %v3979_v18 = vunpack.i.l.bf16 %v3978_v48  ;;  %v4015_v45 = vunpack.i.h.bf16 %v4013_v27 }
 0x8bf   : > { %v3140_v35 = vsel %vm591_vm2, %v3979_v18, %v3980_v3 }
 0x8c4   : > { %v3998_v50 = vpop.permute.xlu0 %3997  ;;  %v6013_v8 = vpop.permute.xlu2 %4022 }
 0x8c5   : > { %v4000_v61 = vunpack.i.h.bf16 %v3998_v50  ;;  %v3999_v34 = vunpack.i.l.bf16 %v3998_v50  ;;  %v4024_v5 = vunpack.i.l.bf16 %v6013_v8 }
 0x8c7   : > { %v3117_v47 = vsel %vm522_vm1, %v3999_v34, %v4000_v61 }
 0x8cc   : > { %v3988_v21 = vpop.permute.xlu1 %3987  ;;  %v1064_v20 = vpop.permute.xlu2 %1063 }
 0x8cd   : > { %v3990_v53 = vunpack.i.h.bf16 %v3988_v21  ;;  %v3989_v16 = vunpack.i.l.bf16 %v3988_v21  ;;  %v4028_v41 = vpop.permute.xlu0 %4027  ;;  %v1097_v54 = vadd.f32 %v6189_v24, %v1064_v20 }
 0x8ce   : > { %v4030_v57 = vunpack.i.h.bf16 %v4028_v41  ;;  %v4029_v11 = vunpack.i.l.bf16 %v4028_v41 }
 0x8cf   : > { %1106 = vst [vmem:[%s6019_s29 + $0x8] sm:$0xff] %v1097_v54  ;;  %v3142_v44 = vsel %vm591_vm2, %v3989_v16, %v3990_v53 }
 0x8d0   : > { %3175 = vmatpush.msra.mxu3 %v3142_v44  ;;  %v3094_v26 = vsel %vm453_vm0, %v4029_v11, %v4030_v57  ;;  %v6192_v44 = vld [vmem:[#allocation18_spill] sm:$0xff] }
 0x8d2   : > { %3176 = vmatpush.msra.mxu3 %v3141_v49 }
 0x8d4   : > { %3177 = vmatpush.msra.mxu3 %v3140_v35  ;;  %v1758_v40 = vpop.permute.xlu2 %1757  ;;  %v3993_v0 = vpop.permute.xlu1 %3992 }
 0x8d5   : > { %v4033_v2 = vpop.permute.xlu0 %4032  ;;  %v1793_v55 = vadd.f32 %v5801_v56, %v1758_v40  ;;  %v3995_v60 = vunpack.i.h.bf16 %v3993_v0  ;;  %v3994_v29 = vunpack.i.l.bf16 %v3993_v0  ;;  %v4014_v56 = vunpack.i.l.bf16 %v4013_v27 }
 0x8d6   : > { %v4035_v20 = vunpack.i.h.bf16 %v4033_v2  ;;  %v4034_v6 = vunpack.i.l.bf16 %v4033_v2 }
 0x8d7   : > { %3273 = vst [vmem:[%s6019_s29 + $0x20] sm:$0xff] %v1793_v55  ;;  %v3139_v31 = vsel %vm591_vm2, %v3994_v29, %v3995_v60  ;;  %v3115_v46 = vsel %vm522_vm1, %v4014_v56, %v4015_v45 }
 0x8d8   : > { %3178 = vmatpush.msra.mxu3 %v3139_v31 }
 0x8da   : > { %3179 = vmatpush.msra.mxu3 %v3118_v28 }
 0x8dc   : > { %v1773_v22 = vpop.permute.xlu2 %1772  ;;  %v4003_v37 = vpop.permute.xlu1 %4002  ;;  %3180 = vmatpush.msra.mxu3 %v3117_v47 }
 0x8dd   : > { %v1069_v13 = vpop.permute.xlu0 %1068  ;;  %v1802_v51 = vadd.f32 %v5821_v43, %v1773_v22  ;;  %v4005_v15 = vunpack.i.h.bf16 %v4003_v37  ;;  %v4004_v39 = vunpack.i.l.bf16 %v4003_v37  ;;  %v4025_v43 = vunpack.i.h.bf16 %v6013_v8 }
 0x8de   : > { %v1100_v19 = vadd.f32 %v6190_v17, %v1069_v13  ;;  %v3091_v8 = vsel %vm453_vm0, %v4034_v6, %v4035_v20 }
 0x8df   : > { %3276 = vst [vmem:[%s6019_s29 + $0x38] sm:$0xff] %v1802_v51  ;;  %v3116_v25 = vsel %vm522_vm1, %v4004_v39, %v4005_v15  ;;  %v3092_v16 = vsel %vm453_vm0, %v4024_v5, %v4025_v43 }
 0x8e0   : > { %1107 = vst [vmem:[%s6019_s29 + $0x10] sm:$0xff] %v1100_v19  ;;  %3181 = vmatpush.msra.mxu3 %v3116_v25 }
 0x8e2   : > { %3182 = vmatpush.msra.mxu3 %v3115_v46 }
 0x8e4   : > { %v2468_v12 = vpop.permute.xlu2 %2467  ;;  %v4018_v23 = vpop.permute.xlu1 %4017  ;;  %3183 = vmatpush.msra.mxu3 %v3094_v26 }
 0x8e5   : > { %v1763_v48 = vpop.permute.xlu0 %1762  ;;  %v2499_v27 = vadd.f32 %v5973_v1, %v2468_v12  ;;  %v4020_v50 = vunpack.i.h.bf16 %v4018_v23  ;;  %v4019_v14 = vunpack.i.l.bf16 %v4018_v23 }
 0x8e6   : > { %v1796_v21 = vadd.f32 %v5806_v9, %v1763_v48  ;;  %v6191_v9 = vld [vmem:[#allocation21_spill] sm:$0xff] }
 0x8e7   : > { %3279 = vst [vmem:[%s6019_s29 + $0x50] sm:$0xff] %v2499_v27  ;;  %v3093_v53 = vsel %vm453_vm0, %v4019_v14, %v4020_v50 }
 0x8e8   : > { %3274 = vst [vmem:[%s6019_s29 + $0x28] sm:$0xff] %v1796_v21  ;;  %3184 = vmatpush.msra.mxu3 %v3093_v53 }
 0x8ea   : > { %3185 = vmatpush.msra.mxu3 %v3092_v16 }
 0x8ec   : > { %v1059_v41 = vpop.permute.xlu1 %1058  ;;  %3186 = vmatpush.msra.mxu3 %v3091_v8  ;;  %v3163_v59 = vpop.permute.xlu2 %3162 }
 0x8ed   : > { %v2458_v1 = vpop.permute.xlu0 %2457  ;;  %v1094_v24 = vadd.f32 %v6191_v9, %v1059_v41 }
 0x8ee   : > { %v2493_v54 = vadd.f32 %v5969_v42, %v2458_v1  ;;  %3187 = vmatpush.msra.mxu3 %v5986_v4 }
 0x8ef   : > { %1105 = vst [vmem:[%s6019_s29] sm:$0xff] %v1094_v24 }
 0x8f0   : > { %3277 = vst [vmem:[%s6019_s29 + $0x40] sm:$0xff] %v2493_v54  ;;  %3188 = vmatpush.msra.mxu3 %v5981_v10 }
 0x8f2   : > { %3189 = vmatpush.msra.mxu3 %v5977_v30 }
 0x8f4   : > { %v1074_v3 = vpop.permute.xlu1 %1073  ;;  %3190 = vmatpush.msra.mxu3 %v5992_v33 }
 0x8f5   : > { %v2473_v18 = vpop.permute.xlu0 %2472  ;;  %v1103_v49 = vadd.f32 %v6192_v44, %v1074_v3  ;;  %3191 = vmatmul.f32.vlgmr.msra.gmra.mxu3 %v5916_v63 }
 0x8f6   : > { %v2502_v42 = vadd.f32 %v5975_v38, %v2473_v18 }
 0x8f7   : > { %1108 = vst [vmem:[%s6019_s29 + $0x18] sm:$0xff] %v1103_v49 }
 0x8f8   : > { %3280 = vst [vmem:[%s6019_s29 + $0x58] sm:$0xff] %v2502_v42 }
 0x8fc   : > { %v1768_v4 = vpop.permute.xlu1 %1767 }
 0x8fd   : > { %v1799_v10 = vadd.f32 %v5817_v52, %v1768_v4  ;;  %3194 = vmatmul.f32.gmra.mxu3 %v5922_v32  ;;  %v3168_v32 = vpop.permute.xlu0 %3167 }
 0x8ff   : > { %3275 = vst [vmem:[%s6019_s29 + $0x30] sm:$0xff] %v1799_v10 }
 0x904   : > { %v2463_v30 = vpop.permute.xlu1 %2462 }
 0x905   : > { %v2496_v33 = vadd.f32 %v5971_v58, %v2463_v30  ;;  %3197 = vmatmul.f32.gmra.mxu3 %v5928_v7 }
 0x907   : > { %3278 = vst [vmem:[%s6019_s29 + $0x48] sm:$0xff] %v2496_v33 }
 0x90c   : > { %v3158_v63 = vpop.permute.xlu1 %3157 }
 0x90d   : > { %3200 = vmatmul.f32.gmra.mxu3 %v5934_v36 }
 0x914   : > { %v3173_v2 = vpop.permute.xlu1 %3172 }
 0x978   : > { %v3192_v38 = vpop.f32.mrf.mxu3 }
 0x979   : > { %v3193_v35 = vadd.f32 %v3192_v38, %v3158_v63 }
 0x97b   : > { %3281 = vst [vmem:[%s6019_s29 + $0x60] sm:$0xff] %v3193_v35 }
 0x980   : > { %v3195_v40 = vpop.f32.mrf.mxu3 }
 0x981   : > { %v3196_v52 = vadd.f32 %v3195_v40, %v3163_v59 }
 0x983   : > { %3282 = vst [vmem:[%s6019_s29 + $0x68] sm:$0xff] %v3196_v52 }
 0x988   : > { %v3198_v0 = vpop.f32.mrf.mxu3 }
 0x989   : > { %v3199_v62 = vadd.f32 %v3198_v0, %v3168_v32 }
 0x98b   : > { %3283 = vst [vmem:[%s6019_s29 + $0x70] sm:$0xff] %v3199_v62 }
 0x990   : > { %v3201_v58 = vpop.f32.mrf.mxu3 }
 0x991   : > { %v3202_v55 = vadd.f32 %v3201_v58, %v3173_v2 }
 0x993   : > { %3284 = vst [vmem:[%s6019_s29 + $0x78] sm:$0xff] %v3202_v55 }
 0x994 PF: > { %s19_s30 = sadd.s32 1, %s4045_s30  }
 0x995   : > { %p16_p4 = scmp.ge.s32.totalorder %s19_s30, 4  }
 0x997   :  { %18 = sbr.rel (!%p16_p4) target bundleno = 1 (0x1), region = 89 }

</bundles_post_ra>
